<compile_context>
chip_gen: v6e
topology: v6e:2x2x1
jax: 0.10.0
libtpu: 0.0.40
codegen_flags: <defaults>
</compile_context>

<pallas_src>
import numpy as np
import jax
import jax.numpy as jnp
from jax.experimental import pallas as pl
from jax.experimental.pallas import tpu as pltpu


COUT_PAD = 128       # lane-dense conv-output channel padding
HPAD = 128           # fc1 hidden padding (50 -> 128), lane-dense
N_POOL2 = 16         # 4x4 pooled spatial positions after conv2
TM_CONV_CAP = 1024   # max pooled-output rows per grid step (conv1 kernel)
TB_CAP = 64          # max samples per grid step (fused conv2+fc kernel)


# ------------------------------ Pallas kernels ------------------------------

def _conv_pool_relu_kernel(p_ref, w_ref, b_ref, o_ref):
    # p_ref: (4, tm, D) bf16 im2col patches, one slab per 2x2-pool position
    # w_ref: (D, 128)   bf16 conv weights, zero-padded out channels
    # b_ref: (1, 128)   f32  conv bias, zero-padded
    # o_ref: (tm, 128)  bf16 relu(maxpool(conv(x)) + b), lane-dense
    tm, d = p_ref.shape[1], p_ref.shape[2]
    p = p_ref[...].reshape(4 * tm, d)                     # one long MXU push
    acc = jnp.dot(p, w_ref[...], preferred_element_type=jnp.float32)
    acc = acc.reshape(4, tm, COUT_PAD)
    m = jnp.maximum(jnp.maximum(acc[0], acc[1]), jnp.maximum(acc[2], acc[3]))
    # Per-channel bias commutes with the 2x2 max; add after, relu, cast on store.
    o_ref[...] = jnp.maximum(m + b_ref[...], 0.0).astype(o_ref.dtype)


def _conv2_fc_kernel(p_ref, wc_ref, bc_ref, w1_ref, b1_ref, w2_ref, b2_ref,
                     o_ref):
    # Fused conv2 -> maxpool2 -> relu -> flatten -> fc1 -> relu -> fc2 for one
    # tile of tb samples (tb is a multiple of 8).
    #   p_ref : (4, 16*tb, 250) bf16  conv2 patches, rows ordered (pos, sample)
    #   wc_ref: (250, 128) bf16, bc_ref: (1, 128) f32   conv2 weight / bias
    #   w1_ref: (16, 128, 128) bf16   fc1 weights split per pool position
    #   b1_ref: (1, 128) f32, w2_ref: (1, 128) f32, b2_ref: (1, 1) f32
    #   o_ref : (tb, 1) f32
    rows, d = p_ref.shape[1], p_ref.shape[2]
    tb = rows // N_POOL2
    p = p_ref[...].reshape(4 * rows, d)                   # one long MXU push
    acc = jnp.dot(p, wc_ref[...], preferred_element_type=jnp.float32)
    acc = acc.reshape(4, rows, COUT_PAD)
    y2 = jnp.maximum(jnp.maximum(acc[0], acc[1]), jnp.maximum(acc[2], acc[3]))
    y2 = jnp.maximum(y2 + bc_ref[...], 0.0).astype(jnp.bfloat16)  # (16*tb,128)
    # TODO(synk): conv2_drop / F.dropout implemented in eval mode (identity).
    # fc1 as a sum of per-pool-position matmuls: avoids a lane-merging flatten
    # inside the kernel; slices are sublane-aligned since tb is a multiple of 8.
    h1 = jnp.zeros((tb, HPAD), jnp.float32)
    for pos in range(N_POOL2):
        blk = y2[pos * tb:(pos + 1) * tb, :]              # (tb, 128) bf16
        h1 = h1 + jnp.dot(blk, w1_ref[pos],
                          preferred_element_type=jnp.float32)
    h1 = jnp.maximum(h1 + b1_ref[...], 0.0)               # (tb, 128)
    # fc2 (50 -> 1): VPU multiply + lane reduction (no 1-column MXU matmul).
    out = jnp.sum(h1 * w2_ref[...], axis=-1, keepdims=True) + b2_ref[...]
    o_ref[...] = out.astype(o_ref.dtype)


# ------------------------------ pallas_call wrappers -------------------------

def _pick_tile(n, cap):
    """n itself if n <= cap, else the largest multiple-of-8 divisor of n <= cap."""
    if n <= cap:
        return n
    best = 8
    for t in range(8, cap + 1, 8):
        if n % t == 0:
            best = t
    return best


def _conv1_pool_relu(patches, w_mat, b_pad):
    _, m, d = patches.shape
    tm = _pick_tile(m, TM_CONV_CAP)
    return pl.pallas_call(
        _conv_pool_relu_kernel,
        out_shape=jax.ShapeDtypeStruct((m, COUT_PAD), jnp.bfloat16),
        grid_spec=pltpu.PrefetchScalarGridSpec(
            num_scalar_prefetch=0,
            grid=(m // tm,),
            in_specs=[
                pl.BlockSpec((4, tm, d), lambda i: (0, i, 0)),
                pl.BlockSpec((d, COUT_PAD), lambda i: (0, 0)),
                pl.BlockSpec((1, COUT_PAD), lambda i: (0, 0)),
            ],
            out_specs=pl.BlockSpec((tm, COUT_PAD), lambda i: (i, 0)),
        ),
        compiler_params=pltpu.CompilerParams(dimension_semantics=("parallel",)),
    )(patches, w_mat, b_pad)


def _conv2_fc(patches2, wc_mat, bc_pad, w1_3d, b1_pad, w2_pad, b2_pad, bp, tb):
    d = patches2.shape[2]
    rows = N_POOL2 * tb
    return pl.pallas_call(
        _conv2_fc_kernel,
        out_shape=jax.ShapeDtypeStruct((bp, 1), jnp.float32),
        grid_spec=pltpu.PrefetchScalarGridSpec(
            num_scalar_prefetch=0,
            grid=(bp // tb,),
            in_specs=[
                pl.BlockSpec((4, rows, d), lambda i: (0, i, 0)),
                pl.BlockSpec((d, COUT_PAD), lambda i: (0, 0)),
                pl.BlockSpec((1, COUT_PAD), lambda i: (0, 0)),
                pl.BlockSpec((N_POOL2, COUT_PAD, HPAD), lambda i: (0, 0, 0)),
                pl.BlockSpec((1, HPAD), lambda i: (0, 0)),
                pl.BlockSpec((1, HPAD), lambda i: (0, 0)),
                pl.BlockSpec((1, 1), lambda i: (0, 0)),
            ],
            out_specs=pl.BlockSpec((tb, 1), lambda i: (i, 0)),
        ),
        compiler_params=pltpu.CompilerParams(dimension_semantics=("parallel",)),
    )(patches2, wc_mat, bc_pad, w1_3d, b1_pad, w2_pad, b2_pad)


# ------------------------------ JAX glue -------------------------------------

def _im2col_pool_groups(x_nhwc, k):
    """KxK valid-conv patches grouped by 2x2-pool position.

    Returns (4, B*Hp*Wp, K*K*C); rows in (b, hp, wp) row-major order;
    patch feature order (kh, kw, cin)."""
    b, h, w, c = x_nhwc.shape
    ho, wo = h - k + 1, w - k + 1
    hp, wp = ho // 2, wo // 2
    wins = [x_nhwc[:, i:i + ho, j:j + wo, :] for i in range(k) for j in range(k)]
    patches = jnp.stack(wins, axis=3).reshape(b, ho, wo, k * k * c)
    patches = patches.reshape(b, hp, 2, wp, 2, k * k * c)
    patches = patches.transpose(2, 4, 0, 1, 3, 5)        # (dh, dw, b, hp, wp, D)
    return patches.reshape(4, b * hp * wp, k * k * c)


def _im2col_pool_groups_posmajor(x_nhwc, k, tb):
    """Same patches, but rows ordered (batch-tile, hp, wp, sample-in-tile) so the
    fused conv2+fc kernel can regroup per pool position with aligned slices."""
    b, h, w, c = x_nhwc.shape
    ho, wo = h - k + 1, w - k + 1
    hp, wp = ho // 2, wo // 2
    wins = [x_nhwc[:, i:i + ho, j:j + wo, :] for i in range(k) for j in range(k)]
    patches = jnp.stack(wins, axis=3).reshape(b, ho, wo, k * k * c)
    patches = patches.reshape(b // tb, tb, hp, 2, wp, 2, k * k * c)
    patches = patches.transpose(3, 5, 0, 2, 4, 1, 6)     # (dh, dw, t, hp, wp, bi, D)
    return patches.reshape(4, b * hp * wp, k * k * c)


def _conv_w_to_mat(w_oihw):
    # (O, I, Kh, Kw) -> (Kh*Kw*I, 128): (kh, kw, cin) row order, zero-padded cout.
    o, i, kh, kw = w_oihw.shape
    w = w_oihw.transpose(2, 3, 1, 0).reshape(kh * kw * i, o)
    return jnp.pad(w, ((0, 0), (0, COUT_PAD - o))).astype(jnp.bfloat16)


def _pad_bias(b):
    return jnp.pad(b, (0, COUT_PAD - b.shape[0])).reshape(1, COUT_PAD)


def _fc1_w_by_pos(fc1_w):
    # PyTorch flattens (B, 20, 4, 4) in (c, hp, wp) order.  Build per-position
    # blocks W1[pos, cin, h] = fc1_w[h, cin*16 + pos], zero-padded to
    # (16, 128, 128) so the contraction runs over the lane-padded channel dim.
    w = fc1_w.reshape(50, 20, 4, 4).transpose(2, 3, 1, 0).reshape(N_POOL2, 20, 50)
    w = jnp.pad(w, ((0, 0), (0, COUT_PAD - 20), (0, HPAD - 50)))
    return w.astype(jnp.bfloat16)


def net_binary_forward(x_nchw, params):
    b = x_nchw.shape[0]
    bp = ((b + 7) // 8) * 8                               # pad batch to a mult of 8
    x = jnp.transpose(x_nchw, (0, 2, 3, 1)).astype(jnp.bfloat16)   # NHWC bf16
    if bp != b:
        x = jnp.pad(x, ((0, bp - b), (0, 0), (0, 0), (0, 0)))

    # conv1(1->10, k5) -> maxpool2 -> relu   (one Pallas kernel, bf16 out)
    p1 = _im2col_pool_groups(x, 5)                        # (4, bp*144, 25) bf16
    y1 = _conv1_pool_relu(p1, _conv_w_to_mat(params["conv1_w"]),
                          _pad_bias(params["conv1_b"]))
    y1 = y1[:, :10].reshape(bp, 12, 12, 10)               # bf16 NHWC

    # conv2 -> dropout2d(eval) -> maxpool2 -> relu -> flatten -> fc1 -> relu
    # -> dropout(eval) -> fc2, fused into one kernel gridded over batch tiles.
    tb_cap = min(TB_CAP, bp // 2) if bp >= 16 else bp
    tb = _pick_tile(bp, tb_cap)
    p2 = _im2col_pool_groups_posmajor(y1, 5, tb)          # (4, bp*16, 250) bf16
    b1_pad = jnp.pad(params["fc1_b"], (0, HPAD - 50)).reshape(1, HPAD)
    w2_pad = jnp.pad(params["fc2_w"].reshape(-1), (0, HPAD - 50)).reshape(1, HPAD)
    b2_pad = params["fc2_b"].reshape(1, 1)
    out = _conv2_fc(p2, _conv_w_to_mat(params["conv2_w"]),
                    _pad_bias(params["conv2_b"]),
                    _fc1_w_by_pos(params["fc1_w"]),
                    b1_pad, w2_pad, b2_pad, bp, tb)
    return out[:b]


# ------------------------------ params & reference ---------------------------

def init_params(key):
    ks = jax.random.split(key, 8)

    def u(k, shape, fan_in):
        bound = 1.0 / np.sqrt(fan_in)
        return jax.random.uniform(k, shape, jnp.float32, -bound, bound)

    return dict(
        conv1_w=u(ks[0], (10, 1, 5, 5), 25),
        conv1_b=u(ks[1], (10,), 25),
        conv2_w=u(ks[2], (20, 10, 5, 5), 250),
        conv2_b=u(ks[3], (20,), 250),
        fc1_w=u(ks[4], (50, 320), 320),
        fc1_b=u(ks[5], (50,), 320),
        fc2_w=u(ks[6], (1, 50), 50),
        fc2_b=u(ks[7], (1,), 50),
    )


def reference_forward(x_nchw, params):
    dn = ("NCHW", "OIHW", "NCHW")
    y = jax.lax.conv_general_dilated(x_nchw, params["conv1_w"], (1, 1), "VALID",
                                     dimension_numbers=dn)
    y = y + params["conv1_b"][None, :, None, None]
    y = jax.lax.reduce_window(y, -jnp.inf, jax.lax.max, (1, 1, 2, 2), (1, 1, 2, 2), "VALID")
    y = jnp.maximum(y, 0.0)
    y = jax.lax.conv_general_dilated(y, params["conv2_w"], (1, 1), "VALID",
                                     dimension_numbers=dn)
    y = y + params["conv2_b"][None, :, None, None]
    y = jax.lax.reduce_window(y, -jnp.inf, jax.lax.max, (1, 1, 2, 2), (1, 1, 2, 2), "VALID")
    y = jnp.maximum(y, 0.0)
    y = y.reshape(y.shape[0], -1)
    y = jnp.maximum(y @ params["fc1_w"].T + params["fc1_b"], 0.0)
    return y @ params["fc2_w"].T + params["fc2_b"]


# ------------------------------ main -----------------------------------------

if __name__ == "__main__":
    key = jax.random.PRNGKey(0)
    k_x, k_p = jax.random.split(key)
    x = jax.random.normal(k_x, (2, 1, 28, 28), jnp.float32)   # MNIST-sized input
    params = init_params(k_p)

    forward = jax.jit(net_binary_forward)
    out = jax.block_until_ready(forward(x, params))
    assert out.shape == (2, 1), out.shape

    ref = jax.block_until_ready(reference_forward(x, params))
    # bf16 activations + bf16 MXU operands (f32 accumulate) vs f32 reference.
    np.testing.assert_allclose(np.asarray(out), np.asarray(ref), rtol=3e-2, atol=3e-2)

    print("KERNEL_OK")
</pallas_src>

<mosaic_0001>
module attributes {stable_mosaic.version = 11 : i64} {
  func.func @_conv_pool_relu_kernel(%arg0: i32, %arg1: memref<4x576x25xbf16, #tpu.memory_space<vmem>>, %arg2: memref<25x128xbf16, #tpu.memory_space<vmem>>, %arg3: memref<1x128xf32, #tpu.memory_space<vmem>>, %arg4: memref<576x128xbf16, #tpu.memory_space<vmem>>) attributes {dimension_semantics = [#tpu.dimension_semantics<parallel>], iteration_bounds = array<i64: 2>, scalar_prefetch = 0 : i64, scratch_operands = 0 : i64, tpu.core_type = #tpu.core_type<tc>, window_params = [{transform_indices = @transform_0, window_bounds = array<i64: 4, 576, 25>}, {pipeline_mode = #tpu.pipeline_mode<synchronous>, transform_indices = @transform_1, window_bounds = array<i64: 25, 128>}, {pipeline_mode = #tpu.pipeline_mode<synchronous>, transform_indices = @transform_2, window_bounds = array<i64: 1, 128>}, {transform_indices = @transform_3, window_bounds = array<i64: 576, 128>}]} {
    %c0 = arith.constant 0 : index
    %c0_0 = arith.constant 0 : index
    %c0_1 = arith.constant 0 : index
    %0 = vector.load %arg1[%c0, %c0_0, %c0_1] : memref<4x576x25xbf16, #tpu.memory_space<vmem>>, vector<4x576x25xbf16>
    %1 = vector.shape_cast %0 : vector<4x576x25xbf16> to vector<2304x25xbf16>
    %c0_2 = arith.constant 0 : index
    %c0_3 = arith.constant 0 : index
    %2 = vector.load %arg2[%c0_2, %c0_3] : memref<25x128xbf16, #tpu.memory_space<vmem>>, vector<25x128xbf16>
    %cst = arith.constant dense<0.000000e+00> : vector<2304x128xf32>
    %3 = tpu.matmul %1, %2, %cst {dimension_numbers = #tpu.dot_dimension_numbers<[1], [0], [0], [1], [0, 0, 1, 1], [], []>} : vector<2304x25xbf16>, vector<25x128xbf16>, vector<2304x128xf32> -> vector<2304x128xf32>
    %4 = vector.shape_cast %3 : vector<2304x128xf32> to vector<4x576x128xf32>
    %5 = vector.extract_strided_slice %4 {offsets = [0, 0, 0], sizes = [1, 576, 128], strides = [1, 1, 1]} : vector<4x576x128xf32> to vector<1x576x128xf32>
    %6 = vector.shape_cast %5 : vector<1x576x128xf32> to vector<576x128xf32>
    %7 = vector.extract_strided_slice %4 {offsets = [1, 0, 0], sizes = [1, 576, 128], strides = [1, 1, 1]} : vector<4x576x128xf32> to vector<1x576x128xf32>
    %8 = vector.shape_cast %7 : vector<1x576x128xf32> to vector<576x128xf32>
    %9 = arith.maximumf %6, %8 : vector<576x128xf32>
    %10 = vector.extract_strided_slice %4 {offsets = [2, 0, 0], sizes = [1, 576, 128], strides = [1, 1, 1]} : vector<4x576x128xf32> to vector<1x576x128xf32>
    %11 = vector.shape_cast %10 : vector<1x576x128xf32> to vector<576x128xf32>
    %12 = vector.extract_strided_slice %4 {offsets = [3, 0, 0], sizes = [1, 576, 128], strides = [1, 1, 1]} : vector<4x576x128xf32> to vector<1x576x128xf32>
    %13 = vector.shape_cast %12 : vector<1x576x128xf32> to vector<576x128xf32>
    %14 = arith.maximumf %11, %13 : vector<576x128xf32>
    %15 = arith.maximumf %9, %14 : vector<576x128xf32>
    %c0_4 = arith.constant 0 : index
    %c0_5 = arith.constant 0 : index
    %16 = vector.load %arg3[%c0_4, %c0_5] : memref<1x128xf32, #tpu.memory_space<vmem>>, vector<1x128xf32>
    %17 = vector.broadcast %16 : vector<1x128xf32> to vector<576x128xf32>
    %18 = arith.addf %15, %17 : vector<576x128xf32>
    %cst_6 = arith.constant 0.000000e+00 : f32
    %19 = vector.broadcast %cst_6 : f32 to vector<576x128xf32>
    %20 = arith.maximumf %18, %19 : vector<576x128xf32>
    %21 = arith.truncf %20 : vector<576x128xf32> to vector<576x128xbf16>
    %c0_7 = arith.constant 0 : index
    %c0_8 = arith.constant 0 : index
    %22 = vector.load %arg4[%c0_7, %c0_8] : memref<576x128xbf16, #tpu.memory_space<vmem>>, vector<576x128xbf16>
    tpu.vector_store %arg4[%c0_7, %c0_8], %21 {strides = array<i32>} : memref<576x128xbf16, #tpu.memory_space<vmem>>, vector<576x128xbf16>,
    return
  }
  func.func @transform_0(%arg0: i32) -> (i32, i32, i32) {
    %c0_i32 = arith.constant 0 : i32
    %c0_i32_0 = arith.constant 0 : i32
    %c0_i32_1 = arith.constant 0 : i32
    return %c0_i32, %arg0, %c0_i32_0 : i32, i32, i32
  }
  func.func @transform_1(%arg0: i32) -> (i32, i32) {
    %c0_i32 = arith.constant 0 : i32
    %c0_i32_0 = arith.constant 0 : i32
    %c0_i32_1 = arith.constant 0 : i32
    return %c0_i32, %c0_i32_0 : i32, i32
  }
  func.func @transform_2(%arg0: i32) -> (i32, i32) {
    %c0_i32 = arith.constant 0 : i32
    %c0_i32_0 = arith.constant 0 : i32
    %c0_i32_1 = arith.constant 0 : i32
    return %c0_i32, %c0_i32_0 : i32, i32
  }
  func.func @transform_3(%arg0: i32) -> (i32, i32) {
    %c0_i32 = arith.constant 0 : i32
    %c0_i32_0 = arith.constant 0 : i32
    return %arg0, %c0_i32 : i32, i32
  }
}

module attributes {stable_mosaic.version = 11 : i64} {
  func.func @_conv2_fc_kernel(%arg0: i32, %arg1: memref<4x128x250xbf16, #tpu.memory_space<vmem>>, %arg2: memref<250x128xbf16, #tpu.memory_space<vmem>>, %arg3: memref<1x128xf32, #tpu.memory_space<vmem>>, %arg4: memref<16x128x128xbf16, #tpu.memory_space<vmem>>, %arg5: memref<1x128xf32, #tpu.memory_space<vmem>>, %arg6: memref<1x128xf32, #tpu.memory_space<vmem>>, %arg7: memref<1x1xf32, #tpu.memory_space<vmem>>, %arg8: memref<8x1xf32, #tpu.memory_space<vmem>>) attributes {dimension_semantics = [#tpu.dimension_semantics<parallel>], iteration_bounds = array<i64: 1>, scalar_prefetch = 0 : i64, scratch_operands = 0 : i64, tpu.core_type = #tpu.core_type<tc>, window_params = [{transform_indices = @transform_0, window_bounds = array<i64: 4, 128, 250>}, {pipeline_mode = #tpu.pipeline_mode<synchronous>, transform_indices = @transform_1, window_bounds = array<i64: 250, 128>}, {pipeline_mode = #tpu.pipeline_mode<synchronous>, transform_indices = @transform_2, window_bounds = array<i64: 1, 128>}, {pipeline_mode = #tpu.pipeline_mode<synchronous>, transform_indices = @transform_3, window_bounds = array<i64: 16, 128, 128>}, {pipeline_mode = #tpu.pipeline_mode<synchronous>, transform_indices = @transform_4, window_bounds = array<i64: 1, 128>}, {pipeline_mode = #tpu.pipeline_mode<synchronous>, transform_indices = @transform_5, window_bounds = array<i64: 1, 128>}, {pipeline_mode = #tpu.pipeline_mode<synchronous>, transform_indices = @transform_6, window_bounds = array<i64: 1, 1>}, {transform_indices = @transform_7, window_bounds = array<i64: 8, 1>}]} {
    %c0 = arith.constant 0 : index
    %c0_0 = arith.constant 0 : index
    %c0_1 = arith.constant 0 : index
    %0 = vector.load %arg1[%c0, %c0_0, %c0_1] : memref<4x128x250xbf16, #tpu.memory_space<vmem>>, vector<4x128x250xbf16>
    %1 = vector.shape_cast %0 : vector<4x128x250xbf16> to vector<512x250xbf16>
    %c0_2 = arith.constant 0 : index
    %c0_3 = arith.constant 0 : index
    %2 = vector.load %arg2[%c0_2, %c0_3] : memref<250x128xbf16, #tpu.memory_space<vmem>>, vector<250x128xbf16>
    %cst = arith.constant dense<0.000000e+00> : vector<512x128xf32>
    %3 = tpu.matmul %1, %2, %cst {dimension_numbers = #tpu.dot_dimension_numbers<[1], [0], [0], [1], [0, 0, 1, 1], [], []>} : vector<512x250xbf16>, vector<250x128xbf16>, vector<512x128xf32> -> vector<512x128xf32>
    %4 = vector.shape_cast %3 : vector<512x128xf32> to vector<4x128x128xf32>
    %5 = vector.extract_strided_slice %4 {offsets = [0, 0, 0], sizes = [1, 128, 128], strides = [1, 1, 1]} : vector<4x128x128xf32> to vector<1x128x128xf32>
    %6 = vector.shape_cast %5 : vector<1x128x128xf32> to vector<128x128xf32>
    %7 = vector.extract_strided_slice %4 {offsets = [1, 0, 0], sizes = [1, 128, 128], strides = [1, 1, 1]} : vector<4x128x128xf32> to vector<1x128x128xf32>
    %8 = vector.shape_cast %7 : vector<1x128x128xf32> to vector<128x128xf32>
    %9 = arith.maximumf %6, %8 : vector<128x128xf32>
    %10 = vector.extract_strided_slice %4 {offsets = [2, 0, 0], sizes = [1, 128, 128], strides = [1, 1, 1]} : vector<4x128x128xf32> to vector<1x128x128xf32>
    %11 = vector.shape_cast %10 : vector<1x128x128xf32> to vector<128x128xf32>
    %12 = vector.extract_strided_slice %4 {offsets = [3, 0, 0], sizes = [1, 128, 128], strides = [1, 1, 1]} : vector<4x128x128xf32> to vector<1x128x128xf32>
    %13 = vector.shape_cast %12 : vector<1x128x128xf32> to vector<128x128xf32>
    %14 = arith.maximumf %11, %13 : vector<128x128xf32>
    %15 = arith.maximumf %9, %14 : vector<128x128xf32>
    %c0_4 = arith.constant 0 : index
    %c0_5 = arith.constant 0 : index
    %16 = vector.load %arg3[%c0_4, %c0_5] : memref<1x128xf32, #tpu.memory_space<vmem>>, vector<1x128xf32>
    %17 = vector.broadcast %16 : vector<1x128xf32> to vector<128x128xf32>
    %18 = arith.addf %15, %17 : vector<128x128xf32>
    %cst_6 = arith.constant 0.000000e+00 : f32
    %19 = vector.broadcast %cst_6 : f32 to vector<128x128xf32>
    %20 = arith.maximumf %18, %19 : vector<128x128xf32>
    %21 = arith.truncf %20 : vector<128x128xf32> to vector<128x128xbf16>
    %cst_7 = arith.constant 0.000000e+00 : f32
    %22 = vector.broadcast %cst_7 : f32 to vector<8x128xf32>
    %23 = vector.extract_strided_slice %21 {offsets = [0, 0], sizes = [8, 128], strides = [1, 1]} : vector<128x128xbf16> to vector<8x128xbf16>
    %c0_8 = arith.constant 0 : index
    %c0_9 = arith.constant 0 : index
    %c0_10 = arith.constant 0 : index
    %24 = vector.load %arg4[%c0_8, %c0_9, %c0_10] : memref<16x128x128xbf16, #tpu.memory_space<vmem>>, vector<1x128x128xbf16>
    %25 = vector.shape_cast %24 : vector<1x128x128xbf16> to vector<128x128xbf16>
    %cst_11 = arith.constant dense<0.000000e+00> : vector<8x128xf32>
    %26 = tpu.matmul %23, %25, %cst_11 {dimension_numbers = #tpu.dot_dimension_numbers<[1], [0], [0], [1], [0, 0, 1, 1], [], []>} : vector<8x128xbf16>, vector<128x128xbf16>, vector<8x128xf32> -> vector<8x128xf32>
    %27 = arith.addf %22, %26 : vector<8x128xf32>
    %28 = vector.extract_strided_slice %21 {offsets = [8, 0], sizes = [8, 128], strides = [1, 1]} : vector<128x128xbf16> to vector<8x128xbf16>
    %c1 = arith.constant 1 : index
    %c0_12 = arith.constant 0 : index
    %c0_13 = arith.constant 0 : index
    %29 = vector.load %arg4[%c1, %c0_12, %c0_13] : memref<16x128x128xbf16, #tpu.memory_space<vmem>>, vector<1x128x128xbf16>
    %30 = vector.shape_cast %29 : vector<1x128x128xbf16> to vector<128x128xbf16>
    %cst_14 = arith.constant dense<0.000000e+00> : vector<8x128xf32>
    %31 = tpu.matmul %28, %30, %cst_14 {dimension_numbers = #tpu.dot_dimension_numbers<[1], [0], [0], [1], [0, 0, 1, 1], [], []>} : vector<8x128xbf16>, vector<128x128xbf16>, vector<8x128xf32> -> vector<8x128xf32>
    %32 = arith.addf %27, %31 : vector<8x128xf32>
    %33 = vector.extract_strided_slice %21 {offsets = [16, 0], sizes = [8, 128], strides = [1, 1]} : vector<128x128xbf16> to vector<8x128xbf16>
    %c2 = arith.constant 2 : index
    %c0_15 = arith.constant 0 : index
    %c0_16 = arith.constant 0 : index
    %34 = vector.load %arg4[%c2, %c0_15, %c0_16] : memref<16x128x128xbf16, #tpu.memory_space<vmem>>, vector<1x128x128xbf16>
    %35 = vector.shape_cast %34 : vector<1x128x128xbf16> to vector<128x128xbf16>
    %cst_17 = arith.constant dense<0.000000e+00> : vector<8x128xf32>
    %36 = tpu.matmul %33, %35, %cst_17 {dimension_numbers = #tpu.dot_dimension_numbers<[1], [0], [0], [1], [0, 0, 1, 1], [], []>} : vector<8x128xbf16>, vector<128x128xbf16>, vector<8x128xf32> -> vector<8x128xf32>
    %37 = arith.addf %32, %36 : vector<8x128xf32>
    %38 = vector.extract_strided_slice %21 {offsets = [24, 0], sizes = [8, 128], strides = [1, 1]} : vector<128x128xbf16> to vector<8x128xbf16>
    %c3 = arith.constant 3 : index
    %c0_18 = arith.constant 0 : index
    %c0_19 = arith.constant 0 : index
    %39 = vector.load %arg4[%c3, %c0_18, %c0_19] : memref<16x128x128xbf16, #tpu.memory_space<vmem>>, vector<1x128x128xbf16>
    %40 = vector.shape_cast %39 : vector<1x128x128xbf16> to vector<128x128xbf16>
    %cst_20 = arith.constant dense<0.000000e+00> : vector<8x128xf32>
    %41 = tpu.matmul %38, %40, %cst_20 {dimension_numbers = #tpu.dot_dimension_numbers<[1], [0], [0], [1], [0, 0, 1, 1], [], []>} : vector<8x128xbf16>, vector<128x128xbf16>, vector<8x128xf32> -> vector<8x128xf32>
    %42 = arith.addf %37, %41 : vector<8x128xf32>
    %43 = vector.extract_strided_slice %21 {offsets = [32, 0], sizes = [8, 128], strides = [1, 1]} : vector<128x128xbf16> to vector<8x128xbf16>
    %c4 = arith.constant 4 : index
    %c0_21 = arith.constant 0 : index
    %c0_22 = arith.constant 0 : index
    %44 = vector.load %arg4[%c4, %c0_21, %c0_22] : memref<16x128x128xbf16, #tpu.memory_space<vmem>>, vector<1x128x128xbf16>
    %45 = vector.shape_cast %44 : vector<1x128x128xbf16> to vector<128x128xbf16>
    %cst_23 = arith.constant dense<0.000000e+00> : vector<8x128xf32>
    %46 = tpu.matmul %43, %45, %cst_23 {dimension_numbers = #tpu.dot_dimension_numbers<[1], [0], [0], [1], [0, 0, 1, 1], [], []>} : vector<8x128xbf16>, vector<128x128xbf16>, vector<8x128xf32> -> vector<8x128xf32>
    %47 = arith.addf %42, %46 : vector<8x128xf32>
    %48 = vector.extract_strided_slice %21 {offsets = [40, 0], sizes = [8, 128], strides = [1, 1]} : vector<128x128xbf16> to vector<8x128xbf16>
    %c5 = arith.constant 5 : index
    %c0_24 = arith.constant 0 : index
    %c0_25 = arith.constant 0 : index
    %49 = vector.load %arg4[%c5, %c0_24, %c0_25] : memref<16x128x128xbf16, #tpu.memory_space<vmem>>, vector<1x128x128xbf16>
    %50 = vector.shape_cast %49 : vector<1x128x128xbf16> to vector<128x128xbf16>
    %cst_26 = arith.constant dense<0.000000e+00> : vector<8x128xf32>
    %51 = tpu.matmul %48, %50, %cst_26 {dimension_numbers = #tpu.dot_dimension_numbers<[1], [0], [0], [1], [0, 0, 1, 1], [], []>} : vector<8x128xbf16>, vector<128x128xbf16>, vector<8x128xf32> -> vector<8x128xf32>
    %52 = arith.addf %47, %51 : vector<8x128xf32>
    %53 = vector.extract_strided_slice %21 {offsets = [48, 0], sizes = [8, 128], strides = [1, 1]} : vector<128x128xbf16> to vector<8x128xbf16>
    %c6 = arith.constant 6 : index
    %c0_27 = arith.constant 0 : index
    %c0_28 = arith.constant 0 : index
    %54 = vector.load %arg4[%c6, %c0_27, %c0_28] : memref<16x128x128xbf16, #tpu.memory_space<vmem>>, vector<1x128x128xbf16>
    %55 = vector.shape_cast %54 : vector<1x128x128xbf16> to vector<128x128xbf16>
    %cst_29 = arith.constant dense<0.000000e+00> : vector<8x128xf32>
    %56 = tpu.matmul %53, %55, %cst_29 {dimension_numbers = #tpu.dot_dimension_numbers<[1], [0], [0], [1], [0, 0, 1, 1], [], []>} : vector<8x128xbf16>, vector<128x128xbf16>, vector<8x128xf32> -> vector<8x128xf32>
    %57 = arith.addf %52, %56 : vector<8x128xf32>
    %58 = vector.extract_strided_slice %21 {offsets = [56, 0], sizes = [8, 128], strides = [1, 1]} : vector<128x128xbf16> to vector<8x128xbf16>
    %c7 = arith.constant 7 : index
    %c0_30 = arith.constant 0 : index
    %c0_31 = arith.constant 0 : index
    %59 = vector.load %arg4[%c7, %c0_30, %c0_31] : memref<16x128x128xbf16, #tpu.memory_space<vmem>>, vector<1x128x128xbf16>
    %60 = vector.shape_cast %59 : vector<1x128x128xbf16> to vector<128x128xbf16>
    %cst_32 = arith.constant dense<0.000000e+00> : vector<8x128xf32>
    %61 = tpu.matmul %58, %60, %cst_32 {dimension_numbers = #tpu.dot_dimension_numbers<[1], [0], [0], [1], [0, 0, 1, 1], [], []>} : vector<8x128xbf16>, vector<128x128xbf16>, vector<8x128xf32> -> vector<8x128xf32>
    %62 = arith.addf %57, %61 : vector<8x128xf32>
    %63 = vector.extract_strided_slice %21 {offsets = [64, 0], sizes = [8, 128], strides = [1, 1]} : vector<128x128xbf16> to vector<8x128xbf16>
    %c8 = arith.constant 8 : index
    %c0_33 = arith.constant 0 : index
    %c0_34 = arith.constant 0 : index
    %64 = vector.load %arg4[%c8, %c0_33, %c0_34] : memref<16x128x128xbf16, #tpu.memory_space<vmem>>, vector<1x128x128xbf16>
    %65 = vector.shape_cast %64 : vector<1x128x128xbf16> to vector<128x128xbf16>
    %cst_35 = arith.constant dense<0.000000e+00> : vector<8x128xf32>
    %66 = tpu.matmul %63, %65, %cst_35 {dimension_numbers = #tpu.dot_dimension_numbers<[1], [0], [0], [1], [0, 0, 1, 1], [], []>} : vector<8x128xbf16>, vector<128x128xbf16>, vector<8x128xf32> -> vector<8x128xf32>
    %67 = arith.addf %62, %66 : vector<8x128xf32>
    %68 = vector.extract_strided_slice %21 {offsets = [72, 0], sizes = [8, 128], strides = [1, 1]} : vector<128x128xbf16> to vector<8x128xbf16>
    %c9 = arith.constant 9 : index
    %c0_36 = arith.constant 0 : index
    %c0_37 = arith.constant 0 : index
    %69 = vector.load %arg4[%c9, %c0_36, %c0_37] : memref<16x128x128xbf16, #tpu.memory_space<vmem>>, vector<1x128x128xbf16>
    %70 = vector.shape_cast %69 : vector<1x128x128xbf16> to vector<128x128xbf16>
    %cst_38 = arith.constant dense<0.000000e+00> : vector<8x128xf32>
    %71 = tpu.matmul %68, %70, %cst_38 {dimension_numbers = #tpu.dot_dimension_numbers<[1], [0], [0], [1], [0, 0, 1, 1], [], []>} : vector<8x128xbf16>, vector<128x128xbf16>, vector<8x128xf32> -> vector<8x128xf32>
    %72 = arith.addf %67, %71 : vector<8x128xf32>
    %73 = vector.extract_strided_slice %21 {offsets = [80, 0], sizes = [8, 128], strides = [1, 1]} : vector<128x128xbf16> to vector<8x128xbf16>
    %c10 = arith.constant 10 : index
    %c0_39 = arith.constant 0 : index
    %c0_40 = arith.constant 0 : index
    %74 = vector.load %arg4[%c10, %c0_39, %c0_40] : memref<16x128x128xbf16, #tpu.memory_space<vmem>>, vector<1x128x128xbf16>
    %75 = vector.shape_cast %74 : vector<1x128x128xbf16> to vector<128x128xbf16>
    %cst_41 = arith.constant dense<0.000000e+00> : vector<8x128xf32>
    %76 = tpu.matmul %73, %75, %cst_41 {dimension_numbers = #tpu.dot_dimension_numbers<[1], [0], [0], [1], [0, 0, 1, 1], [], []>} : vector<8x128xbf16>, vector<128x128xbf16>, vector<8x128xf32> -> vector<8x128xf32>
    %77 = arith.addf %72, %76 : vector<8x128xf32>
    %78 = vector.extract_strided_slice %21 {offsets = [88, 0], sizes = [8, 128], strides = [1, 1]} : vector<128x128xbf16> to vector<8x128xbf16>
    %c11 = arith.constant 11 : index
    %c0_42 = arith.constant 0 : index
    %c0_43 = arith.constant 0 : index
    %79 = vector.load %arg4[%c11, %c0_42, %c0_43] : memref<16x128x128xbf16, #tpu.memory_space<vmem>>, vector<1x128x128xbf16>
    %80 = vector.shape_cast %79 : vector<1x128x128xbf16> to vector<128x128xbf16>
    %cst_44 = arith.constant dense<0.000000e+00> : vector<8x128xf32>
    %81 = tpu.matmul %78, %80, %cst_44 {dimension_numbers = #tpu.dot_dimension_numbers<[1], [0], [0], [1], [0, 0, 1, 1], [], []>} : vector<8x128xbf16>, vector<128x128xbf16>, vector<8x128xf32> -> vector<8x128xf32>
    %82 = arith.addf %77, %81 : vector<8x128xf32>
    %83 = vector.extract_strided_slice %21 {offsets = [96, 0], sizes = [8, 128], strides = [1, 1]} : vector<128x128xbf16> to vector<8x128xbf16>
    %c12 = arith.constant 12 : index
    %c0_45 = arith.constant 0 : index
    %c0_46 = arith.constant 0 : index
    %84 = vector.load %arg4[%c12, %c0_45, %c0_46] : memref<16x128x128xbf16, #tpu.memory_space<vmem>>, vector<1x128x128xbf16>
    %85 = vector.shape_cast %84 : vector<1x128x128xbf16> to vector<128x128xbf16>
    %cst_47 = arith.constant dense<0.000000e+00> : vector<8x128xf32>
    %86 = tpu.matmul %83, %85, %cst_47 {dimension_numbers = #tpu.dot_dimension_numbers<[1], [0], [0], [1], [0, 0, 1, 1], [], []>} : vector<8x128xbf16>, vector<128x128xbf16>, vector<8x128xf32> -> vector<8x128xf32>
    %87 = arith.addf %82, %86 : vector<8x128xf32>
    %88 = vector.extract_strided_slice %21 {offsets = [104, 0], sizes = [8, 128], strides = [1, 1]} : vector<128x128xbf16> to vector<8x128xbf16>
    %c13 = arith.constant 13 : index
    %c0_48 = arith.constant 0 : index
    %c0_49 = arith.constant 0 : index
    %89 = vector.load %arg4[%c13, %c0_48, %c0_49] : memref<16x128x128xbf16, #tpu.memory_space<vmem>>, vector<1x128x128xbf16>
    %90 = vector.shape_cast %89 : vector<1x128x128xbf16> to vector<128x128xbf16>
    %cst_50 = arith.constant dense<0.000000e+00> : vector<8x128xf32>
    %91 = tpu.matmul %88, %90, %cst_50 {dimension_numbers = #tpu.dot_dimension_numbers<[1], [0], [0], [1], [0, 0, 1, 1], [], []>} : vector<8x128xbf16>, vector<128x128xbf16>, vector<8x128xf32> -> vector<8x128xf32>
    %92 = arith.addf %87, %91 : vector<8x128xf32>
    %93 = vector.extract_strided_slice %21 {offsets = [112, 0], sizes = [8, 128], strides = [1, 1]} : vector<128x128xbf16> to vector<8x128xbf16>
    %c14 = arith.constant 14 : index
    %c0_51 = arith.constant 0 : index
    %c0_52 = arith.constant 0 : index
    %94 = vector.load %arg4[%c14, %c0_51, %c0_52] : memref<16x128x128xbf16, #tpu.memory_space<vmem>>, vector<1x128x128xbf16>
    %95 = vector.shape_cast %94 : vector<1x128x128xbf16> to vector<128x128xbf16>
    %cst_53 = arith.constant dense<0.000000e+00> : vector<8x128xf32>
    %96 = tpu.matmul %93, %95, %cst_53 {dimension_numbers = #tpu.dot_dimension_numbers<[1], [0], [0], [1], [0, 0, 1, 1], [], []>} : vector<8x128xbf16>, vector<128x128xbf16>, vector<8x128xf32> -> vector<8x128xf32>
    %97 = arith.addf %92, %96 : vector<8x128xf32>
    %98 = vector.extract_strided_slice %21 {offsets = [120, 0], sizes = [8, 128], strides = [1, 1]} : vector<128x128xbf16> to vector<8x128xbf16>
    %c15 = arith.constant 15 : index
    %c0_54 = arith.constant 0 : index
    %c0_55 = arith.constant 0 : index
    %99 = vector.load %arg4[%c15, %c0_54, %c0_55] : memref<16x128x128xbf16, #tpu.memory_space<vmem>>, vector<1x128x128xbf16>
    %100 = vector.shape_cast %99 : vector<1x128x128xbf16> to vector<128x128xbf16>
    %cst_56 = arith.constant dense<0.000000e+00> : vector<8x128xf32>
    %101 = tpu.matmul %98, %100, %cst_56 {dimension_numbers = #tpu.dot_dimension_numbers<[1], [0], [0], [1], [0, 0, 1, 1], [], []>} : vector<8x128xbf16>, vector<128x128xbf16>, vector<8x128xf32> -> vector<8x128xf32>
    %102 = arith.addf %97, %101 : vector<8x128xf32>
    %c0_57 = arith.constant 0 : index
    %c0_58 = arith.constant 0 : index
    %103 = vector.load %arg5[%c0_57, %c0_58] : memref<1x128xf32, #tpu.memory_space<vmem>>, vector<1x128xf32>
    %104 = vector.broadcast %103 : vector<1x128xf32> to vector<8x128xf32>
    %105 = arith.addf %102, %104 : vector<8x128xf32>
    %cst_59 = arith.constant 0.000000e+00 : f32
    %106 = vector.broadcast %cst_59 : f32 to vector<8x128xf32>
    %107 = arith.maximumf %105, %106 : vector<8x128xf32>
    %c0_60 = arith.constant 0 : index
    %c0_61 = arith.constant 0 : index
    %108 = vector.load %arg6[%c0_60, %c0_61] : memref<1x128xf32, #tpu.memory_space<vmem>>, vector<1x128xf32>
    %109 = vector.broadcast %108 : vector<1x128xf32> to vector<8x128xf32>
    %110 = arith.mulf %107, %109 : vector<8x128xf32>
    %cst_62 = arith.constant dense<0.000000e+00> : vector<8xf32>
    %111 = vector.multi_reduction <add>, %110, %cst_62 [1] : vector<8x128xf32> to vector<8xf32>
    %112 = vector.shape_cast %111 : vector<8xf32> to vector<8x1xf32>
    %c0_63 = arith.constant 0 : index
    %c0_64 = arith.constant 0 : index
    %113 = vector.load %arg7[%c0_63, %c0_64] : memref<1x1xf32, #tpu.memory_space<vmem>>, vector<1x1xf32>
    %114 = vector.broadcast %113 : vector<1x1xf32> to vector<8x1xf32>
    %115 = arith.addf %112, %114 : vector<8x1xf32>
    %c0_65 = arith.constant 0 : index
    %c0_66 = arith.constant 0 : index
    %116 = vector.load %arg8[%c0_65, %c0_66] : memref<8x1xf32, #tpu.memory_space<vmem>>, vector<8x1xf32>
    tpu.vector_store %arg8[%c0_65, %c0_66], %115 {strides = array<i32>} : memref<8x1xf32, #tpu.memory_space<vmem>>, vector<8x1xf32>,
    return
  }
  func.func @transform_0(%arg0: i32) -> (i32, i32, i32) {
    %c0_i32 = arith.constant 0 : i32
    %c0_i32_0 = arith.constant 0 : i32
    %c0_i32_1 = arith.constant 0 : i32
    return %c0_i32, %arg0, %c0_i32_0 : i32, i32, i32
  }
  func.func @transform_1(%arg0: i32) -> (i32, i32) {
    %c0_i32 = arith.constant 0 : i32
    %c0_i32_0 = arith.constant 0 : i32
    %c0_i32_1 = arith.constant 0 : i32
    return %c0_i32, %c0_i32_0 : i32, i32
  }
  func.func @transform_2(%arg0: i32) -> (i32, i32) {
    %c0_i32 = arith.constant 0 : i32
    %c0_i32_0 = arith.constant 0 : i32
    %c0_i32_1 = arith.constant 0 : i32
    return %c0_i32, %c0_i32_0 : i32, i32
  }
  func.func @transform_3(%arg0: i32) -> (i32, i32, i32) {
    %c0_i32 = arith.constant 0 : i32
    %c0_i32_0 = arith.constant 0 : i32
    %c0_i32_1 = arith.constant 0 : i32
    %c0_i32_2 = arith.constant 0 : i32
    return %c0_i32, %c0_i32_0, %c0_i32_1 : i32, i32, i32
  }
  func.func @transform_4(%arg0: i32) -> (i32, i32) {
    %c0_i32 = arith.constant 0 : i32
    %c0_i32_0 = arith.constant 0 : i32
    %c0_i32_1 = arith.constant 0 : i32
    return %c0_i32, %c0_i32_0 : i32, i32
  }
  func.func @transform_5(%arg0: i32) -> (i32, i32) {
    %c0_i32 = arith.constant 0 : i32
    %c0_i32_0 = arith.constant 0 : i32
    %c0_i32_1 = arith.constant 0 : i32
    return %c0_i32, %c0_i32_0 : i32, i32
  }
  func.func @transform_6(%arg0: i32) -> (i32, i32) {
    %c0_i32 = arith.constant 0 : i32
    %c0_i32_0 = arith.constant 0 : i32
    %c0_i32_1 = arith.constant 0 : i32
    return %c0_i32, %c0_i32_0 : i32, i32
  }
  func.func @transform_7(%arg0: i32) -> (i32, i32) {
    %c0_i32 = arith.constant 0 : i32
    %c0_i32_0 = arith.constant 0 : i32
    return %arg0, %c0_i32 : i32, i32
  }
}

</mosaic_0001>

<bundles_post_ra>
// kernel: net_binary_forward.2
= control target key start
LH: loop header
LB: loop body
LE: loop exit
PB: predicated region body
PF: predicated region fallthrough
CT: control target
= control target key end

     0   :  { %s6124_s12 = smov 0   ;;  %s6126_s13 = smov 0   ;;  %s7306_s0 = inlined_call_operand.vmem [shape: bf16[4,1152,25], index: 0, kind: input, shape index: {}]   ;;  %s7307_s1 = inlined_call_operand.vmem [shape: bf16[25,128], index: 1, kind: input, shape index: {}]   ;;  %s7308_s2 = inlined_call_operand.vmem [shape: f32[1,128], index: 2, kind: input, shape index: {}]   ;;  %s7309_s3 = inlined_call_operand.vmem [shape: bf16[1152,128], index: 3, kind: output, shape index: {}]  }
   0x1   :  { %s6128_s14 = smov 0  }
   0x2 LB: > { %s4803_s15 = sadd.s32 4294967295, %s6101_s14   ;;  %s6141_s16 = sadd.s32 1, %s6101_s14   ;;  %s6101_s14 = sphi %s6128_s14, %s7500_s14   ;;  %s6097_s13 = sphi %s6126_s13, %s7499_s13   ;;  %s6093_s12 = sphi %s6124_s12, %s7498_s12  }
   0x3   : > { %s17_s17 = ssub.s32 %s6101_s14, %s6141_s16  ;;  %s20_s18 = sadd.s32 1, %s6097_s13 }
   0x4   : > { %p18_p0 = scmp.eq.s32.totalorder %s17_s17, 0  ;;  %p27_p1 = scmp.ne.s32.totalorder %s6097_s13, %s6093_s12 }
   0x5   : > { %p28_p2 = scmp.eq.s32.totalorder %s6101_s14, 0  ;;  %p4806_p4 = scmp.ge.s32.totalorder %s6101_s14, 2 }
   0x6   : > { %s6150_s19 = scalar_select %p18_p0, %s6097_s13, %s20_s18  }
   0x7   : > { %p29_p3 = por %p28_p2, %p27_p1  ;;  %127 = sbr.rel (%p4806_p4) target bundleno = 89 (0x59), region = 24 }
   0xc   : > { %130 = sbr.rel (!%p29_p3) target bundleno = 89 (0x59), region = 28  ;;  %s132_s20 = sand.u32 (%p29_p3), 1, %s6097_s13  }
   0xd   : > { %s5175_s21 = smul.u32 (%p29_p3), 288, %s6101_s14 }
   0xe   : > { %s5905_s22 = smul.u32 (%p29_p3), 1152, %s132_s20 }
   0xf   : > { %s6158_s25 = scalar_lea.vmem (%p29_p3), %s7306_s0, %s5175_s21 }
  0x10   : > { %v154_v0 = vld [vmem:[%s6158_s25] sm:$0xff] (%p29_p3)   ;;  %v158_v1 = vld [vmem:[%s6158_s25 + $0x8] sm:$0xff] (%p29_p3)   ;;  %v162_v2 = vld [vmem:[%s6158_s25 + $0x10] sm:$0xff] (%p29_p3)   ;;  %s6163_s26 = scalar_lea.vmem (%p29_p3), [#allocation2], %s5905_s22 }
  0x11   : > { %155 = vst [vmem:[%s6163_s26] sm:$0xff] %v154_v0   ;;  %159 = vst [vmem:[%s6163_s26 + $0x8] sm:$0xff] %v158_v1   ;;  %v166_v3 = vld [vmem:[%s6158_s25 + $0x18] sm:$0xff]   ;;  %v170_v4 = vld [vmem:[%s6158_s25 + $0x20] sm:$0xff]  }
  0x12   : > { %163 = vst [vmem:[%s6163_s26 + $0x10] sm:$0xff] %v162_v2   ;;  %v174_v5 = vld [vmem:[%s6158_s25 + $0x28] sm:$0xff]   ;;  %167 = vst [vmem:[%s6163_s26 + $0x18] sm:$0xff] %v166_v3   ;;  %v178_v6 = vld [vmem:[%s6158_s25 + $0x30] sm:$0xff]  }
  0x13   : > { %171 = vst [vmem:[%s6163_s26 + $0x20] sm:$0xff] %v170_v4   ;;  %175 = vst [vmem:[%s6163_s26 + $0x28] sm:$0xff] %v174_v5   ;;  %v182_v7 = vld [vmem:[%s6158_s25 + $0x38] sm:$0xff]   ;;  %v186_v8 = vld [vmem:[%s6158_s25 + $0x40] sm:$0xff]  }
  0x14   : > { %179 = vst [vmem:[%s6163_s26 + $0x30] sm:$0xff] %v178_v6   ;;  %183 = vst [vmem:[%s6163_s26 + $0x38] sm:$0xff] %v182_v7   ;;  %v190_v9 = vld [vmem:[%s6158_s25 + $0x48] sm:$0xff]   ;;  %v194_v10 = vld [vmem:[%s6158_s25 + $0x50] sm:$0xff]  }
  0x15   : > { %187 = vst [vmem:[%s6163_s26 + $0x40] sm:$0xff] %v186_v8   ;;  %v198_v11 = vld [vmem:[%s6158_s25 + $0x58] sm:$0xff]   ;;  %191 = vst [vmem:[%s6163_s26 + $0x48] sm:$0xff] %v190_v9   ;;  %v202_v12 = vld [vmem:[%s6158_s25 + $0x60] sm:$0xff]  }
  0x16   : > { %195 = vst [vmem:[%s6163_s26 + $0x50] sm:$0xff] %v194_v10   ;;  %199 = vst [vmem:[%s6163_s26 + $0x58] sm:$0xff] %v198_v11   ;;  %v206_v13 = vld [vmem:[%s6158_s25 + $0x68] sm:$0xff]   ;;  %v210_v14 = vld [vmem:[%s6158_s25 + $0x70] sm:$0xff]  }
  0x17   : > { %203 = vst [vmem:[%s6163_s26 + $0x60] sm:$0xff] %v202_v12   ;;  %207 = vst [vmem:[%s6163_s26 + $0x68] sm:$0xff] %v206_v13   ;;  %v214_v15 = vld [vmem:[%s6158_s25 + $0x78] sm:$0xff]   ;;  %v218_v16 = vld [vmem:[%s6158_s25 + $0x80] sm:$0xff]  }
  0x18   : > { %211 = vst [vmem:[%s6163_s26 + $0x70] sm:$0xff] %v210_v14   ;;  %v222_v17 = vld [vmem:[%s6158_s25 + $0x88] sm:$0xff]   ;;  %215 = vst [vmem:[%s6163_s26 + $0x78] sm:$0xff] %v214_v15   ;;  %v226_v18 = vld [vmem:[%s6158_s25 + $0x90] sm:$0xff]  }
  0x19   : > { %219 = vst [vmem:[%s6163_s26 + $0x80] sm:$0xff] %v218_v16   ;;  %223 = vst [vmem:[%s6163_s26 + $0x88] sm:$0xff] %v222_v17   ;;  %v230_v19 = vld [vmem:[%s6158_s25 + $0x98] sm:$0xff]   ;;  %v234_v20 = vld [vmem:[%s6158_s25 + $0xa0] sm:$0xff]  }
  0x1a   : > { %227 = vst [vmem:[%s6163_s26 + $0x90] sm:$0xff] %v226_v18   ;;  %231 = vst [vmem:[%s6163_s26 + $0x98] sm:$0xff] %v230_v19   ;;  %v238_v21 = vld [vmem:[%s6158_s25 + $0xa8] sm:$0xff]   ;;  %v242_v22 = vld [vmem:[%s6158_s25 + $0xb0] sm:$0xff]  }
  0x1b   : > { %235 = vst [vmem:[%s6163_s26 + $0xa0] sm:$0xff] %v234_v20   ;;  %v246_v23 = vld [vmem:[%s6158_s25 + $0xb8] sm:$0xff]   ;;  %239 = vst [vmem:[%s6163_s26 + $0xa8] sm:$0xff] %v238_v21   ;;  %v250_v24 = vld [vmem:[%s6158_s25 + $0xc0] sm:$0xff]  }
  0x1c   : > { %243 = vst [vmem:[%s6163_s26 + $0xb0] sm:$0xff] %v242_v22   ;;  %247 = vst [vmem:[%s6163_s26 + $0xb8] sm:$0xff] %v246_v23   ;;  %v254_v25 = vld [vmem:[%s6158_s25 + $0xc8] sm:$0xff]   ;;  %v258_v26 = vld [vmem:[%s6158_s25 + $0xd0] sm:$0xff]  }
  0x1d   : > { %251 = vst [vmem:[%s6163_s26 + $0xc0] sm:$0xff] %v250_v24   ;;  %255 = vst [vmem:[%s6163_s26 + $0xc8] sm:$0xff] %v254_v25   ;;  %v262_v27 = vld [vmem:[%s6158_s25 + $0xd8] sm:$0xff]   ;;  %v266_v28 = vld [vmem:[%s6158_s25 + $0xe0] sm:$0xff]  }
  0x1e   : > { %259 = vst [vmem:[%s6163_s26 + $0xd0] sm:$0xff] %v258_v26   ;;  %v270_v29 = vld [vmem:[%s6158_s25 + $0xe8] sm:$0xff]   ;;  %263 = vst [vmem:[%s6163_s26 + $0xd8] sm:$0xff] %v262_v27   ;;  %v274_v30 = vld [vmem:[%s6158_s25 + $0xf0] sm:$0xff]  }
  0x1f   : > { %267 = vst [vmem:[%s6163_s26 + $0xe0] sm:$0xff] %v266_v28   ;;  %271 = vst [vmem:[%s6163_s26 + $0xe8] sm:$0xff] %v270_v29   ;;  %v278_v31 = vld [vmem:[%s6158_s25 + $0xf8] sm:$0xff]   ;;  %v282_v32 = vld [vmem:[%s6158_s25 + $0x100] sm:$0xff]  }
  0x20   : > { %275 = vst [vmem:[%s6163_s26 + $0xf0] sm:$0xff] %v274_v30   ;;  %279 = vst [vmem:[%s6163_s26 + $0xf8] sm:$0xff] %v278_v31   ;;  %v286_v33 = vld [vmem:[%s6158_s25 + $0x108] sm:$0xff]   ;;  %v290_v34 = vld [vmem:[%s6158_s25 + $0x110] sm:$0xff]  }
  0x21   : > { %283 = vst [vmem:[%s6163_s26 + $0x100] sm:$0xff] %v282_v32   ;;  %v294_v35 = vld [vmem:[%s6158_s25 + $0x118] sm:$0xff]   ;;  %287 = vst [vmem:[%s6163_s26 + $0x108] sm:$0xff] %v286_v33   ;;  %v298_v36 = vld [vmem:[%s6158_s25 + $0x240] sm:$0xff]  }
  0x22   : > { %291 = vst [vmem:[%s6163_s26 + $0x110] sm:$0xff] %v290_v34   ;;  %295 = vst [vmem:[%s6163_s26 + $0x118] sm:$0xff] %v294_v35   ;;  %v302_v37 = vld [vmem:[%s6158_s25 + $0x248] sm:$0xff]   ;;  %v306_v38 = vld [vmem:[%s6158_s25 + $0x250] sm:$0xff]  }
  0x23   : > { %299 = vst [vmem:[%s6163_s26 + $0x120] sm:$0xff] %v298_v36   ;;  %303 = vst [vmem:[%s6163_s26 + $0x128] sm:$0xff] %v302_v37   ;;  %v310_v39 = vld [vmem:[%s6158_s25 + $0x258] sm:$0xff]   ;;  %v314_v40 = vld [vmem:[%s6158_s25 + $0x260] sm:$0xff]  }
  0x24   : > { %307 = vst [vmem:[%s6163_s26 + $0x130] sm:$0xff] %v306_v38   ;;  %v318_v41 = vld [vmem:[%s6158_s25 + $0x268] sm:$0xff]   ;;  %311 = vst [vmem:[%s6163_s26 + $0x138] sm:$0xff] %v310_v39   ;;  %v322_v42 = vld [vmem:[%s6158_s25 + $0x270] sm:$0xff]  }
  0x25   : > { %315 = vst [vmem:[%s6163_s26 + $0x140] sm:$0xff] %v314_v40   ;;  %319 = vst [vmem:[%s6163_s26 + $0x148] sm:$0xff] %v318_v41   ;;  %v326_v43 = vld [vmem:[%s6158_s25 + $0x278] sm:$0xff]   ;;  %v330_v44 = vld [vmem:[%s6158_s25 + $0x280] sm:$0xff]  }
  0x26   : > { %323 = vst [vmem:[%s6163_s26 + $0x150] sm:$0xff] %v322_v42   ;;  %327 = vst [vmem:[%s6163_s26 + $0x158] sm:$0xff] %v326_v43   ;;  %v334_v45 = vld [vmem:[%s6158_s25 + $0x288] sm:$0xff]   ;;  %v338_v46 = vld [vmem:[%s6158_s25 + $0x290] sm:$0xff]  }
  0x27   : > { %331 = vst [vmem:[%s6163_s26 + $0x160] sm:$0xff] %v330_v44   ;;  %v342_v47 = vld [vmem:[%s6158_s25 + $0x298] sm:$0xff]   ;;  %335 = vst [vmem:[%s6163_s26 + $0x168] sm:$0xff] %v334_v45   ;;  %v346_v48 = vld [vmem:[%s6158_s25 + $0x2a0] sm:$0xff]  }
  0x28   : > { %339 = vst [vmem:[%s6163_s26 + $0x170] sm:$0xff] %v338_v46   ;;  %343 = vst [vmem:[%s6163_s26 + $0x178] sm:$0xff] %v342_v47   ;;  %v350_v49 = vld [vmem:[%s6158_s25 + $0x2a8] sm:$0xff]   ;;  %v354_v50 = vld [vmem:[%s6158_s25 + $0x2b0] sm:$0xff]  }
  0x29   : > { %347 = vst [vmem:[%s6163_s26 + $0x180] sm:$0xff] %v346_v48   ;;  %351 = vst [vmem:[%s6163_s26 + $0x188] sm:$0xff] %v350_v49   ;;  %v358_v51 = vld [vmem:[%s6158_s25 + $0x2b8] sm:$0xff]   ;;  %v362_v52 = vld [vmem:[%s6158_s25 + $0x2c0] sm:$0xff]  }
  0x2a   : > { %355 = vst [vmem:[%s6163_s26 + $0x190] sm:$0xff] %v354_v50   ;;  %v366_v53 = vld [vmem:[%s6158_s25 + $0x2c8] sm:$0xff]   ;;  %359 = vst [vmem:[%s6163_s26 + $0x198] sm:$0xff] %v358_v51   ;;  %v370_v54 = vld [vmem:[%s6158_s25 + $0x2d0] sm:$0xff]  }
  0x2b   : > { %363 = vst [vmem:[%s6163_s26 + $0x1a0] sm:$0xff] %v362_v52   ;;  %367 = vst [vmem:[%s6163_s26 + $0x1a8] sm:$0xff] %v366_v53   ;;  %v374_v55 = vld [vmem:[%s6158_s25 + $0x2d8] sm:$0xff]   ;;  %v378_v56 = vld [vmem:[%s6158_s25 + $0x2e0] sm:$0xff]  }
  0x2c   : > { %371 = vst [vmem:[%s6163_s26 + $0x1b0] sm:$0xff] %v370_v54   ;;  %375 = vst [vmem:[%s6163_s26 + $0x1b8] sm:$0xff] %v374_v55   ;;  %v382_v57 = vld [vmem:[%s6158_s25 + $0x2e8] sm:$0xff]   ;;  %v386_v58 = vld [vmem:[%s6158_s25 + $0x2f0] sm:$0xff]  }
  0x2d   : > { %379 = vst [vmem:[%s6163_s26 + $0x1c0] sm:$0xff] %v378_v56   ;;  %v390_v59 = vld [vmem:[%s6158_s25 + $0x2f8] sm:$0xff]   ;;  %383 = vst [vmem:[%s6163_s26 + $0x1c8] sm:$0xff] %v382_v57   ;;  %v394_v60 = vld [vmem:[%s6158_s25 + $0x300] sm:$0xff]  }
  0x2e   : > { %387 = vst [vmem:[%s6163_s26 + $0x1d0] sm:$0xff] %v386_v58   ;;  %391 = vst [vmem:[%s6163_s26 + $0x1d8] sm:$0xff] %v390_v59   ;;  %v398_v61 = vld [vmem:[%s6158_s25 + $0x308] sm:$0xff]   ;;  %v402_v62 = vld [vmem:[%s6158_s25 + $0x310] sm:$0xff]  }
  0x2f   : > { %395 = vst [vmem:[%s6163_s26 + $0x1e0] sm:$0xff] %v394_v60   ;;  %399 = vst [vmem:[%s6163_s26 + $0x1e8] sm:$0xff] %v398_v61   ;;  %v406_v63 = vld [vmem:[%s6158_s25 + $0x318] sm:$0xff]   ;;  %v410_v0 = vld [vmem:[%s6158_s25 + $0x320] sm:$0xff]  }
  0x30   : > { %403 = vst [vmem:[%s6163_s26 + $0x1f0] sm:$0xff] %v402_v62   ;;  %v414_v1 = vld [vmem:[%s6158_s25 + $0x328] sm:$0xff]   ;;  %407 = vst [vmem:[%s6163_s26 + $0x1f8] sm:$0xff] %v406_v63   ;;  %v418_v2 = vld [vmem:[%s6158_s25 + $0x330] sm:$0xff]  }
  0x31   : > { %411 = vst [vmem:[%s6163_s26 + $0x200] sm:$0xff] %v410_v0   ;;  %415 = vst [vmem:[%s6163_s26 + $0x208] sm:$0xff] %v414_v1   ;;  %v422_v3 = vld [vmem:[%s6158_s25 + $0x338] sm:$0xff]   ;;  %v426_v4 = vld [vmem:[%s6158_s25 + $0x340] sm:$0xff]  }
  0x32   : > { %419 = vst [vmem:[%s6163_s26 + $0x210] sm:$0xff] %v418_v2   ;;  %423 = vst [vmem:[%s6163_s26 + $0x218] sm:$0xff] %v422_v3   ;;  %v430_v5 = vld [vmem:[%s6158_s25 + $0x348] sm:$0xff]   ;;  %v434_v6 = vld [vmem:[%s6158_s25 + $0x350] sm:$0xff]  }
  0x33   : > { %427 = vst [vmem:[%s6163_s26 + $0x220] sm:$0xff] %v426_v4   ;;  %v438_v7 = vld [vmem:[%s6158_s25 + $0x358] sm:$0xff]   ;;  %431 = vst [vmem:[%s6163_s26 + $0x228] sm:$0xff] %v430_v5   ;;  %v442_v8 = vld [vmem:[%s6158_s25 + $0x480] sm:$0xff]  }
  0x34   : > { %435 = vst [vmem:[%s6163_s26 + $0x230] sm:$0xff] %v434_v6   ;;  %439 = vst [vmem:[%s6163_s26 + $0x238] sm:$0xff] %v438_v7   ;;  %v446_v9 = vld [vmem:[%s6158_s25 + $0x488] sm:$0xff]   ;;  %v450_v10 = vld [vmem:[%s6158_s25 + $0x490] sm:$0xff]  }
  0x35   : > { %443 = vst [vmem:[%s6163_s26 + $0x240] sm:$0xff] %v442_v8   ;;  %447 = vst [vmem:[%s6163_s26 + $0x248] sm:$0xff] %v446_v9   ;;  %v454_v11 = vld [vmem:[%s6158_s25 + $0x498] sm:$0xff]   ;;  %v458_v12 = vld [vmem:[%s6158_s25 + $0x4a0] sm:$0xff]  }
  0x36   : > { %451 = vst [vmem:[%s6163_s26 + $0x250] sm:$0xff] %v450_v10   ;;  %v462_v13 = vld [vmem:[%s6158_s25 + $0x4a8] sm:$0xff]   ;;  %455 = vst [vmem:[%s6163_s26 + $0x258] sm:$0xff] %v454_v11   ;;  %v466_v14 = vld [vmem:[%s6158_s25 + $0x4b0] sm:$0xff]  }
  0x37   : > { %459 = vst [vmem:[%s6163_s26 + $0x260] sm:$0xff] %v458_v12   ;;  %463 = vst [vmem:[%s6163_s26 + $0x268] sm:$0xff] %v462_v13   ;;  %v470_v15 = vld [vmem:[%s6158_s25 + $0x4b8] sm:$0xff]   ;;  %v474_v16 = vld [vmem:[%s6158_s25 + $0x4c0] sm:$0xff]  }
  0x38   : > { %467 = vst [vmem:[%s6163_s26 + $0x270] sm:$0xff] %v466_v14   ;;  %471 = vst [vmem:[%s6163_s26 + $0x278] sm:$0xff] %v470_v15   ;;  %v478_v17 = vld [vmem:[%s6158_s25 + $0x4c8] sm:$0xff]   ;;  %v482_v18 = vld [vmem:[%s6158_s25 + $0x4d0] sm:$0xff]  }
  0x39   : > { %475 = vst [vmem:[%s6163_s26 + $0x280] sm:$0xff] %v474_v16   ;;  %v486_v19 = vld [vmem:[%s6158_s25 + $0x4d8] sm:$0xff]   ;;  %479 = vst [vmem:[%s6163_s26 + $0x288] sm:$0xff] %v478_v17   ;;  %v490_v20 = vld [vmem:[%s6158_s25 + $0x4e0] sm:$0xff]  }
  0x3a   : > { %483 = vst [vmem:[%s6163_s26 + $0x290] sm:$0xff] %v482_v18   ;;  %487 = vst [vmem:[%s6163_s26 + $0x298] sm:$0xff] %v486_v19   ;;  %v494_v21 = vld [vmem:[%s6158_s25 + $0x4e8] sm:$0xff]   ;;  %v498_v22 = vld [vmem:[%s6158_s25 + $0x4f0] sm:$0xff]  }
  0x3b   : > { %491 = vst [vmem:[%s6163_s26 + $0x2a0] sm:$0xff] %v490_v20   ;;  %495 = vst [vmem:[%s6163_s26 + $0x2a8] sm:$0xff] %v494_v21   ;;  %v502_v23 = vld [vmem:[%s6158_s25 + $0x4f8] sm:$0xff]   ;;  %v506_v24 = vld [vmem:[%s6158_s25 + $0x500] sm:$0xff]  }
  0x3c   : > { %499 = vst [vmem:[%s6163_s26 + $0x2b0] sm:$0xff] %v498_v22   ;;  %v510_v25 = vld [vmem:[%s6158_s25 + $0x508] sm:$0xff]   ;;  %503 = vst [vmem:[%s6163_s26 + $0x2b8] sm:$0xff] %v502_v23   ;;  %v514_v26 = vld [vmem:[%s6158_s25 + $0x510] sm:$0xff]  }
  0x3d   : > { %507 = vst [vmem:[%s6163_s26 + $0x2c0] sm:$0xff] %v506_v24   ;;  %511 = vst [vmem:[%s6163_s26 + $0x2c8] sm:$0xff] %v510_v25   ;;  %v518_v27 = vld [vmem:[%s6158_s25 + $0x518] sm:$0xff]   ;;  %v522_v28 = vld [vmem:[%s6158_s25 + $0x520] sm:$0xff]  }
  0x3e   : > { %515 = vst [vmem:[%s6163_s26 + $0x2d0] sm:$0xff] %v514_v26   ;;  %519 = vst [vmem:[%s6163_s26 + $0x2d8] sm:$0xff] %v518_v27   ;;  %v526_v29 = vld [vmem:[%s6158_s25 + $0x528] sm:$0xff]   ;;  %v530_v30 = vld [vmem:[%s6158_s25 + $0x530] sm:$0xff]  }
  0x3f   : > { %523 = vst [vmem:[%s6163_s26 + $0x2e0] sm:$0xff] %v522_v28   ;;  %v534_v31 = vld [vmem:[%s6158_s25 + $0x538] sm:$0xff]   ;;  %527 = vst [vmem:[%s6163_s26 + $0x2e8] sm:$0xff] %v526_v29   ;;  %v538_v32 = vld [vmem:[%s6158_s25 + $0x540] sm:$0xff]  }
  0x40   : > { %531 = vst [vmem:[%s6163_s26 + $0x2f0] sm:$0xff] %v530_v30   ;;  %535 = vst [vmem:[%s6163_s26 + $0x2f8] sm:$0xff] %v534_v31   ;;  %v542_v33 = vld [vmem:[%s6158_s25 + $0x548] sm:$0xff]   ;;  %v546_v34 = vld [vmem:[%s6158_s25 + $0x550] sm:$0xff]  }
  0x41   : > { %539 = vst [vmem:[%s6163_s26 + $0x300] sm:$0xff] %v538_v32   ;;  %543 = vst [vmem:[%s6163_s26 + $0x308] sm:$0xff] %v542_v33   ;;  %v550_v35 = vld [vmem:[%s6158_s25 + $0x558] sm:$0xff]   ;;  %v554_v36 = vld [vmem:[%s6158_s25 + $0x560] sm:$0xff]  }
  0x42   : > { %547 = vst [vmem:[%s6163_s26 + $0x310] sm:$0xff] %v546_v34   ;;  %v558_v37 = vld [vmem:[%s6158_s25 + $0x568] sm:$0xff]   ;;  %551 = vst [vmem:[%s6163_s26 + $0x318] sm:$0xff] %v550_v35   ;;  %v562_v38 = vld [vmem:[%s6158_s25 + $0x570] sm:$0xff]  }
  0x43   : > { %555 = vst [vmem:[%s6163_s26 + $0x320] sm:$0xff] %v554_v36   ;;  %559 = vst [vmem:[%s6163_s26 + $0x328] sm:$0xff] %v558_v37   ;;  %v566_v39 = vld [vmem:[%s6158_s25 + $0x578] sm:$0xff]   ;;  %v570_v40 = vld [vmem:[%s6158_s25 + $0x580] sm:$0xff]  }
  0x44   : > { %563 = vst [vmem:[%s6163_s26 + $0x330] sm:$0xff] %v562_v38   ;;  %567 = vst [vmem:[%s6163_s26 + $0x338] sm:$0xff] %v566_v39   ;;  %v574_v41 = vld [vmem:[%s6158_s25 + $0x588] sm:$0xff]   ;;  %v578_v42 = vld [vmem:[%s6158_s25 + $0x590] sm:$0xff]  }
  0x45   : > { %571 = vst [vmem:[%s6163_s26 + $0x340] sm:$0xff] %v570_v40   ;;  %v582_v43 = vld [vmem:[%s6158_s25 + $0x598] sm:$0xff]   ;;  %575 = vst [vmem:[%s6163_s26 + $0x348] sm:$0xff] %v574_v41   ;;  %v586_v44 = vld [vmem:[%s6158_s25 + $0x6c0] sm:$0xff]  }
  0x46   : > { %579 = vst [vmem:[%s6163_s26 + $0x350] sm:$0xff] %v578_v42   ;;  %583 = vst [vmem:[%s6163_s26 + $0x358] sm:$0xff] %v582_v43   ;;  %v590_v45 = vld [vmem:[%s6158_s25 + $0x6c8] sm:$0xff]   ;;  %v594_v46 = vld [vmem:[%s6158_s25 + $0x6d0] sm:$0xff]  }
  0x47   : > { %587 = vst [vmem:[%s6163_s26 + $0x360] sm:$0xff] %v586_v44   ;;  %591 = vst [vmem:[%s6163_s26 + $0x368] sm:$0xff] %v590_v45   ;;  %v598_v47 = vld [vmem:[%s6158_s25 + $0x6d8] sm:$0xff]   ;;  %v602_v48 = vld [vmem:[%s6158_s25 + $0x6e0] sm:$0xff]  }
  0x48   : > { %595 = vst [vmem:[%s6163_s26 + $0x370] sm:$0xff] %v594_v46   ;;  %v606_v49 = vld [vmem:[%s6158_s25 + $0x6e8] sm:$0xff]   ;;  %599 = vst [vmem:[%s6163_s26 + $0x378] sm:$0xff] %v598_v47   ;;  %v610_v50 = vld [vmem:[%s6158_s25 + $0x6f0] sm:$0xff]  }
  0x49   : > { %603 = vst [vmem:[%s6163_s26 + $0x380] sm:$0xff] %v602_v48   ;;  %607 = vst [vmem:[%s6163_s26 + $0x388] sm:$0xff] %v606_v49   ;;  %v614_v51 = vld [vmem:[%s6158_s25 + $0x6f8] sm:$0xff]   ;;  %v618_v52 = vld [vmem:[%s6158_s25 + $0x700] sm:$0xff]  }
  0x4a   : > { %611 = vst [vmem:[%s6163_s26 + $0x390] sm:$0xff] %v610_v50   ;;  %615 = vst [vmem:[%s6163_s26 + $0x398] sm:$0xff] %v614_v51   ;;  %v622_v53 = vld [vmem:[%s6158_s25 + $0x708] sm:$0xff]   ;;  %v626_v54 = vld [vmem:[%s6158_s25 + $0x710] sm:$0xff]  }
  0x4b   : > { %619 = vst [vmem:[%s6163_s26 + $0x3a0] sm:$0xff] %v618_v52   ;;  %v630_v55 = vld [vmem:[%s6158_s25 + $0x718] sm:$0xff]   ;;  %623 = vst [vmem:[%s6163_s26 + $0x3a8] sm:$0xff] %v622_v53   ;;  %v634_v56 = vld [vmem:[%s6158_s25 + $0x720] sm:$0xff]  }
  0x4c   : > { %627 = vst [vmem:[%s6163_s26 + $0x3b0] sm:$0xff] %v626_v54   ;;  %631 = vst [vmem:[%s6163_s26 + $0x3b8] sm:$0xff] %v630_v55   ;;  %v638_v57 = vld [vmem:[%s6158_s25 + $0x728] sm:$0xff]   ;;  %v642_v58 = vld [vmem:[%s6158_s25 + $0x730] sm:$0xff]  }
  0x4d   : > { %635 = vst [vmem:[%s6163_s26 + $0x3c0] sm:$0xff] %v634_v56   ;;  %639 = vst [vmem:[%s6163_s26 + $0x3c8] sm:$0xff] %v638_v57   ;;  %v646_v59 = vld [vmem:[%s6158_s25 + $0x738] sm:$0xff]   ;;  %v650_v60 = vld [vmem:[%s6158_s25 + $0x740] sm:$0xff]  }
  0x4e   : > { %643 = vst [vmem:[%s6163_s26 + $0x3d0] sm:$0xff] %v642_v58   ;;  %v654_v61 = vld [vmem:[%s6158_s25 + $0x748] sm:$0xff]   ;;  %647 = vst [vmem:[%s6163_s26 + $0x3d8] sm:$0xff] %v646_v59   ;;  %v658_v62 = vld [vmem:[%s6158_s25 + $0x750] sm:$0xff]  }
  0x4f   : > { %651 = vst [vmem:[%s6163_s26 + $0x3e0] sm:$0xff] %v650_v60   ;;  %655 = vst [vmem:[%s6163_s26 + $0x3e8] sm:$0xff] %v654_v61   ;;  %v662_v63 = vld [vmem:[%s6158_s25 + $0x758] sm:$0xff]   ;;  %v666_v0 = vld [vmem:[%s6158_s25 + $0x760] sm:$0xff]  }
  0x50   : > { %659 = vst [vmem:[%s6163_s26 + $0x3f0] sm:$0xff] %v658_v62   ;;  %663 = vst [vmem:[%s6163_s26 + $0x3f8] sm:$0xff] %v662_v63   ;;  %v670_v1 = vld [vmem:[%s6158_s25 + $0x768] sm:$0xff]   ;;  %v674_v2 = vld [vmem:[%s6158_s25 + $0x770] sm:$0xff]  }
  0x51   : > { %667 = vst [vmem:[%s6163_s26 + $0x400] sm:$0xff] %v666_v0   ;;  %v678_v3 = vld [vmem:[%s6158_s25 + $0x778] sm:$0xff]   ;;  %671 = vst [vmem:[%s6163_s26 + $0x408] sm:$0xff] %v670_v1   ;;  %v682_v4 = vld [vmem:[%s6158_s25 + $0x780] sm:$0xff]  }
  0x52   : > { %675 = vst [vmem:[%s6163_s26 + $0x410] sm:$0xff] %v674_v2   ;;  %679 = vst [vmem:[%s6163_s26 + $0x418] sm:$0xff] %v678_v3   ;;  %v686_v5 = vld [vmem:[%s6158_s25 + $0x788] sm:$0xff]   ;;  %v690_v6 = vld [vmem:[%s6158_s25 + $0x790] sm:$0xff]  }
  0x53   : > { %683 = vst [vmem:[%s6163_s26 + $0x420] sm:$0xff] %v682_v4   ;;  %687 = vst [vmem:[%s6163_s26 + $0x428] sm:$0xff] %v686_v5   ;;  %v694_v7 = vld [vmem:[%s6158_s25 + $0x798] sm:$0xff]   ;;  %v698_v8 = vld [vmem:[%s6158_s25 + $0x7a0] sm:$0xff]  }
  0x54   : > { %691 = vst [vmem:[%s6163_s26 + $0x430] sm:$0xff] %v690_v6   ;;  %v702_v9 = vld [vmem:[%s6158_s25 + $0x7a8] sm:$0xff]   ;;  %695 = vst [vmem:[%s6163_s26 + $0x438] sm:$0xff] %v694_v7   ;;  %v706_v10 = vld [vmem:[%s6158_s25 + $0x7b0] sm:$0xff]  }
  0x55   : > { %699 = vst [vmem:[%s6163_s26 + $0x440] sm:$0xff] %v698_v8   ;;  %703 = vst [vmem:[%s6163_s26 + $0x448] sm:$0xff] %v702_v9   ;;  %v710_v11 = vld [vmem:[%s6158_s25 + $0x7b8] sm:$0xff]   ;;  %v714_v12 = vld [vmem:[%s6158_s25 + $0x7c0] sm:$0xff]  }
  0x56   : > { %707 = vst [vmem:[%s6163_s26 + $0x450] sm:$0xff] %v706_v10   ;;  %711 = vst [vmem:[%s6163_s26 + $0x458] sm:$0xff] %v710_v11   ;;  %v718_v13 = vld [vmem:[%s6158_s25 + $0x7c8] sm:$0xff]   ;;  %v722_v14 = vld [vmem:[%s6158_s25 + $0x7d0] sm:$0xff]  }
  0x57   : > { %715 = vst [vmem:[%s6163_s26 + $0x460] sm:$0xff] %v714_v12   ;;  %v726_v15 = vld [vmem:[%s6158_s25 + $0x7d8] sm:$0xff]   ;;  %719 = vst [vmem:[%s6163_s26 + $0x468] sm:$0xff] %v718_v13  }
  0x58   : > { %723 = vst [vmem:[%s6163_s26 + $0x470] sm:$0xff] %v722_v14   ;;  %727 = vst [vmem:[%s6163_s26 + $0x478] sm:$0xff] %v726_v15  }
  0x59 PF: > { %p4808_p5 = scmp.ge.s32.totalorder %s6101_s14, 1  ;;  %p1328_p6 = scmp.lt.s32.totalorder %s6101_s14, 3 }
  0x5b   : > { %p1329_p7 = pnand %p4808_p5, %p1328_p6 }
  0x5d   : > { %1332 = sbr.rel (%p1329_p7) target bundleno = 601 (0x259), region = 69 }
  0x62   : > { %v5932_v16 = vld [vmem:[%s7307_s1 + $0x8] sm:$0x1f]   ;;  %vm2822_vm0 = vcmask 1043456   ;;  %vm2823_vm1 = vcmask 1044480   ;;  %v6103_v17 = vmov 65535   ;;  %s1335_s29 = sand.u32 1, %s6093_s12  }
  0x63   : > { %v2824_v18 = vsel %vm2822_vm0, 4294967295, %v6103_v17  ;;  %s5906_s30 = smul.u32 1152, %s1335_s29  ;;  %v5933_v21 = vld [vmem:[%s7307_s1] sm:$0xff]   ;;  %vm2389_vm2 = vcmask 203776  }
  0x64   : > { %v2825_v19 = vsel %vm2823_vm1, %v2824_v18, 0  ;;  %s1359_s7 = smul.u32 72, %s4803_s15 }
  0x65   : > { %v2827_v20 = vand.u32 %v5932_v16, %v2825_v19  ;;  %s6459_s6 = scalar_lea.vmem [#allocation2], %s5906_s30 }
  0x66   : > { %v5934_v22 = vld [vmem:[%s6459_s6] sm:$0xff]   ;;  %v5936_v24 = vld [vmem:[%s6459_s6 + $0x8] sm:$0xff]   ;;  %v5938_v26 = vld [vmem:[%s6459_s6 + $0x10] sm:$0xff]   ;;  %p1360_p8 = scmp.lt.s32.totalorder %s1359_s7, 143 }
  0x67   : > { %5609 = vmatprep.subr.bf16.mxu0 %v2827_v20  ;;  %5901 = vmatprep.subr.bf16.mxu1 %v2827_v20  ;;  %v5935_v23 = vld [vmem:[%s6459_s6 + $0x240] sm:$0xff]   ;;  %v5937_v25 = vld [vmem:[%s6459_s6 + $0x248] sm:$0xff]   ;;  %v5939_v27 = vld [vmem:[%s6459_s6 + $0x250] sm:$0xff]  }
  0x68   : > { %5610 = vmatpush3.bf16.msra.mxu0 %v2827_v20  ;;  %5903 = vmatpush3.bf16.msra.mxu1 %v2827_v20  ;;  %v5940_v28 = vld [vmem:[%s6459_s6 + $0x18] sm:$0xff]   ;;  %v5942_v30 = vld [vmem:[%s6459_s6 + $0x20] sm:$0xff]   ;;  %v5944_v32 = vld [vmem:[%s6459_s6 + $0x28] sm:$0xff]   ;;  %s7502_s7 = smov (!%p1360_p8, %s1359_s7), 143 }
  0x69   : > { %5611 = vmatprep.subr.bf16.mxu0 %v5933_v21  ;;  %5902 = vmatprep.subr.bf16.mxu1 %v5933_v21  ;;  %v5941_v29 = vld [vmem:[%s6459_s6 + $0x258] sm:$0xff]   ;;  %v5943_v31 = vld [vmem:[%s6459_s6 + $0x260] sm:$0xff]   ;;  %v5945_v33 = vld [vmem:[%s6459_s6 + $0x268] sm:$0xff]   ;;  %s4809_s10 = sshll.u32 %s7502_s7, 2 }
  0x6a   : > { %5613 = vmatprep.mubr.msk.bf16.mxu0 %vm2389_vm2, %v5934_v22  ;;  %5757 = vmatprep.mubr.msk.bf16.mxu1 %vm2389_vm2, %v5935_v23  ;;  %v5946_v34 = vld [vmem:[%s6459_s6 + $0x30] sm:$0xff]   ;;  %v5948_v36 = vld [vmem:[%s6459_s6 + $0x38] sm:$0xff]   ;;  %v5950_v38 = vld [vmem:[%s6459_s6 + $0x40] sm:$0xff]   ;;  %s7062_s14 = scalar_lea.vmem %s7309_s3, %s4809_s10 }
  0x6b   : > { %v5947_v35 = vld [vmem:[%s6459_s6 + $0x270] sm:$0xff]   ;;  %v5949_v37 = vld [vmem:[%s6459_s6 + $0x278] sm:$0xff]   ;;  %v5951_v39 = vld [vmem:[%s6459_s6 + $0x280] sm:$0xff]  }
  0x6c   : > { %5612 = vmatpush3.bf16.msra.mxu0 %v5933_v21  ;;  %5904 = vmatpush3.bf16.msra.mxu1 %v5933_v21  ;;  %v5952_v40 = vld [vmem:[%s6459_s6 + $0x48] sm:$0xff]   ;;  %v5954_v42 = vld [vmem:[%s6459_s6 + $0x50] sm:$0xff]   ;;  %v5956_v44 = vld [vmem:[%s6459_s6 + $0x58] sm:$0xff]  }
  0x6d   : > { %v5953_v41 = vld [vmem:[%s6459_s6 + $0x288] sm:$0xff]   ;;  %v5955_v43 = vld [vmem:[%s6459_s6 + $0x290] sm:$0xff]   ;;  %v5957_v45 = vld [vmem:[%s6459_s6 + $0x298] sm:$0xff]  }
  0x6e   : > { %v5958_v46 = vld [vmem:[%s6459_s6 + $0x60] sm:$0xff]   ;;  %v5960_v48 = vld [vmem:[%s6459_s6 + $0x68] sm:$0xff]   ;;  %v5962_v50 = vld [vmem:[%s6459_s6 + $0x70] sm:$0xff]  }
  0x6f   : > { %5614 = vmatmul.mubr.msk.bf16.vlgmr.msra.gmra.mxu0 %vm2389_vm2, %v5936_v24  ;;  %5758 = vmatmul.mubr.msk.bf16.vlgmr.msra.gmra.mxu1 %vm2389_vm2, %v5937_v25  ;;  %v5959_v47 = vld [vmem:[%s6459_s6 + $0x2a0] sm:$0xff]   ;;  %v5961_v49 = vld [vmem:[%s6459_s6 + $0x2a8] sm:$0xff]   ;;  %v5963_v51 = vld [vmem:[%s6459_s6 + $0x2b0] sm:$0xff]  }
  0x70   : > { %5617 = vmatprep.mubr.msk.bf16.mxu0 %vm2389_vm2, %v5938_v26  ;;  %5761 = vmatprep.mubr.msk.bf16.mxu1 %vm2389_vm2, %v5939_v27  ;;  %v5964_v52 = vld [vmem:[%s6459_s6 + $0x78] sm:$0xff]   ;;  %v5966_v54 = vld [vmem:[%s6459_s6 + $0x80] sm:$0xff]   ;;  %v5968_v56 = vld [vmem:[%s6459_s6 + $0x88] sm:$0xff]  }
  0x71   : > { %v5965_v53 = vld [vmem:[%s6459_s6 + $0x2b8] sm:$0xff]   ;;  %v5967_v55 = vld [vmem:[%s6459_s6 + $0x2c0] sm:$0xff]   ;;  %v5969_v57 = vld [vmem:[%s6459_s6 + $0x2c8] sm:$0xff]  }
  0x72   : > { %v5970_v58 = vld [vmem:[%s6459_s6 + $0x90] sm:$0xff]   ;;  %v5972_v60 = vld [vmem:[%s6459_s6 + $0x98] sm:$0xff]   ;;  %v5974_v62 = vld [vmem:[%s6459_s6 + $0xa0] sm:$0xff]  }
  0x73   : > { %v5971_v59 = vld [vmem:[%s6459_s6 + $0x2d0] sm:$0xff]   ;;  %v5973_v61 = vld [vmem:[%s6459_s6 + $0x2d8] sm:$0xff]   ;;  %v5975_v63 = vld [vmem:[%s6459_s6 + $0x2e0] sm:$0xff]  }
  0x74   : > { %v5976_v0 = vld [vmem:[%s6459_s6 + $0xa8] sm:$0xff]   ;;  %v5978_v2 = vld [vmem:[%s6459_s6 + $0xb0] sm:$0xff]   ;;  %v5980_v4 = vld [vmem:[%s6459_s6 + $0xb8] sm:$0xff]  }
  0x75   : > { %v5977_v1 = vld [vmem:[%s6459_s6 + $0x2e8] sm:$0xff]   ;;  %v5979_v3 = vld [vmem:[%s6459_s6 + $0x2f0] sm:$0xff]   ;;  %v5981_v5 = vld [vmem:[%s6459_s6 + $0x2f8] sm:$0xff]  }
  0x76   : > { %v5982_v6 = vld [vmem:[%s6459_s6 + $0xc0] sm:$0xff]   ;;  %v5984_v8 = vld [vmem:[%s6459_s6 + $0xc8] sm:$0xff]   ;;  %v5986_v10 = vld [vmem:[%s6459_s6 + $0xd0] sm:$0xff]  }
  0x77   : > { %5618 = vmatmul.mubr.msk.bf16.gmra.mxu0 %vm2389_vm2, %v5940_v28  ;;  %5762 = vmatmul.mubr.msk.bf16.gmra.mxu1 %vm2389_vm2, %v5941_v29  ;;  %v5983_v7 = vld [vmem:[%s6459_s6 + $0x300] sm:$0xff]   ;;  %v5985_v9 = vld [vmem:[%s6459_s6 + $0x308] sm:$0xff]   ;;  %v5987_v11 = vld [vmem:[%s6459_s6 + $0x310] sm:$0xff]  }
  0x78   : > { %5621 = vmatprep.mubr.msk.bf16.mxu0 %vm2389_vm2, %v5942_v30  ;;  %5765 = vmatprep.mubr.msk.bf16.mxu1 %vm2389_vm2, %v5943_v31  ;;  %v5988_v12 = vld [vmem:[%s6459_s6 + $0xd8] sm:$0xff]   ;;  %v5990_v14 = vld [vmem:[%s6459_s6 + $0xe0] sm:$0xff]   ;;  %v5992_v16 = vld [vmem:[%s6459_s6 + $0xe8] sm:$0xff]  }
  0x79   : > { %v5989_v13 = vld [vmem:[%s6459_s6 + $0x318] sm:$0xff]   ;;  %v5991_v15 = vld [vmem:[%s6459_s6 + $0x320] sm:$0xff]   ;;  %v5993_v17 = vld [vmem:[%s6459_s6 + $0x328] sm:$0xff]  }
  0x7a   : > { %v5994_v18 = vld [vmem:[%s6459_s6 + $0xf0] sm:$0xff]   ;;  %v5996_v20 = vld [vmem:[%s6459_s6 + $0xf8] sm:$0xff]   ;;  %v5998_v22 = vld [vmem:[%s6459_s6 + $0x100] sm:$0xff]  }
  0x7b   : > { %v5995_v19 = vld [vmem:[%s6459_s6 + $0x330] sm:$0xff]   ;;  %v5997_v21 = vld [vmem:[%s6459_s6 + $0x338] sm:$0xff]   ;;  %v5999_v23 = vld [vmem:[%s6459_s6 + $0x340] sm:$0xff]  }
  0x7c   : > { %v6000_v24 = vld [vmem:[%s6459_s6 + $0x108] sm:$0xff]   ;;  %v6002_v26 = vld [vmem:[%s6459_s6 + $0x110] sm:$0xff]   ;;  %v6004_v28 = vld [vmem:[%s6459_s6 + $0x118] sm:$0xff]  }
  0x7d   : > { %v6001_v25 = vld [vmem:[%s6459_s6 + $0x348] sm:$0xff]   ;;  %v6003_v27 = vld [vmem:[%s6459_s6 + $0x350] sm:$0xff]   ;;  %v6005_v29 = vld [vmem:[%s6459_s6 + $0x358] sm:$0xff]  }
  0x7e   : > { %v6006_v30 = vld [vmem:[%s6459_s6 + $0x120] sm:$0xff]  }
  0x7f   : > { %5622 = vmatmul.mubr.msk.bf16.gmra.mxu0 %vm2389_vm2, %v5944_v32  ;;  %5766 = vmatmul.mubr.msk.bf16.gmra.mxu1 %vm2389_vm2, %v5945_v33  ;;  %v6007_v31 = vld [vmem:[%s6459_s6 + $0x360] sm:$0xff]   ;;  %v6008_v32 = vld [vmem:[%s6459_s6 + $0x128] sm:$0xff]  }
  0x80   : > { %5625 = vmatprep.mubr.msk.bf16.mxu0 %vm2389_vm2, %v5946_v34  ;;  %5769 = vmatprep.mubr.msk.bf16.mxu1 %vm2389_vm2, %v5947_v35  ;;  %v6009_v33 = vld [vmem:[%s6459_s6 + $0x368] sm:$0xff]   ;;  %v6010_v34 = vld [vmem:[%s6459_s6 + $0x130] sm:$0xff]  }
  0x81   : > { %v6011_v35 = vld [vmem:[%s6459_s6 + $0x370] sm:$0xff]  }
  0x87   : > { %5626 = vmatmul.mubr.msk.bf16.gmra.mxu0 %vm2389_vm2, %v5948_v36  ;;  %5770 = vmatmul.mubr.msk.bf16.gmra.mxu1 %vm2389_vm2, %v5949_v37  ;;  %v6012_v36 = vld [vmem:[%s6459_s6 + $0x138] sm:$0xff]  }
  0x88   : > { %5629 = vmatprep.mubr.msk.bf16.mxu0 %vm2389_vm2, %v5950_v38  ;;  %5773 = vmatprep.mubr.msk.bf16.mxu1 %vm2389_vm2, %v5951_v39  ;;  %v6013_v37 = vld [vmem:[%s6459_s6 + $0x378] sm:$0xff]   ;;  %v6014_v38 = vld [vmem:[%s6459_s6 + $0x140] sm:$0xff]  }
  0x89   : > { %v6015_v39 = vld [vmem:[%s6459_s6 + $0x380] sm:$0xff]  }
  0x8f   : > { %5630 = vmatmul.mubr.msk.bf16.gmra.mxu0 %vm2389_vm2, %v5952_v40  ;;  %5774 = vmatmul.mubr.msk.bf16.gmra.mxu1 %vm2389_vm2, %v5953_v41  ;;  %v6016_v40 = vld [vmem:[%s6459_s6 + $0x148] sm:$0xff]  }
  0x90   : > { %5633 = vmatprep.mubr.msk.bf16.mxu0 %vm2389_vm2, %v5954_v42  ;;  %5777 = vmatprep.mubr.msk.bf16.mxu1 %vm2389_vm2, %v5955_v43  ;;  %v6017_v41 = vld [vmem:[%s6459_s6 + $0x388] sm:$0xff]   ;;  %v6018_v42 = vld [vmem:[%s6459_s6 + $0x150] sm:$0xff]  }
  0x91   : > { %v6019_v43 = vld [vmem:[%s6459_s6 + $0x390] sm:$0xff]  }
  0x97   : > { %5634 = vmatmul.mubr.msk.bf16.gmra.mxu0 %vm2389_vm2, %v5956_v44  ;;  %5778 = vmatmul.mubr.msk.bf16.gmra.mxu1 %vm2389_vm2, %v5957_v45  ;;  %v6020_v44 = vld [vmem:[%s6459_s6 + $0x158] sm:$0xff]  }
  0x98   : > { %5637 = vmatprep.mubr.msk.bf16.mxu0 %vm2389_vm2, %v5958_v46  ;;  %5781 = vmatprep.mubr.msk.bf16.mxu1 %vm2389_vm2, %v5959_v47  ;;  %v6021_v45 = vld [vmem:[%s6459_s6 + $0x398] sm:$0xff]   ;;  %v6022_v46 = vld [vmem:[%s6459_s6 + $0x160] sm:$0xff]  }
  0x99   : > { %v6023_v47 = vld [vmem:[%s6459_s6 + $0x3a0] sm:$0xff]  }
  0x9f   : > { %5638 = vmatmul.mubr.msk.bf16.gmra.mxu0 %vm2389_vm2, %v5960_v48  ;;  %5782 = vmatmul.mubr.msk.bf16.gmra.mxu1 %vm2389_vm2, %v5961_v49  ;;  %v6024_v48 = vld [vmem:[%s6459_s6 + $0x168] sm:$0xff]  }
  0xa0   : > { %5641 = vmatprep.mubr.msk.bf16.mxu0 %vm2389_vm2, %v5962_v50  ;;  %5785 = vmatprep.mubr.msk.bf16.mxu1 %vm2389_vm2, %v5963_v51  ;;  %v6025_v49 = vld [vmem:[%s6459_s6 + $0x3a8] sm:$0xff]   ;;  %v6026_v50 = vld [vmem:[%s6459_s6 + $0x170] sm:$0xff]  }
  0xa1   : > { %v6027_v51 = vld [vmem:[%s6459_s6 + $0x3b0] sm:$0xff]  }
  0xa7   : > { %5642 = vmatmul.mubr.msk.bf16.gmra.mxu0 %vm2389_vm2, %v5964_v52  ;;  %5786 = vmatmul.mubr.msk.bf16.gmra.mxu1 %vm2389_vm2, %v5965_v53  ;;  %v6028_v52 = vld [vmem:[%s6459_s6 + $0x178] sm:$0xff]  }
  0xa8   : > { %5645 = vmatprep.mubr.msk.bf16.mxu0 %vm2389_vm2, %v5966_v54  ;;  %5789 = vmatprep.mubr.msk.bf16.mxu1 %vm2389_vm2, %v5967_v55  ;;  %v6029_v53 = vld [vmem:[%s6459_s6 + $0x3b8] sm:$0xff]   ;;  %v6030_v54 = vld [vmem:[%s6459_s6 + $0x180] sm:$0xff]  }
  0xa9   : > { %v6031_v55 = vld [vmem:[%s6459_s6 + $0x3c0] sm:$0xff]  }
  0xaf   : > { %5646 = vmatmul.mubr.msk.bf16.gmra.mxu0 %vm2389_vm2, %v5968_v56  ;;  %5790 = vmatmul.mubr.msk.bf16.gmra.mxu1 %vm2389_vm2, %v5969_v57  ;;  %v6032_v56 = vld [vmem:[%s6459_s6 + $0x188] sm:$0xff]  }
  0xb0   : > { %5649 = vmatprep.mubr.msk.bf16.mxu0 %vm2389_vm2, %v5970_v58  ;;  %5793 = vmatprep.mubr.msk.bf16.mxu1 %vm2389_vm2, %v5971_v59  ;;  %v6033_v57 = vld [vmem:[%s6459_s6 + $0x3c8] sm:$0xff]   ;;  %v6034_v58 = vld [vmem:[%s6459_s6 + $0x190] sm:$0xff]  }
  0xb1   : > { %v6035_v59 = vld [vmem:[%s6459_s6 + $0x3d0] sm:$0xff]  }
  0xb7   : > { %5650 = vmatmul.mubr.msk.bf16.gmra.mxu0 %vm2389_vm2, %v5972_v60  ;;  %5794 = vmatmul.mubr.msk.bf16.gmra.mxu1 %vm2389_vm2, %v5973_v61 }
  0xb8   : > { %5653 = vmatprep.mubr.msk.bf16.mxu0 %vm2389_vm2, %v5974_v62  ;;  %5797 = vmatprep.mubr.msk.bf16.mxu1 %vm2389_vm2, %v5975_v63 }
  0xbf   : > { %5654 = vmatmul.mubr.msk.bf16.gmra.mxu0 %vm2389_vm2, %v5976_v0  ;;  %5798 = vmatmul.mubr.msk.bf16.gmra.mxu1 %vm2389_vm2, %v5977_v1 }
  0xc0   : > { %5657 = vmatprep.mubr.msk.bf16.mxu0 %vm2389_vm2, %v5978_v2  ;;  %5801 = vmatprep.mubr.msk.bf16.mxu1 %vm2389_vm2, %v5979_v3  ;;  %v6036_v2 = vld [vmem:[%s6459_s6 + $0x198] sm:$0xff]  }
  0xc1   : > { %v6037_v3 = vld [vmem:[%s6459_s6 + $0x3d8] sm:$0xff]  }
  0xc7   : > { %5658 = vmatmul.mubr.msk.bf16.gmra.mxu0 %vm2389_vm2, %v5980_v4  ;;  %5802 = vmatmul.mubr.msk.bf16.gmra.mxu1 %vm2389_vm2, %v5981_v5  ;;  %v6038_v4 = vld [vmem:[%s6459_s6 + $0x1a0] sm:$0xff]  }
  0xc8   : > { %5661 = vmatprep.mubr.msk.bf16.mxu0 %vm2389_vm2, %v5982_v6  ;;  %5805 = vmatprep.mubr.msk.bf16.mxu1 %vm2389_vm2, %v5983_v7  ;;  %v6039_v5 = vld [vmem:[%s6459_s6 + $0x3e0] sm:$0xff]  }
  0xcf   : > { %5662 = vmatmul.mubr.msk.bf16.gmra.mxu0 %vm2389_vm2, %v5984_v8  ;;  %5806 = vmatmul.mubr.msk.bf16.gmra.mxu1 %vm2389_vm2, %v5985_v9 }
  0xd0   : > { %5665 = vmatprep.mubr.msk.bf16.mxu0 %vm2389_vm2, %v5986_v10  ;;  %5809 = vmatprep.mubr.msk.bf16.mxu1 %vm2389_vm2, %v5987_v11 }
  0xd7   : > { %5666 = vmatmul.mubr.msk.bf16.gmra.mxu0 %vm2389_vm2, %v5988_v12  ;;  %5810 = vmatmul.mubr.msk.bf16.gmra.mxu1 %vm2389_vm2, %v5989_v13 }
  0xd8   : > { %5669 = vmatprep.mubr.msk.bf16.mxu0 %vm2389_vm2, %v5990_v14  ;;  %5813 = vmatprep.mubr.msk.bf16.mxu1 %vm2389_vm2, %v5991_v15  ;;  %v6040_v14 = vld [vmem:[%s6459_s6 + $0x1a8] sm:$0xff]  }
  0xd9   : > { %v6041_v15 = vld [vmem:[%s6459_s6 + $0x3e8] sm:$0xff]  }
  0xdf   : > { %5670 = vmatmul.mubr.msk.bf16.gmra.mxu0 %vm2389_vm2, %v5992_v16  ;;  %5814 = vmatmul.mubr.msk.bf16.gmra.mxu1 %vm2389_vm2, %v5993_v17  ;;  %v6042_v16 = vld [vmem:[%s6459_s6 + $0x1b0] sm:$0xff]  }
  0xe0   : > { %5673 = vmatprep.mubr.msk.bf16.mxu0 %vm2389_vm2, %v5994_v18  ;;  %5817 = vmatprep.mubr.msk.bf16.mxu1 %vm2389_vm2, %v5995_v19  ;;  %v6043_v17 = vld [vmem:[%s6459_s6 + $0x3f0] sm:$0xff]  }
  0xe7   : > { %5674 = vmatmul.mubr.msk.bf16.gmra.mxu0 %vm2389_vm2, %v5996_v20  ;;  %5818 = vmatmul.mubr.msk.bf16.gmra.mxu1 %vm2389_vm2, %v5997_v21 }
  0xe8   : > { %5677 = vmatprep.mubr.msk.bf16.mxu0 %vm2389_vm2, %v5998_v22  ;;  %5821 = vmatprep.mubr.msk.bf16.mxu1 %vm2389_vm2, %v5999_v23 }
  0xef   : > { %5678 = vmatmul.mubr.msk.bf16.gmra.mxu0 %vm2389_vm2, %v6000_v24  ;;  %5822 = vmatmul.mubr.msk.bf16.gmra.mxu1 %vm2389_vm2, %v6001_v25 }
  0xf0   : > { %5681 = vmatprep.mubr.msk.bf16.mxu0 %vm2389_vm2, %v6002_v26  ;;  %5825 = vmatprep.mubr.msk.bf16.mxu1 %vm2389_vm2, %v6003_v27  ;;  %v6044_v26 = vld [vmem:[%s6459_s6 + $0x1b8] sm:$0xff]  }
  0xf1   : > { %v6045_v27 = vld [vmem:[%s6459_s6 + $0x3f8] sm:$0xff]  }
  0xf7   : > { %5682 = vmatmul.mubr.msk.bf16.gmra.mxu0 %vm2389_vm2, %v6004_v28  ;;  %5826 = vmatmul.mubr.msk.bf16.gmra.mxu1 %vm2389_vm2, %v6005_v29  ;;  %v6046_v28 = vld [vmem:[%s6459_s6 + $0x1c0] sm:$0xff]  }
  0xf8   : > { %5685 = vmatprep.mubr.msk.bf16.mxu0 %vm2389_vm2, %v6006_v30  ;;  %5829 = vmatprep.mubr.msk.bf16.mxu1 %vm2389_vm2, %v6007_v31  ;;  %v6047_v29 = vld [vmem:[%s6459_s6 + $0x400] sm:$0xff]  }
  0xff   : > { %5686 = vmatmul.mubr.msk.bf16.gmra.mxu0 %vm2389_vm2, %v6008_v32  ;;  %5830 = vmatmul.mubr.msk.bf16.gmra.mxu1 %vm2389_vm2, %v6009_v33 }
 0x100   : > { %5689 = vmatprep.mubr.msk.bf16.mxu0 %vm2389_vm2, %v6010_v34  ;;  %5833 = vmatprep.mubr.msk.bf16.mxu1 %vm2389_vm2, %v6011_v35 }
 0x107   : > { %5690 = vmatmul.mubr.msk.bf16.gmra.mxu0 %vm2389_vm2, %v6012_v36  ;;  %5834 = vmatmul.mubr.msk.bf16.gmra.mxu1 %vm2389_vm2, %v6013_v37 }
 0x108   : > { %5693 = vmatprep.mubr.msk.bf16.mxu0 %vm2389_vm2, %v6014_v38  ;;  %5837 = vmatprep.mubr.msk.bf16.mxu1 %vm2389_vm2, %v6015_v39  ;;  %v6048_v38 = vld [vmem:[%s6459_s6 + $0x1c8] sm:$0xff]  }
 0x109   : > { %v6049_v39 = vld [vmem:[%s6459_s6 + $0x408] sm:$0xff]  }
 0x10f   : > { %5694 = vmatmul.mubr.msk.bf16.gmra.mxu0 %vm2389_vm2, %v6016_v40  ;;  %5838 = vmatmul.mubr.msk.bf16.gmra.mxu1 %vm2389_vm2, %v6017_v41  ;;  %v6050_v40 = vld [vmem:[%s6459_s6 + $0x1d0] sm:$0xff]  }
 0x110   : > { %5697 = vmatprep.mubr.msk.bf16.mxu0 %vm2389_vm2, %v6018_v42  ;;  %5841 = vmatprep.mubr.msk.bf16.mxu1 %vm2389_vm2, %v6019_v43  ;;  %v6051_v41 = vld [vmem:[%s6459_s6 + $0x410] sm:$0xff]  }
 0x117   : > { %5698 = vmatmul.mubr.msk.bf16.gmra.mxu0 %vm2389_vm2, %v6020_v44  ;;  %5842 = vmatmul.mubr.msk.bf16.gmra.mxu1 %vm2389_vm2, %v6021_v45 }
 0x118   : > { %5701 = vmatprep.mubr.msk.bf16.mxu0 %vm2389_vm2, %v6022_v46  ;;  %5845 = vmatprep.mubr.msk.bf16.mxu1 %vm2389_vm2, %v6023_v47 }
 0x11f   : > { %5702 = vmatmul.mubr.msk.bf16.gmra.mxu0 %vm2389_vm2, %v6024_v48  ;;  %5846 = vmatmul.mubr.msk.bf16.gmra.mxu1 %vm2389_vm2, %v6025_v49 }
 0x120   : > { %5705 = vmatprep.mubr.msk.bf16.mxu0 %vm2389_vm2, %v6026_v50  ;;  %5849 = vmatprep.mubr.msk.bf16.mxu1 %vm2389_vm2, %v6027_v51  ;;  %v6052_v50 = vld [vmem:[%s6459_s6 + $0x1d8] sm:$0xff]  }
 0x121   : > { %v6053_v51 = vld [vmem:[%s6459_s6 + $0x418] sm:$0xff]  }
 0x127   : > { %5706 = vmatmul.mubr.msk.bf16.gmra.mxu0 %vm2389_vm2, %v6028_v52  ;;  %5850 = vmatmul.mubr.msk.bf16.gmra.mxu1 %vm2389_vm2, %v6029_v53  ;;  %v6054_v52 = vld [vmem:[%s6459_s6 + $0x1e0] sm:$0xff]  }
 0x128   : > { %5709 = vmatprep.mubr.msk.bf16.mxu0 %vm2389_vm2, %v6030_v54  ;;  %5853 = vmatprep.mubr.msk.bf16.mxu1 %vm2389_vm2, %v6031_v55  ;;  %v6055_v53 = vld [vmem:[%s6459_s6 + $0x420] sm:$0xff]  }
 0x12f   : > { %v6661_v60 = vpop.f32.mrf.mxu0  ;;  %5710 = vmatmul.mubr.msk.bf16.gmra.mxu0 %vm2389_vm2, %v6032_v56  ;;  %v6664_v61 = vpop.f32.mrf.mxu1  ;;  %5854 = vmatmul.mubr.msk.bf16.gmra.mxu1 %vm2389_vm2, %v6033_v57 }
 0x130   : > { %5713 = vmatprep.mubr.msk.bf16.mxu0 %vm2389_vm2, %v6034_v58  ;;  %5857 = vmatprep.mubr.msk.bf16.mxu1 %vm2389_vm2, %v6035_v59 }
 0x131   : > { %v6669_v62 = vpop.f32.mrf.mxu0  ;;  %v6671_v63 = vpop.f32.mrf.mxu1 }
 0x133   : > { %v6673_v0 = vpop.f32.mrf.mxu0  ;;  %v6675_v1 = vpop.f32.mrf.mxu1 }
 0x135   : > { %v6681_v6 = vpop.f32.mrf.mxu0  ;;  %v6683_v7 = vpop.f32.mrf.mxu1 }
 0x137   : > { %v6685_v8 = vpop.f32.mrf.mxu0  ;;  %5714 = vmatmul.mubr.msk.bf16.gmra.mxu0 %vm2389_vm2, %v6036_v2  ;;  %v6688_v9 = vpop.f32.mrf.mxu1  ;;  %5858 = vmatmul.mubr.msk.bf16.gmra.mxu1 %vm2389_vm2, %v6037_v3 }
 0x138   : > { %5717 = vmatprep.mubr.msk.bf16.mxu0 %vm2389_vm2, %v6038_v4  ;;  %5861 = vmatprep.mubr.msk.bf16.mxu1 %vm2389_vm2, %v6039_v5  ;;  %v6056_v4 = vld [vmem:[%s6459_s6 + $0x1e8] sm:$0xff]  }
 0x139   : > { %v6693_v10 = vpop.f32.mrf.mxu0  ;;  %v6695_v11 = vpop.f32.mrf.mxu1  ;;  %v6057_v5 = vld [vmem:[%s6459_s6 + $0x428] sm:$0xff]  }
 0x13b   : > { %v6697_v12 = vpop.f32.mrf.mxu0  ;;  %v6699_v13 = vpop.f32.mrf.mxu1 }
 0x13d   : > { %v6705_v18 = vpop.f32.mrf.mxu0  ;;  %v6707_v19 = vpop.f32.mrf.mxu1 }
 0x13f   : > { %v6709_v20 = vpop.f32.mrf.mxu0  ;;  %5718 = vmatmul.mubr.msk.bf16.gmra.mxu0 %vm2389_vm2, %v6040_v14  ;;  %v6712_v21 = vpop.f32.mrf.mxu1  ;;  %5862 = vmatmul.mubr.msk.bf16.gmra.mxu1 %vm2389_vm2, %v6041_v15  ;;  %v6058_v14 = vld [vmem:[%s6459_s6 + $0x1f0] sm:$0xff]  }
 0x140   : > { %5721 = vmatprep.mubr.msk.bf16.mxu0 %vm2389_vm2, %v6042_v16  ;;  %5865 = vmatprep.mubr.msk.bf16.mxu1 %vm2389_vm2, %v6043_v17  ;;  %v6059_v15 = vld [vmem:[%s6459_s6 + $0x430] sm:$0xff]  }
 0x141   : > { %v6717_v22 = vpop.f32.mrf.mxu0  ;;  %v6719_v23 = vpop.f32.mrf.mxu1 }
 0x143   : > { %v6721_v24 = vpop.f32.mrf.mxu0  ;;  %v6723_v25 = vpop.f32.mrf.mxu1 }
 0x145   : > { %v6729_v30 = vpop.f32.mrf.mxu0  ;;  %v6731_v31 = vpop.f32.mrf.mxu1 }
 0x147   : > { %v6733_v32 = vpop.f32.mrf.mxu0  ;;  %5722 = vmatmul.mubr.msk.bf16.gmra.mxu0 %vm2389_vm2, %v6044_v26  ;;  %v6736_v33 = vpop.f32.mrf.mxu1  ;;  %5866 = vmatmul.mubr.msk.bf16.gmra.mxu1 %vm2389_vm2, %v6045_v27 }
 0x148   : > { %5725 = vmatprep.mubr.msk.bf16.mxu0 %vm2389_vm2, %v6046_v28  ;;  %5869 = vmatprep.mubr.msk.bf16.mxu1 %vm2389_vm2, %v6047_v29 }
 0x149   : > { %v6741_v34 = vpop.f32.mrf.mxu0  ;;  %v6743_v35 = vpop.f32.mrf.mxu1 }
 0x14b   : > { %v6745_v36 = vpop.f32.mrf.mxu0  ;;  %v6747_v37 = vpop.f32.mrf.mxu1 }
 0x14d   : > { %v6753_v42 = vpop.f32.mrf.mxu0  ;;  %v6755_v43 = vpop.f32.mrf.mxu1 }
 0x14f   : > { %v6757_v44 = vpop.f32.mrf.mxu0  ;;  %5726 = vmatmul.mubr.msk.bf16.gmra.mxu0 %vm2389_vm2, %v6048_v38  ;;  %v6760_v45 = vpop.f32.mrf.mxu1  ;;  %5870 = vmatmul.mubr.msk.bf16.gmra.mxu1 %vm2389_vm2, %v6049_v39 }
 0x150   : > { %5729 = vmatprep.mubr.msk.bf16.mxu0 %vm2389_vm2, %v6050_v40  ;;  %5873 = vmatprep.mubr.msk.bf16.mxu1 %vm2389_vm2, %v6051_v41  ;;  %v6060_v40 = vld [vmem:[%s6459_s6 + $0x1f8] sm:$0xff]  }
 0x151   : > { %v6765_v46 = vpop.f32.mrf.mxu0  ;;  %v6767_v47 = vpop.f32.mrf.mxu1  ;;  %v6061_v41 = vld [vmem:[%s6459_s6 + $0x438] sm:$0xff]  }
 0x153   : > { %v6769_v48 = vpop.f32.mrf.mxu0  ;;  %v6771_v49 = vpop.f32.mrf.mxu1 }
 0x155   : > { %v6777_v54 = vpop.f32.mrf.mxu0  ;;  %v6779_v55 = vpop.f32.mrf.mxu1 }
 0x157   : > { %v6781_v56 = vpop.f32.mrf.mxu0  ;;  %5730 = vmatmul.mubr.msk.bf16.gmra.mxu0 %vm2389_vm2, %v6052_v50  ;;  %v6784_v57 = vpop.f32.mrf.mxu1  ;;  %5874 = vmatmul.mubr.msk.bf16.gmra.mxu1 %vm2389_vm2, %v6053_v51  ;;  %v6062_v50 = vld [vmem:[%s6459_s6 + $0x200] sm:$0xff]  }
 0x158   : > { %5733 = vmatprep.mubr.msk.bf16.mxu0 %vm2389_vm2, %v6054_v52  ;;  %5877 = vmatprep.mubr.msk.bf16.mxu1 %vm2389_vm2, %v6055_v53  ;;  %v6063_v51 = vld [vmem:[%s6459_s6 + $0x440] sm:$0xff]  }
 0x159   : > { %v6789_v58 = vpop.f32.mrf.mxu0  ;;  %v6791_v59 = vpop.f32.mrf.mxu1 }
 0x15b   : > { %v6793_v2 = vpop.f32.mrf.mxu0  ;;  %v6795_v3 = vpop.f32.mrf.mxu1 }
 0x15d   : > { %v6801_v16 = vpop.f32.mrf.mxu0  ;;  %v6803_v17 = vpop.f32.mrf.mxu1 }
 0x15f   : > { %v6805_v26 = vpop.f32.mrf.mxu0  ;;  %5734 = vmatmul.mubr.msk.bf16.gmra.mxu0 %vm2389_vm2, %v6056_v4  ;;  %v6808_v27 = vpop.f32.mrf.mxu1  ;;  %5878 = vmatmul.mubr.msk.bf16.gmra.mxu1 %vm2389_vm2, %v6057_v5 }
 0x160   : > { %5737 = vmatprep.mubr.msk.bf16.mxu0 %vm2389_vm2, %v6058_v14  ;;  %5881 = vmatprep.mubr.msk.bf16.mxu1 %vm2389_vm2, %v6059_v15 }
 0x161   : > { %v6813_v28 = vpop.f32.mrf.mxu0  ;;  %v6815_v29 = vpop.f32.mrf.mxu1 }
 0x162   : > { %7310 = vst [vmem:[#allocation3_spill] sm:$0xff] %v6813_v28  ;;  %7311 = vst [vmem:[#allocation4_spill] sm:$0xff] %v6815_v29 }
 0x163   : > { %v6817_v38 = vpop.f32.mrf.mxu0  ;;  %v6819_v39 = vpop.f32.mrf.mxu1 }
 0x164   : > { %7312 = vst [vmem:[#allocation5_spill] sm:$0xff] %v6817_v38  ;;  %7313 = vst [vmem:[#allocation6_spill] sm:$0xff] %v6819_v39 }
 0x165   : > { %v6825_v52 = vpop.f32.mrf.mxu0  ;;  %v6827_v53 = vpop.f32.mrf.mxu1 }
 0x166   : > { %7314 = vst [vmem:[#allocation7_spill] sm:$0xff] %v6825_v52  ;;  %7315 = vst [vmem:[#allocation8_spill] sm:$0xff] %v6827_v53  ;;  %v6064_v53 = vld [vmem:[%s6459_s6 + $0x208] sm:$0xff]  }
 0x167   : > { %v6829_v4 = vpop.f32.mrf.mxu0  ;;  %5738 = vmatmul.mubr.msk.bf16.gmra.mxu0 %vm2389_vm2, %v6060_v40  ;;  %v6832_v5 = vpop.f32.mrf.mxu1  ;;  %5882 = vmatmul.mubr.msk.bf16.gmra.mxu1 %vm2389_vm2, %v6061_v41  ;;  %v6066_v40 = vld [vmem:[%s6459_s6 + $0x210] sm:$0xff]  }
 0x168   : > { %7316 = vst [vmem:[#allocation9_spill] sm:$0xff] %v6829_v4  ;;  %7317 = vst [vmem:[#allocation10_spill] sm:$0xff] %v6832_v5  ;;  %5741 = vmatprep.mubr.msk.bf16.mxu0 %vm2389_vm2, %v6062_v50  ;;  %5885 = vmatprep.mubr.msk.bf16.mxu1 %vm2389_vm2, %v6063_v51  ;;  %v6065_v4 = vld [vmem:[%s6459_s6 + $0x448] sm:$0xff]   ;;  %v6067_v5 = vld [vmem:[%s6459_s6 + $0x450] sm:$0xff]  }
 0x169   : > { %v6837_v14 = vpop.f32.mrf.mxu0  ;;  %v6839_v15 = vpop.f32.mrf.mxu1 }
 0x16a   : > { %7318 = vst [vmem:[#allocation11_spill] sm:$0xff] %v6837_v14  ;;  %7319 = vst [vmem:[#allocation12_spill] sm:$0xff] %v6839_v15 }
 0x16b   : > { %v6841_v39 = vpop.f32.mrf.mxu0  ;;  %v6843_v52 = vpop.f32.mrf.mxu1 }
 0x16c   : > { %7320 = vst [vmem:[#allocation13_spill] sm:$0xff] %v6841_v39  ;;  %7321 = vst [vmem:[#allocation14_spill] sm:$0xff] %v6843_v52 }
 0x16d   : > { %v6849_v41 = vpop.f32.mrf.mxu0  ;;  %v6851_v50 = vpop.f32.mrf.mxu1 }
 0x16e   : > { %7322 = vst [vmem:[#allocation15_spill] sm:$0xff] %v6849_v41  ;;  %7323 = vst [vmem:[#allocation16_spill] sm:$0xff] %v6851_v50  ;;  %v6068_v50 = vld [vmem:[%s6459_s6 + $0x218] sm:$0xff]  }
 0x16f   : > { %v6853_v51 = vpop.f32.mrf.mxu0  ;;  %5742 = vmatmul.mubr.msk.bf16.gmra.mxu0 %vm2389_vm2, %v6064_v53  ;;  %v6856_v15 = vpop.f32.mrf.mxu1  ;;  %5886 = vmatmul.mubr.msk.bf16.gmra.mxu1 %vm2389_vm2, %v6065_v4  ;;  %v6070_v53 = vld [vmem:[%s6459_s6 + $0x220] sm:$0xff]  }
 0x170   : > { %7324 = vst [vmem:[#allocation17_spill] sm:$0xff] %v6853_v51  ;;  %7325 = vst [vmem:[#allocation18_spill] sm:$0xff] %v6856_v15  ;;  %5745 = vmatprep.mubr.msk.bf16.mxu0 %vm2389_vm2, %v6066_v40  ;;  %5889 = vmatprep.mubr.msk.bf16.mxu1 %vm2389_vm2, %v6067_v5  ;;  %v6069_v51 = vld [vmem:[%s6459_s6 + $0x458] sm:$0xff]   ;;  %v6071_v15 = vld [vmem:[%s6459_s6 + $0x460] sm:$0xff]  }
 0x171   : > { %v6861_v52 = vpop.f32.mrf.mxu0  ;;  %v6863_v39 = vpop.f32.mrf.mxu1 }
 0x172   : > { %7326 = vst [vmem:[#allocation19_spill] sm:$0xff] %v6861_v52  ;;  %7327 = vst [vmem:[#allocation20_spill] sm:$0xff] %v6863_v39 }
 0x173   : > { %v6865_v14 = vpop.f32.mrf.mxu0  ;;  %v6867_v41 = vpop.f32.mrf.mxu1 }
 0x174   : > { %7328 = vst [vmem:[#allocation21_spill] sm:$0xff] %v6865_v14  ;;  %7329 = vst [vmem:[#allocation22_spill] sm:$0xff] %v6867_v41 }
 0x175   : > { %v6873_v4 = vpop.f32.mrf.mxu0  ;;  %v6875_v40 = vpop.f32.mrf.mxu1 }
 0x176   : > { %7330 = vst [vmem:[#allocation23_spill] sm:$0xff] %v6873_v4  ;;  %7331 = vst [vmem:[#allocation24_spill] sm:$0xff] %v6875_v40  ;;  %v6072_v40 = vld [vmem:[%s6459_s6 + $0x228] sm:$0xff]  }
 0x177   : > { %v6877_v5 = vpop.f32.mrf.mxu0  ;;  %5746 = vmatmul.mubr.msk.bf16.gmra.mxu0 %vm2389_vm2, %v6068_v50  ;;  %v6880_v39 = vpop.f32.mrf.mxu1  ;;  %5890 = vmatmul.mubr.msk.bf16.gmra.mxu1 %vm2389_vm2, %v6069_v51  ;;  %v6074_v50 = vld [vmem:[%s6459_s6 + $0x230] sm:$0xff]  }
 0x178   : > { %7332 = vst [vmem:[#allocation25_spill] sm:$0xff] %v6877_v5  ;;  %7333 = vst [vmem:[#allocation26_spill] sm:$0xff] %v6880_v39  ;;  %5749 = vmatprep.mubr.msk.bf16.mxu0 %vm2389_vm2, %v6070_v53  ;;  %5893 = vmatprep.mubr.msk.bf16.mxu1 %vm2389_vm2, %v6071_v15  ;;  %v6073_v5 = vld [vmem:[%s6459_s6 + $0x468] sm:$0xff]   ;;  %v6075_v39 = vld [vmem:[%s6459_s6 + $0x470] sm:$0xff]  }
 0x179   : > { %v6885_v41 = vpop.f32.mrf.mxu0  ;;  %v6887_v14 = vpop.f32.mrf.mxu1 }
 0x17a   : > { %7334 = vst [vmem:[#allocation27_spill] sm:$0xff] %v6885_v41  ;;  %7335 = vst [vmem:[#allocation28_spill] sm:$0xff] %v6887_v14 }
 0x17b   : > { %v6889_v52 = vpop.f32.mrf.mxu0  ;;  %v6891_v4 = vpop.f32.mrf.mxu1 }
 0x17c   : > { %7336 = vst [vmem:[#allocation29_spill] sm:$0xff] %v6889_v52  ;;  %7337 = vst [vmem:[#allocation30_spill] sm:$0xff] %v6891_v4 }
 0x17d   : > { %v6897_v38 = vpop.f32.mrf.mxu0  ;;  %v6899_v51 = vpop.f32.mrf.mxu1 }
 0x17e   : > { %7338 = vst [vmem:[#allocation31_spill] sm:$0xff] %v6897_v38  ;;  %7339 = vst [vmem:[#allocation32_spill] sm:$0xff] %v6899_v51  ;;  %v6076_v51 = vld [vmem:[%s6459_s6 + $0x238] sm:$0xff]  }
 0x17f   : > { %v6901_v53 = vpop.f32.mrf.mxu0  ;;  %5750 = vmatmul.mubr.msk.bf16.gmra.mxu0 %vm2389_vm2, %v6072_v40  ;;  %v6904_v15 = vpop.f32.mrf.mxu1  ;;  %5894 = vmatmul.mubr.msk.bf16.gmra.mxu1 %vm2389_vm2, %v6073_v5 }
 0x180   : > { %7340 = vst [vmem:[#allocation33_spill] sm:$0xff] %v6901_v53  ;;  %7341 = vst [vmem:[#allocation34_spill] sm:$0xff] %v6904_v15  ;;  %5753 = vmatprep.mubr.msk.bf16.mxu0 %vm2389_vm2, %v6074_v50  ;;  %5897 = vmatprep.mubr.msk.bf16.mxu1 %vm2389_vm2, %v6075_v39  ;;  %v6077_v53 = vld [vmem:[%s6459_s6 + $0x478] sm:$0xff]  }
 0x181   : > { %v6909_v4 = vpop.f32.mrf.mxu0  ;;  %v6911_v52 = vpop.f32.mrf.mxu1 }
 0x182   : > { %7342 = vst [vmem:[#allocation35_spill] sm:$0xff] %v6909_v4  ;;  %7343 = vst [vmem:[#allocation36_spill] sm:$0xff] %v6911_v52 }
 0x183   : > { %v6913_v14 = vpop.f32.mrf.mxu0  ;;  %v6915_v38 = vpop.f32.mrf.mxu1 }
 0x184   : > { %7344 = vst [vmem:[#allocation37_spill] sm:$0xff] %v6913_v14  ;;  %7345 = vst [vmem:[#allocation38_spill] sm:$0xff] %v6915_v38 }
 0x185   : > { %v6919_v41 = vpop.f32.mrf.mxu0  ;;  %v6921_v40 = vpop.f32.mrf.mxu1 }
 0x186   : > { %7346 = vst [vmem:[#allocation39_spill] sm:$0xff] %v6919_v41  ;;  %7347 = vst [vmem:[#allocation40_spill] sm:$0xff] %v6921_v40 }
 0x187   : > { %v6923_v15 = vpop.f32.mrf.mxu0  ;;  %5754 = vmatmul.mubr.msk.bf16.gmra.mxu0 %vm2389_vm2, %v6076_v51  ;;  %v6926_v5 = vpop.f32.mrf.mxu1  ;;  %5898 = vmatmul.mubr.msk.bf16.gmra.mxu1 %vm2389_vm2, %v6077_v53 }
 0x188   : > { %7348 = vst [vmem:[#allocation41_spill] sm:$0xff] %v6923_v15  ;;  %7349 = vst [vmem:[#allocation42_spill] sm:$0xff] %v6926_v5 }
 0x189   : > { %v6929_v39 = vpop.f32.mrf.mxu0  ;;  %v6931_v50 = vpop.f32.mrf.mxu1 }
 0x18a   : > { %7350 = vst [vmem:[#allocation43_spill] sm:$0xff] %v6929_v39  ;;  %7351 = vst [vmem:[#allocation44_spill] sm:$0xff] %v6931_v50 }
 0x18b   : > { %v6933_v14 = vpop.f32.mrf.mxu0  ;;  %v6935_v38 = vpop.f32.mrf.mxu1 }
 0x18c   : > { %7352 = vst [vmem:[#allocation45_spill] sm:$0xff] %v6933_v14  ;;  %7353 = vst [vmem:[#allocation46_spill] sm:$0xff] %v6935_v38 }
 0x18d   : > { %v6937_v52 = vpop.f32.mrf.mxu0  ;;  %v6939_v41 = vpop.f32.mrf.mxu1 }
 0x18e   : > { %7354 = vst [vmem:[#allocation47_spill] sm:$0xff] %v6937_v52  ;;  %7355 = vst [vmem:[#allocation48_spill] sm:$0xff] %v6939_v41 }
 0x18f   : > { %v6941_v40 = vpop.f32.mrf.mxu0  ;;  %v6943_v15 = vpop.f32.mrf.mxu1 }
 0x190   : > { %7356 = vst [vmem:[#allocation49_spill] sm:$0xff] %v6941_v40  ;;  %7357 = vst [vmem:[#allocation50_spill] sm:$0xff] %v6943_v15 }
 0x191   : > { %v6945_v51 = vpop.f32.mrf.mxu0  ;;  %v6947_v5 = vpop.f32.mrf.mxu1 }
 0x192   : > { %7358 = vst [vmem:[#allocation51_spill] sm:$0xff] %v6945_v51  ;;  %7359 = vst [vmem:[#allocation52_spill] sm:$0xff] %v6947_v5 }
 0x193   : > { %v6949_v53 = vpop.f32.mrf.mxu0  ;;  %v6951_v39 = vpop.f32.mrf.mxu1 }
 0x194   : > { %7360 = vst [vmem:[#allocation53_spill] sm:$0xff] %v6949_v53  ;;  %7361 = vst [vmem:[#allocation54_spill] sm:$0xff] %v6951_v39 }
 0x195   : > { %v6953_v50 = vpop.f32.mrf.mxu0  ;;  %v6955_v14 = vpop.f32.mrf.mxu1 }
 0x196   : > { %7362 = vst [vmem:[#allocation55_spill] sm:$0xff] %v6953_v50  ;;  %7363 = vst [vmem:[#allocation56_spill] sm:$0xff] %v6955_v14 }
 0x197   : > { %v6957_v38 = vpop.f32.mrf.mxu0  ;;  %v6959_v52 = vpop.f32.mrf.mxu1 }
 0x198   : > { %7364 = vst [vmem:[#allocation57_spill] sm:$0xff] %v6957_v38  ;;  %7365 = vst [vmem:[#allocation58_spill] sm:$0xff] %v6959_v52 }
 0x199   : > { %v6961_v41 = vpop.f32.mrf.mxu0  ;;  %v6963_v40 = vpop.f32.mrf.mxu1 }
 0x19a   : > { %7366 = vst [vmem:[#allocation59_spill] sm:$0xff] %v6961_v41  ;;  %7367 = vst [vmem:[#allocation60_spill] sm:$0xff] %v6963_v40 }
 0x19b   : > { %v6965_v15 = vpop.f32.mrf.mxu0  ;;  %v6967_v51 = vpop.f32.mrf.mxu1 }
 0x19c   : > { %7368 = vst [vmem:[#allocation61_spill] sm:$0xff] %v6965_v15  ;;  %7369 = vst [vmem:[#allocation62_spill] sm:$0xff] %v6967_v51 }
 0x19d   : > { %v6969_v5 = vpop.f32.mrf.mxu0  ;;  %v6971_v53 = vpop.f32.mrf.mxu1 }
 0x19e   : > { %7370 = vst [vmem:[#allocation63_spill] sm:$0xff] %v6969_v5  ;;  %7371 = vst [vmem:[#allocation64_spill] sm:$0xff] %v6971_v53 }
 0x19f   : > { %v6973_v39 = vpop.f32.mrf.mxu0  ;;  %v6975_v50 = vpop.f32.mrf.mxu1 }
 0x1a0   : > { %7372 = vst [vmem:[#allocation65_spill] sm:$0xff] %v6973_v39  ;;  %7373 = vst [vmem:[#allocation66_spill] sm:$0xff] %v6975_v50 }
 0x1a1   : > { %v6977_v14 = vpop.f32.mrf.mxu0  ;;  %v6979_v38 = vpop.f32.mrf.mxu1 }
 0x1a2   : > { %7374 = vst [vmem:[#allocation67_spill] sm:$0xff] %v6977_v14  ;;  %7375 = vst [vmem:[#allocation68_spill] sm:$0xff] %v6979_v38 }
 0x1a3   : > { %v6981_v52 = vpop.f32.mrf.mxu0  ;;  %v6983_v41 = vpop.f32.mrf.mxu1 }
 0x1a4   : > { %7376 = vst [vmem:[#allocation69_spill] sm:$0xff] %v6981_v52  ;;  %7377 = vst [vmem:[#allocation70_spill] sm:$0xff] %v6983_v41 }
 0x1a5   : > { %v6985_v40 = vpop.f32.mrf.mxu0  ;;  %v6987_v15 = vpop.f32.mrf.mxu1 }
 0x1a6   : > { %7378 = vst [vmem:[#allocation71_spill] sm:$0xff] %v6985_v40  ;;  %7379 = vst [vmem:[#allocation72_spill] sm:$0xff] %v6987_v15 }
 0x1a7   : > { %v6989_v51 = vpop.f32.mrf.mxu0  ;;  %v6991_v5 = vpop.f32.mrf.mxu1 }
 0x1a8   : > { %7380 = vst [vmem:[#allocation73_spill] sm:$0xff] %v6989_v51  ;;  %7381 = vst [vmem:[#allocation74_spill] sm:$0xff] %v6991_v5 }
 0x1a9   : > { %v6993_v53 = vpop.f32.mrf.mxu0  ;;  %v6995_v39 = vpop.f32.mrf.mxu1 }
 0x1aa   : > { %7382 = vst [vmem:[#allocation75_spill] sm:$0xff] %v6993_v53  ;;  %7383 = vst [vmem:[#allocation76_spill] sm:$0xff] %v6995_v39 }
 0x1ab   : > { %v6997_v50 = vpop.f32.mrf.mxu0  ;;  %v6999_v14 = vpop.f32.mrf.mxu1 }
 0x1ac   : > { %7384 = vst [vmem:[#allocation77_spill] sm:$0xff] %v6997_v50  ;;  %7385 = vst [vmem:[#allocation78_spill] sm:$0xff] %v6999_v14 }
 0x1ad   : > { %v7001_v38 = vpop.f32.mrf.mxu0  ;;  %v7003_v41 = vpop.f32.mrf.mxu1 }
 0x1ae   : > { %7386 = vst [vmem:[#allocation79_spill] sm:$0xff] %v7001_v38  ;;  %7387 = vst [vmem:[#allocation80_spill] sm:$0xff] %v7003_v41 }
 0x1af   : > { %v7005_v40 = vpop.f32.mrf.mxu0  ;;  %v7007_v15 = vpop.f32.mrf.mxu1 }
 0x1b0   : > { %7388 = vst [vmem:[#allocation81_spill] sm:$0xff] %v7005_v40  ;;  %7389 = vst [vmem:[#allocation82_spill] sm:$0xff] %v7007_v15 }
 0x1b1   : > { %v7009_v51 = vpop.f32.mrf.mxu0  ;;  %v7011_v5 = vpop.f32.mrf.mxu1 }
 0x1b2   : > { %7390 = vst [vmem:[#allocation83_spill] sm:$0xff] %v7009_v51  ;;  %7391 = vst [vmem:[#allocation84_spill] sm:$0xff] %v7011_v5 }
 0x1b3   : > { %v7013_v53 = vpop.f32.mrf.mxu0  ;;  %v7015_v39 = vpop.f32.mrf.mxu1 }
 0x1b4   : > { %7392 = vst [vmem:[#allocation85_spill] sm:$0xff] %v7013_v53  ;;  %7393 = vst [vmem:[#allocation86_spill] sm:$0xff] %v7015_v39 }
 0x1b5   : > { %v7017_v50 = vpop.f32.mrf.mxu0  ;;  %v7019_v14 = vpop.f32.mrf.mxu1 }
 0x1b6   : > { %7394 = vst [vmem:[#allocation87_spill] sm:$0xff] %v7017_v50  ;;  %7395 = vst [vmem:[#allocation88_spill] sm:$0xff] %v7019_v14 }
 0x1b7   : > { %v7021_v38 = vpop.f32.mrf.mxu0  ;;  %v7023_v52 = vpop.f32.mrf.mxu1 }
 0x1b8   : > { %7396 = vst [vmem:[#allocation89_spill] sm:$0xff] %v7021_v38  ;;  %7397 = vst [vmem:[#allocation90_spill] sm:$0xff] %v7023_v52 }
 0x1b9   : > { %v7025_v41 = vpop.f32.mrf.mxu0  ;;  %v7027_v40 = vpop.f32.mrf.mxu1 }
 0x1ba   : > { %7398 = vst [vmem:[#allocation91_spill] sm:$0xff] %v7025_v41  ;;  %7399 = vst [vmem:[#allocation92_spill] sm:$0xff] %v7027_v40 }
 0x1bb   : > { %v7029_v15 = vpop.f32.mrf.mxu0  ;;  %v7031_v51 = vpop.f32.mrf.mxu1 }
 0x1bc   : > { %7400 = vst [vmem:[#allocation93_spill] sm:$0xff] %v7029_v15  ;;  %7401 = vst [vmem:[#allocation94_spill] sm:$0xff] %v7031_v51 }
 0x1bd   : > { %v7035_v53 = vpop.f32.mrf.mxu0  ;;  %v7037_v39 = vpop.f32.mrf.mxu1 }
 0x1be   : > { %7402 = vst [vmem:[#allocation95_spill] sm:$0xff] %v7035_v53  ;;  %7403 = vst [vmem:[#allocation96_spill] sm:$0xff] %v7037_v39  ;;  %v7046_v53 = vld [vmem:[%s7308_s2] ss:$0 sm:$0xff] }
 0x1bf   : > { %v5687_v50 = vpop.f32.mrf.mxu0  ;;  %v5831_v14 = vpop.f32.mrf.mxu1 }
 0x1c0   : > { %v4016_v38 = vmax.f32 %v6661_v60, %v5687_v50  ;;  %v4088_v52 = vmax.f32 %v6664_v61, %v5831_v14 }
 0x1c1   : > { %v3151_v41 = vpop.f32.mrf.mxu0  ;;  %v3727_v5 = vpop.f32.mrf.mxu1 }
 0x1c2   : > { %v4160_v40 = vmax.f32 %v4016_v38, %v4088_v52  ;;  %v4014_v15 = vmax.f32 %v6669_v62, %v3151_v41  ;;  %v4086_v51 = vmax.f32 %v6671_v63, %v3727_v5 }
 0x1c3   : > { %v5688_v39 = vpop.f32.mrf.mxu0  ;;  %v5832_v4 = vpop.f32.mrf.mxu1 }
 0x1c4   : > { %v4017_v29 = vmax.f32 %v6673_v0, %v5688_v39  ;;  %v4089_v60 = vmax.f32 %v6675_v1, %v5832_v4  ;;  %v4158_v61 = vmax.f32 %v4014_v15, %v4086_v51  ;;  %v4239_v38 = vadd.f32 %v7046_v53, %v4160_v40 }
 0x1c5   : > { %v3154_v14 = vpop.f32.mrf.mxu0  ;;  %v3730_v50 = vpop.f32.mrf.mxu1 }
 0x1c6   : > { %v4161_v62 = vmax.f32 %v4017_v29, %v4089_v60  ;;  %v4015_v63 = vmax.f32 %v6681_v6, %v3154_v14  ;;  %v4087_v52 = vmax.f32 %v6683_v7, %v3730_v50  ;;  %v4237_v1 = vadd.f32 %v7046_v53, %v4158_v61 }
 0x1c7   : > { %v5691_v41 = vpop.f32.mrf.mxu0  ;;  %v5835_v5 = vpop.f32.mrf.mxu1  ;;  %v4311_v40 = vmax.f32 %v4239_v38, 0.0 }
 0x1c8   : > { %v4240_v28 = vadd.f32 %v7046_v53, %v4161_v62  ;;  %v4020_v0 = vmax.f32 %v6685_v8, %v5691_v41  ;;  %v4092_v39 = vmax.f32 %v6688_v9, %v5835_v5  ;;  %v4159_v4 = vmax.f32 %v4015_v63, %v4087_v52 }
 0x1c9   : > { %v3167_v15 = vpop.f32.mrf.mxu0  ;;  %v3743_v51 = vpop.f32.mrf.mxu1 }
 0x1ca   : > { %v4312_v29 = vmax.f32 %v4240_v28, 0.0  ;;  %v4018_v6 = vmax.f32 %v6693_v10, %v3167_v15  ;;  %v4090_v7 = vmax.f32 %v6695_v11, %v3743_v51  ;;  %v4238_v8 = vadd.f32 %v7046_v53, %v4159_v4 }
 0x1cb   : > { %v4164_v9 = vmax.f32 %v4020_v0, %v4092_v39  ;;  %v5692_v60 = vpop.f32.mrf.mxu0  ;;  %v5836_v61 = vpop.f32.mrf.mxu1  ;;  %v4309_v28 = vmax.f32 %v4237_v1, 0.0 }
 0x1cc   : > { %v5256_v14 = vpack.c.bf16 %v4312_v29, %v4311_v40  ;;  %v4162_v50 = vmax.f32 %v4018_v6, %v4090_v7  ;;  %v4021_v38 = vmax.f32 %v6697_v12, %v5692_v60  ;;  %v4310_v62 = vmax.f32 %v4238_v8, 0.0 }
 0x1cd   : > { %v4093_v10 = vmax.f32 %v6699_v13, %v5836_v61  ;;  %v3170_v11 = vpop.f32.mrf.mxu0  ;;  %v3746_v63 = vpop.f32.mrf.mxu1  ;;  %v4243_v0 = vadd.f32 %v7046_v53, %v4164_v9 }
 0x1ce   : > { %5428 = vst [vmem:[%s7062_s14 + $0x8] sm:$0xff] %v5256_v14   ;;  %v4019_v52 = vmax.f32 %v6705_v18, %v3170_v11  ;;  %v4091_v41 = vmax.f32 %v6707_v19, %v3746_v63  ;;  %v5251_v5 = vpack.c.bf16 %v4310_v62, %v4309_v28  ;;  %v4241_v12 = vadd.f32 %v7046_v53, %v4162_v50 }
 0x1cf   : > { %v4165_v39 = vmax.f32 %v4021_v38, %v4093_v10  ;;  %v5695_v4 = vpop.f32.mrf.mxu0  ;;  %v5839_v15 = vpop.f32.mrf.mxu1  ;;  %v4315_v8 = vmax.f32 %v4243_v0, 0.0 }
 0x1d0   : > { %v4163_v1 = vmax.f32 %v4019_v52, %v4091_v41  ;;  %v4024_v51 = vmax.f32 %v6709_v20, %v5695_v4  ;;  %v4096_v13 = vmax.f32 %v6712_v21, %v5839_v15  ;;  %5252 = vst [vmem:[%s7062_s14] sm:$0xff] %v5251_v5   ;;  %v4313_v20 = vmax.f32 %v4241_v12, 0.0 }
 0x1d1   : > { %v4244_v40 = vadd.f32 %v7046_v53, %v4165_v39  ;;  %v3183_v29 = vpop.f32.mrf.mxu0  ;;  %v3759_v18 = vpop.f32.mrf.mxu1 }
 0x1d2   : > { %v4242_v19 = vadd.f32 %v7046_v53, %v4163_v1  ;;  %v4022_v6 = vmax.f32 %v6717_v22, %v3183_v29  ;;  %v4094_v7 = vmax.f32 %v6719_v23, %v3759_v18  ;;  %v4168_v60 = vmax.f32 %v4024_v51, %v4096_v13 }
 0x1d3   : > { %v4316_v9 = vmax.f32 %v4244_v40, 0.0  ;;  %v5696_v61 = vpop.f32.mrf.mxu0  ;;  %v5840_v14 = vpop.f32.mrf.mxu1 }
 0x1d4   : > { %v4314_v21 = vmax.f32 %v4242_v19, 0.0  ;;  %v4025_v50 = vmax.f32 %v6721_v24, %v5696_v61  ;;  %v4166_v28 = vmax.f32 %v4022_v6, %v4094_v7  ;;  %v4097_v62 = vmax.f32 %v6723_v25, %v5840_v14 }
 0x1d5   : > { %v5266_v38 = vpack.c.bf16 %v4316_v9, %v4315_v8  ;;  %v3186_v10 = vpop.f32.mrf.mxu0  ;;  %v3762_v11 = vpop.f32.mrf.mxu1  ;;  %v4247_v63 = vadd.f32 %v7046_v53, %v4168_v60 }
 0x1d6   : > { %v5261_v22 = vpack.c.bf16 %v4314_v21, %v4313_v20  ;;  %v4023_v23 = vmax.f32 %v6729_v30, %v3186_v10  ;;  %v4169_v52 = vmax.f32 %v4025_v50, %v4097_v62  ;;  %v4095_v41 = vmax.f32 %v6731_v31, %v3762_v11 }
 0x1d7   : > { %5430 = vst [vmem:[%s7062_s14 + $0x18] sm:$0xff] %v5266_v38   ;;  %v5699_v5 = vpop.f32.mrf.mxu0  ;;  %v5843_v0 = vpop.f32.mrf.mxu1  ;;  %v4245_v25 = vadd.f32 %v7046_v53, %v4166_v28  ;;  %v4319_v31 = vmax.f32 %v4247_v63, 0.0 }
 0x1d8   : > { %5429 = vst [vmem:[%s7062_s14 + $0x10] sm:$0xff] %v5261_v22   ;;  %v4028_v24 = vmax.f32 %v6733_v32, %v5699_v5  ;;  %v4100_v39 = vmax.f32 %v6736_v33, %v5843_v0  ;;  %v4248_v4 = vadd.f32 %v7046_v53, %v4169_v52  ;;  %v4167_v15 = vmax.f32 %v4023_v23, %v4095_v41 }
 0x1d9   : > { %v3199_v12 = vpop.f32.mrf.mxu0  ;;  %v3775_v30 = vpop.f32.mrf.mxu1  ;;  %v4317_v6 = vmax.f32 %v4245_v25, 0.0 }
 0x1da   : > { %v4172_v1 = vmax.f32 %v4028_v24, %v4100_v39  ;;  %v4026_v51 = vmax.f32 %v6741_v34, %v3199_v12  ;;  %v4098_v13 = vmax.f32 %v6743_v35, %v3775_v30  ;;  %v4320_v40 = vmax.f32 %v4248_v4, 0.0 }
 0x1db   : > { %v4246_v29 = vadd.f32 %v7046_v53, %v4167_v15  ;;  %v5700_v32 = vpop.f32.mrf.mxu0  ;;  %v5844_v18 = vpop.f32.mrf.mxu1 }
 0x1dc   : > { %v4029_v33 = vmax.f32 %v6745_v36, %v5700_v32  ;;  %v4101_v19 = vmax.f32 %v6747_v37, %v5844_v18  ;;  %v5276_v7 = vpack.c.bf16 %v4320_v40, %v4319_v31  ;;  %v4170_v9 = vmax.f32 %v4026_v51, %v4098_v13 }
 0x1dd   : > { %v4318_v8 = vmax.f32 %v4246_v29, 0.0  ;;  %v3202_v60 = vpop.f32.mrf.mxu0  ;;  %v3778_v34 = vpop.f32.mrf.mxu1  ;;  %v4251_v35 = vadd.f32 %v7046_v53, %v4172_v1 }
 0x1de   : > { %v4173_v61 = vmax.f32 %v4029_v33, %v4101_v19  ;;  %v4027_v14 = vmax.f32 %v6753_v42, %v3202_v60  ;;  %5432 = vst [vmem:[%s7062_s14 + $0x28] sm:$0xff] %v5276_v7   ;;  %v4099_v21 = vmax.f32 %v6755_v43, %v3778_v34  ;;  %v4249_v62 = vadd.f32 %v7046_v53, %v4170_v9 }
 0x1df   : > { %v5271_v20 = vpack.c.bf16 %v4318_v8, %v4317_v6  ;;  %v5703_v50 = vpop.f32.mrf.mxu0  ;;  %v5847_v36 = vpop.f32.mrf.mxu1  ;;  %v4323_v23 = vmax.f32 %v4251_v35, 0.0 }
 0x1e0   : > { %v4252_v37 = vadd.f32 %v7046_v53, %v4173_v61  ;;  %v4032_v38 = vmax.f32 %v6757_v44, %v5703_v50  ;;  %v4104_v28 = vmax.f32 %v6760_v45, %v5847_v36  ;;  %v4171_v10 = vmax.f32 %v4027_v14, %v4099_v21 }
 0x1e1   : > { %5431 = vst [vmem:[%s7062_s14 + $0x20] sm:$0xff] %v5271_v20   ;;  %v3215_v11 = vpop.f32.mrf.mxu0  ;;  %v3791_v22 = vpop.f32.mrf.mxu1  ;;  %v4321_v39 = vmax.f32 %v4249_v62, 0.0 }
 0x1e2   : > { %v4324_v42 = vmax.f32 %v4252_v37, 0.0  ;;  %v4030_v63 = vmax.f32 %v6765_v46, %v3215_v11  ;;  %v4102_v43 = vmax.f32 %v6767_v47, %v3791_v22  ;;  %v4250_v52 = vadd.f32 %v7046_v53, %v4171_v10 }
 0x1e3   : > { %v4176_v41 = vmax.f32 %v4032_v38, %v4104_v28  ;;  %v5704_v5 = vpop.f32.mrf.mxu0  ;;  %v5848_v44 = vpop.f32.mrf.mxu1 }
 0x1e4   : > { %v5286_v0 = vpack.c.bf16 %v4324_v42, %v4323_v23  ;;  %v4174_v45 = vmax.f32 %v4030_v63, %v4102_v43  ;;  %v4033_v24 = vmax.f32 %v6769_v48, %v5704_v5  ;;  %v4322_v25 = vmax.f32 %v4250_v52, 0.0  ;;  %v7404_v42 = vld [vmem:[#allocation3_spill] sm:$0xff]  ;;  %v7405_v43 = vld [vmem:[#allocation4_spill] sm:$0xff] }
 0x1e5   : > { %v4105_v4 = vmax.f32 %v6771_v49, %v5848_v44  ;;  %v3218_v15 = vpop.f32.mrf.mxu0  ;;  %v3794_v12 = vpop.f32.mrf.mxu1  ;;  %v4255_v1 = vadd.f32 %v7046_v53, %v4176_v41 }
 0x1e6   : > { %5434 = vst [vmem:[%s7062_s14 + $0x38] sm:$0xff] %v5286_v0   ;;  %v4031_v46 = vmax.f32 %v6777_v54, %v3218_v15  ;;  %v4103_v47 = vmax.f32 %v6779_v55, %v3794_v12  ;;  %v5281_v30 = vpack.c.bf16 %v4322_v25, %v4321_v39  ;;  %v4253_v48 = vadd.f32 %v7046_v53, %v4174_v45  ;;  %v7407_v45 = vld [vmem:[#allocation6_spill] sm:$0xff] }
 0x1e7   : > { %v4177_v51 = vmax.f32 %v4033_v24, %v4105_v4  ;;  %v5707_v13 = vpop.f32.mrf.mxu0  ;;  %v5851_v31 = vpop.f32.mrf.mxu1  ;;  %v4327_v6 = vmax.f32 %v4255_v1, 0.0  ;;  %v7408_v1 = vld [vmem:[#allocation7_spill] sm:$0xff] }
 0x1e8   : > { %v4175_v40 = vmax.f32 %v4031_v46, %v4103_v47  ;;  %v4036_v29 = vmax.f32 %v6781_v56, %v5707_v13  ;;  %v4108_v49 = vmax.f32 %v6784_v57, %v5851_v31  ;;  %5433 = vst [vmem:[%s7062_s14 + $0x30] sm:$0xff] %v5281_v30   ;;  %v4325_v56 = vmax.f32 %v4253_v48, 0.0  ;;  %v7409_v31 = vld [vmem:[#allocation8_spill] sm:$0xff] }
 0x1e9   : > { %v4256_v32 = vadd.f32 %v7046_v53, %v4177_v51  ;;  %v3231_v18 = vpop.f32.mrf.mxu0  ;;  %v3807_v54 = vpop.f32.mrf.mxu1 }
 0x1ea   : > { %v4254_v55 = vadd.f32 %v7046_v53, %v4175_v40  ;;  %v4034_v33 = vmax.f32 %v6789_v58, %v3231_v18  ;;  %v4106_v19 = vmax.f32 %v6791_v59, %v3807_v54  ;;  %v4180_v8 = vmax.f32 %v4036_v29, %v4108_v49  ;;  %v7411_v54 = vld [vmem:[#allocation10_spill] sm:$0xff] }
 0x1eb   : > { %v4328_v7 = vmax.f32 %v4256_v32, 0.0  ;;  %v5708_v9 = vpop.f32.mrf.mxu0  ;;  %v5852_v60 = vpop.f32.mrf.mxu1  ;;  %v7410_v32 = vld [vmem:[#allocation9_spill] sm:$0xff] }
 0x1ec   : > { %v4326_v57 = vmax.f32 %v4254_v55, 0.0  ;;  %v4037_v34 = vmax.f32 %v6793_v2, %v5708_v9  ;;  %v4178_v61 = vmax.f32 %v4034_v33, %v4106_v19  ;;  %v4109_v14 = vmax.f32 %v6795_v3, %v5852_v60  ;;  %v7412_v60 = vld [vmem:[#allocation11_spill] sm:$0xff] }
 0x1ed   : > { %v5296_v35 = vpack.c.bf16 %v4328_v7, %v4327_v6  ;;  %v3234_v20 = vpop.f32.mrf.mxu0  ;;  %v3810_v21 = vpop.f32.mrf.mxu1  ;;  %v4259_v50 = vadd.f32 %v7046_v53, %v4180_v8 }
 0x1ee   : > { %v5291_v58 = vpack.c.bf16 %v4326_v57, %v4325_v56  ;;  %v4035_v59 = vmax.f32 %v6801_v16, %v3234_v20  ;;  %v4181_v36 = vmax.f32 %v4037_v34, %v4109_v14  ;;  %v4107_v37 = vmax.f32 %v6803_v17, %v3810_v21  ;;  %v7413_v57 = vld [vmem:[#allocation12_spill] sm:$0xff] }
 0x1ef   : > { %5436 = vst [vmem:[%s7062_s14 + $0x48] sm:$0xff] %v5296_v35   ;;  %v5711_v38 = vpop.f32.mrf.mxu0  ;;  %v5855_v28 = vpop.f32.mrf.mxu1  ;;  %v4257_v3 = vadd.f32 %v7046_v53, %v4178_v61  ;;  %v4331_v17 = vmax.f32 %v4259_v50, 0.0 }
 0x1f0   : > { %5435 = vst [vmem:[%s7062_s14 + $0x40] sm:$0xff] %v5291_v58   ;;  %v4040_v2 = vmax.f32 %v6805_v26, %v5711_v38  ;;  %v4112_v62 = vmax.f32 %v6808_v27, %v5855_v28  ;;  %v4260_v10 = vadd.f32 %v7046_v53, %v4181_v36  ;;  %v4179_v11 = vmax.f32 %v4035_v59, %v4107_v37  ;;  %v7406_v27 = vld [vmem:[#allocation5_spill] sm:$0xff]  ;;  %v7415_v38 = vld [vmem:[#allocation14_spill] sm:$0xff] }
 0x1f1   : > { %v3247_v22 = vpop.f32.mrf.mxu0  ;;  %v3823_v16 = vpop.f32.mrf.mxu1  ;;  %v4329_v39 = vmax.f32 %v4257_v3, 0.0  ;;  %v7414_v59 = vld [vmem:[#allocation13_spill] sm:$0xff]  ;;  %v7416_v3 = vld [vmem:[#allocation15_spill] sm:$0xff] }
 0x1f2   : > { %v4184_v23 = vmax.f32 %v4040_v2, %v4112_v62  ;;  %v4038_v63 = vmax.f32 %v7404_v42, %v3247_v22  ;;  %v4110_v52 = vmax.f32 %v7405_v43, %v3823_v16  ;;  %v4332_v41 = vmax.f32 %v4260_v10, 0.0 }
 0x1f3   : > { %v4258_v5 = vadd.f32 %v7046_v53, %v4179_v11  ;;  %v5712_v26 = vpop.f32.mrf.mxu0  ;;  %v5856_v44 = vpop.f32.mrf.mxu1  ;;  %v7417_v11 = vld [vmem:[#allocation16_spill] sm:$0xff] }
 0x1f4   : > { %v4041_v0 = vmax.f32 %v7406_v27, %v5712_v26  ;;  %v4113_v24 = vmax.f32 %v7407_v45, %v5856_v44  ;;  %v5306_v25 = vpack.c.bf16 %v4332_v41, %v4331_v17  ;;  %v4182_v15 = vmax.f32 %v4038_v63, %v4110_v52  ;;  %v7418_v41 = vld [vmem:[#allocation17_spill] sm:$0xff]  ;;  %v7419_v26 = vld [vmem:[#allocation18_spill] sm:$0xff] }
 0x1f5   : > { %v4330_v4 = vmax.f32 %v4258_v5, 0.0  ;;  %v3250_v12 = vpop.f32.mrf.mxu0  ;;  %v3826_v46 = vpop.f32.mrf.mxu1  ;;  %v4263_v47 = vadd.f32 %v7046_v53, %v4184_v23 }
 0x1f6   : > { %v4185_v30 = vmax.f32 %v4041_v0, %v4113_v24  ;;  %v4039_v51 = vmax.f32 %v7408_v1, %v3250_v12  ;;  %5438 = vst [vmem:[%s7062_s14 + $0x58] sm:$0xff] %v5306_v25   ;;  %v4111_v48 = vmax.f32 %v7409_v31, %v3826_v46  ;;  %v4261_v33 = vadd.f32 %v7046_v53, %v4182_v15  ;;  %v7422_v31 = vld [vmem:[#allocation21_spill] sm:$0xff] }
 0x1f7   : > { %v5301_v13 = vpack.c.bf16 %v4330_v4, %v4329_v39  ;;  %v5715_v40 = vpop.f32.mrf.mxu0  ;;  %v5859_v29 = vpop.f32.mrf.mxu1  ;;  %v4335_v8 = vmax.f32 %v4263_v47, 0.0  ;;  %v7420_v39 = vld [vmem:[#allocation19_spill] sm:$0xff]  ;;  %v7421_v4 = vld [vmem:[#allocation20_spill] sm:$0xff] }
 0x1f8   : > { %v4264_v49 = vadd.f32 %v7046_v53, %v4185_v30  ;;  %v4044_v18 = vmax.f32 %v7410_v32, %v5715_v40  ;;  %v4116_v55 = vmax.f32 %v7411_v54, %v5859_v29  ;;  %v4183_v19 = vmax.f32 %v4039_v51, %v4111_v48 }
 0x1f9   : > { %5437 = vst [vmem:[%s7062_s14 + $0x50] sm:$0xff] %v5301_v13   ;;  %v3263_v6 = vpop.f32.mrf.mxu0  ;;  %v3839_v7 = vpop.f32.mrf.mxu1  ;;  %v4333_v36 = vmax.f32 %v4261_v33, 0.0  ;;  %v7424_v33 = vld [vmem:[#allocation23_spill] sm:$0xff] }
 0x1fa   : > { %v4336_v9 = vmax.f32 %v4264_v49, 0.0  ;;  %v4042_v56 = vmax.f32 %v7412_v60, %v3263_v6  ;;  %v4114_v34 = vmax.f32 %v7413_v57, %v3839_v7  ;;  %v4262_v35 = vadd.f32 %v7046_v53, %v4183_v19  ;;  %v7423_v49 = vld [vmem:[#allocation22_spill] sm:$0xff]  ;;  %v7426_v57 = vld [vmem:[#allocation25_spill] sm:$0xff] }
 0x1fb   : > { %v4188_v61 = vmax.f32 %v4044_v18, %v4116_v55  ;;  %v5716_v14 = vpop.f32.mrf.mxu0  ;;  %v5860_v20 = vpop.f32.mrf.mxu1 }
 0x1fc   : > { %v5316_v21 = vpack.c.bf16 %v4336_v9, %v4335_v8  ;;  %v4186_v58 = vmax.f32 %v4042_v56, %v4114_v34  ;;  %v4045_v50 = vmax.f32 %v7414_v59, %v5716_v14  ;;  %v4334_v37 = vmax.f32 %v4262_v35, 0.0  ;;  %v7425_v8 = vld [vmem:[#allocation24_spill] sm:$0xff]  ;;  %v7427_v35 = vld [vmem:[#allocation26_spill] sm:$0xff] }
 0x1fd   : > { %v4117_v28 = vmax.f32 %v7415_v38, %v5860_v20  ;;  %v3266_v2 = vpop.f32.mrf.mxu0  ;;  %v3842_v62 = vpop.f32.mrf.mxu1  ;;  %v4267_v23 = vadd.f32 %v7046_v53, %v4188_v61  ;;  %v7429_v38 = vld [vmem:[#allocation28_spill] sm:$0xff] }
 0x1fe   : > { %5440 = vst [vmem:[%s7062_s14 + $0x68] sm:$0xff] %v5316_v21   ;;  %v4043_v10 = vmax.f32 %v7416_v3, %v3266_v2  ;;  %v4115_v22 = vmax.f32 %v7417_v11, %v3842_v62  ;;  %v5311_v16 = vpack.c.bf16 %v4334_v37, %v4333_v36  ;;  %v4265_v52 = vadd.f32 %v7046_v53, %v4186_v58  ;;  %v7428_v36 = vld [vmem:[#allocation27_spill] sm:$0xff] }
 0x1ff   : > { %v4189_v42 = vmax.f32 %v4045_v50, %v4117_v28  ;;  %v5719_v63 = vpop.f32.mrf.mxu0  ;;  %v5863_v43 = vpop.f32.mrf.mxu1  ;;  %v4339_v12 = vmax.f32 %v4267_v23, 0.0  ;;  %v7431_v23 = vld [vmem:[#allocation30_spill] sm:$0xff] }
 0x200   : > { %v4187_v17 = vmax.f32 %v4043_v10, %v4115_v22  ;;  %v4048_v5 = vmax.f32 %v7418_v41, %v5719_v63  ;;  %v4120_v44 = vmax.f32 %v7419_v26, %v5863_v43  ;;  %5439 = vst [vmem:[%s7062_s14 + $0x60] sm:$0xff] %v5311_v16   ;;  %v4337_v51 = vmax.f32 %v4265_v52, 0.0  ;;  %v7430_v22 = vld [vmem:[#allocation29_spill] sm:$0xff] }
 0x201   : > { %v4268_v27 = vadd.f32 %v7046_v53, %v4189_v42  ;;  %v3279_v0 = vpop.f32.mrf.mxu0  ;;  %v3855_v45 = vpop.f32.mrf.mxu1 }
 0x202   : > { %v4266_v24 = vadd.f32 %v7046_v53, %v4187_v17  ;;  %v4046_v25 = vmax.f32 %v7420_v39, %v3279_v0  ;;  %v4118_v15 = vmax.f32 %v7421_v4, %v3855_v45  ;;  %v4192_v47 = vmax.f32 %v4048_v5, %v4120_v44 }
 0x203   : > { %v4340_v46 = vmax.f32 %v4268_v27, 0.0  ;;  %v5720_v30 = vpop.f32.mrf.mxu0  ;;  %v5864_v1 = vpop.f32.mrf.mxu1  ;;  %v7432_v27 = vld [vmem:[#allocation31_spill] sm:$0xff] }
 0x204   : > { %v4338_v13 = vmax.f32 %v4266_v24, 0.0  ;;  %v4049_v48 = vmax.f32 %v7422_v31, %v5720_v30  ;;  %v4190_v29 = vmax.f32 %v4046_v25, %v4118_v15  ;;  %v4121_v32 = vmax.f32 %v7423_v49, %v5864_v1  ;;  %v7433_v24 = vld [vmem:[#allocation32_spill] sm:$0xff] }
 0x205   : > { %v5326_v40 = vpack.c.bf16 %v4340_v46, %v4339_v12  ;;  %v3282_v18 = vpop.f32.mrf.mxu0  ;;  %v3858_v54 = vpop.f32.mrf.mxu1  ;;  %v4271_v6 = vadd.f32 %v7046_v53, %v4192_v47  ;;  %v7434_v12 = vld [vmem:[#allocation33_spill] sm:$0xff]  ;;  %v7435_v47 = vld [vmem:[#allocation34_spill] sm:$0xff] }
 0x206   : > { %v5321_v55 = vpack.c.bf16 %v4338_v13, %v4337_v51  ;;  %v4047_v19 = vmax.f32 %v7424_v33, %v3282_v18  ;;  %v4193_v7 = vmax.f32 %v4049_v48, %v4121_v32  ;;  %v4119_v9 = vmax.f32 %v7425_v8, %v3858_v54  ;;  %v7437_v32 = vld [vmem:[#allocation36_spill] sm:$0xff]  ;;  %v7438_v8 = vld [vmem:[#allocation37_spill] sm:$0xff] }
 0x207   : > { %5442 = vst [vmem:[%s7062_s14 + $0x78] sm:$0xff] %v5326_v40   ;;  %v5723_v60 = vpop.f32.mrf.mxu0  ;;  %v5867_v56 = vpop.f32.mrf.mxu1  ;;  %v4269_v14 = vadd.f32 %v7046_v53, %v4190_v29  ;;  %v4343_v2 = vmax.f32 %v4271_v6, 0.0  ;;  %v7436_v29 = vld [vmem:[#allocation35_spill] sm:$0xff] }
 0x208   : > { %5441 = vst [vmem:[%s7062_s14 + $0x70] sm:$0xff] %v5321_v55   ;;  %v4052_v34 = vmax.f32 %v7426_v57, %v5723_v60  ;;  %v4124_v61 = vmax.f32 %v7427_v35, %v5867_v56  ;;  %v4272_v20 = vadd.f32 %v7046_v53, %v4193_v7  ;;  %v4191_v21 = vmax.f32 %v4047_v19, %v4119_v9  ;;  %v7439_v57 = vld [vmem:[#allocation38_spill] sm:$0xff] }
 0x209   : > { %v3295_v58 = vpop.f32.mrf.mxu0  ;;  %v3871_v59 = vpop.f32.mrf.mxu1  ;;  %v4341_v63 = vmax.f32 %v4269_v14, 0.0  ;;  %v7440_v14 = vld [vmem:[#allocation39_spill] sm:$0xff] }
 0x20a   : > { %v4196_v50 = vmax.f32 %v4052_v34, %v4124_v61  ;;  %v4050_v37 = vmax.f32 %v7428_v36, %v3295_v58  ;;  %v4122_v28 = vmax.f32 %v7429_v38, %v3871_v59  ;;  %v4344_v62 = vmax.f32 %v4272_v20, 0.0 }
 0x20b   : > { %v4270_v3 = vadd.f32 %v7046_v53, %v4191_v21  ;;  %v5724_v10 = vpop.f32.mrf.mxu0  ;;  %v5868_v11 = vpop.f32.mrf.mxu1  ;;  %v7441_v21 = vld [vmem:[#allocation40_spill] sm:$0xff] }
 0x20c   : > { %v4053_v16 = vmax.f32 %v7430_v22, %v5724_v10  ;;  %v4125_v42 = vmax.f32 %v7431_v23, %v5868_v11  ;;  %v5336_v43 = vpack.c.bf16 %v4344_v62, %v4343_v2  ;;  %v4194_v17 = vmax.f32 %v4050_v37, %v4122_v28  ;;  %v7442_v62 = vld [vmem:[#allocation41_spill] sm:$0xff]  ;;  %v7443_v10 = vld [vmem:[#allocation42_spill] sm:$0xff] }
 0x20d   : > { %v4342_v52 = vmax.f32 %v4270_v3, 0.0  ;;  %v3298_v41 = vpop.f32.mrf.mxu0  ;;  %v3874_v5 = vpop.f32.mrf.mxu1  ;;  %v4275_v26 = vadd.f32 %v7046_v53, %v4196_v50 }
 0x20e   : > { %v4197_v44 = vmax.f32 %v4053_v16, %v4125_v42  ;;  %v4051_v0 = vmax.f32 %v7432_v27, %v3298_v41  ;;  %5444 = vst [vmem:[%s7062_s14 + $0x88] sm:$0xff] %v5336_v43   ;;  %v4123_v39 = vmax.f32 %v7433_v24, %v3874_v5  ;;  %v4273_v1 = vadd.f32 %v7046_v53, %v4194_v17  ;;  %v7446_v24 = vld [vmem:[#allocation45_spill] sm:$0xff] }
 0x20f   : > { %v5331_v45 = vpack.c.bf16 %v4342_v52, %v4341_v63  ;;  %v5727_v25 = vpop.f32.mrf.mxu0  ;;  %v5871_v4 = vpop.f32.mrf.mxu1  ;;  %v4347_v48 = vmax.f32 %v4275_v26, 0.0  ;;  %v7444_v63 = vld [vmem:[#allocation43_spill] sm:$0xff]  ;;  %v7445_v52 = vld [vmem:[#allocation44_spill] sm:$0xff] }
 0x210   : > { %v4276_v15 = vadd.f32 %v7046_v53, %v4197_v44  ;;  %v4056_v46 = vmax.f32 %v7434_v12, %v5727_v25  ;;  %v4128_v30 = vmax.f32 %v7435_v47, %v5871_v4  ;;  %v4195_v51 = vmax.f32 %v4051_v0, %v4123_v39 }
 0x211   : > { %5443 = vst [vmem:[%s7062_s14 + $0x80] sm:$0xff] %v5331_v45   ;;  %v3311_v13 = vpop.f32.mrf.mxu0  ;;  %v3887_v31 = vpop.f32.mrf.mxu1  ;;  %v4345_v60 = vmax.f32 %v4273_v1, 0.0  ;;  %v7448_v1 = vld [vmem:[#allocation47_spill] sm:$0xff] }
 0x212   : > { %v4348_v40 = vmax.f32 %v4276_v15, 0.0  ;;  %v4054_v49 = vmax.f32 %v7436_v29, %v3311_v13  ;;  %v4126_v18 = vmax.f32 %v7437_v32, %v3887_v31  ;;  %v4274_v54 = vadd.f32 %v7046_v53, %v4195_v51  ;;  %v7447_v15 = vld [vmem:[#allocation46_spill] sm:$0xff]  ;;  %v7450_v32 = vld [vmem:[#allocation49_spill] sm:$0xff] }
 0x213   : > { %v4200_v55 = vmax.f32 %v4056_v46, %v4128_v30  ;;  %v5728_v33 = vpop.f32.mrf.mxu0  ;;  %v5872_v19 = vpop.f32.mrf.mxu1 }
 0x214   : > { %v5346_v6 = vpack.c.bf16 %v4348_v40, %v4347_v48  ;;  %v4198_v7 = vmax.f32 %v4054_v49, %v4126_v18  ;;  %v4057_v9 = vmax.f32 %v7438_v8, %v5728_v33  ;;  %v4346_v56 = vmax.f32 %v4274_v54, 0.0  ;;  %v7449_v48 = vld [vmem:[#allocation48_spill] sm:$0xff]  ;;  %v7451_v54 = vld [vmem:[#allocation50_spill] sm:$0xff] }
 0x215   : > { %v4129_v34 = vmax.f32 %v7439_v57, %v5872_v19  ;;  %v3314_v35 = vpop.f32.mrf.mxu0  ;;  %v3890_v61 = vpop.f32.mrf.mxu1  ;;  %v4279_v50 = vadd.f32 %v7046_v53, %v4200_v55  ;;  %v7453_v57 = vld [vmem:[#allocation52_spill] sm:$0xff] }
 0x216   : > { %5446 = vst [vmem:[%s7062_s14 + $0x98] sm:$0xff] %v5346_v6   ;;  %v4055_v20 = vmax.f32 %v7440_v14, %v3314_v35  ;;  %v4127_v58 = vmax.f32 %v7441_v21, %v3890_v61  ;;  %v5341_v59 = vpack.c.bf16 %v4346_v56, %v4345_v60  ;;  %v4277_v28 = vadd.f32 %v7046_v53, %v4198_v7  ;;  %v7452_v60 = vld [vmem:[#allocation51_spill] sm:$0xff] }
 0x217   : > { %v4201_v36 = vmax.f32 %v4057_v9, %v4129_v34  ;;  %v5731_v37 = vpop.f32.mrf.mxu0  ;;  %v5875_v38 = vpop.f32.mrf.mxu1  ;;  %v4351_v41 = vmax.f32 %v4279_v50, 0.0  ;;  %v7455_v50 = vld [vmem:[#allocation54_spill] sm:$0xff] }
 0x218   : > { %v4199_v2 = vmax.f32 %v4055_v20, %v4127_v58  ;;  %v4060_v3 = vmax.f32 %v7442_v62, %v5731_v37  ;;  %v4132_v11 = vmax.f32 %v7443_v10, %v5875_v38  ;;  %5445 = vst [vmem:[%s7062_s14 + $0x90] sm:$0xff] %v5341_v59   ;;  %v4349_v0 = vmax.f32 %v4277_v28, 0.0  ;;  %v7454_v58 = vld [vmem:[#allocation53_spill] sm:$0xff] }
 0x219   : > { %v4280_v22 = vadd.f32 %v7046_v53, %v4201_v36  ;;  %v3327_v16 = vpop.f32.mrf.mxu0  ;;  %v3903_v23 = vpop.f32.mrf.mxu1 }
 0x21a   : > { %v4278_v42 = vadd.f32 %v7046_v53, %v4199_v2  ;;  %v4058_v43 = vmax.f32 %v7444_v63, %v3327_v16  ;;  %v4130_v17 = vmax.f32 %v7445_v52, %v3903_v23  ;;  %v4204_v26 = vmax.f32 %v4060_v3, %v4132_v11 }
 0x21b   : > { %v4352_v5 = vmax.f32 %v4280_v22, 0.0  ;;  %v5732_v44 = vpop.f32.mrf.mxu0  ;;  %v5876_v27 = vpop.f32.mrf.mxu1  ;;  %v7456_v22 = vld [vmem:[#allocation55_spill] sm:$0xff] }
 0x21c   : > { %v4350_v45 = vmax.f32 %v4278_v42, 0.0  ;;  %v4061_v39 = vmax.f32 %v7446_v24, %v5732_v44  ;;  %v4202_v4 = vmax.f32 %v4058_v43, %v4130_v17  ;;  %v4133_v12 = vmax.f32 %v7447_v15, %v5876_v27  ;;  %v7457_v42 = vld [vmem:[#allocation56_spill] sm:$0xff] }
 0x21d   : > { %v5356_v25 = vpack.c.bf16 %v4352_v5, %v4351_v41  ;;  %v3330_v46 = vpop.f32.mrf.mxu0  ;;  %v3906_v47 = vpop.f32.mrf.mxu1  ;;  %v4283_v13 = vadd.f32 %v7046_v53, %v4204_v26  ;;  %v7458_v41 = vld [vmem:[#allocation57_spill] sm:$0xff]  ;;  %v7459_v26 = vld [vmem:[#allocation58_spill] sm:$0xff] }
 0x21e   : > { %v5351_v30 = vpack.c.bf16 %v4350_v45, %v4349_v0  ;;  %v4059_v51 = vmax.f32 %v7448_v1, %v3330_v46  ;;  %v4205_v31 = vmax.f32 %v4061_v39, %v4133_v12  ;;  %v4131_v40 = vmax.f32 %v7449_v48, %v3906_v47  ;;  %v7461_v12 = vld [vmem:[#allocation60_spill] sm:$0xff]  ;;  %v7462_v48 = vld [vmem:[#allocation61_spill] sm:$0xff] }
 0x21f   : > { %5448 = vst [vmem:[%s7062_s14 + $0xa8] sm:$0xff] %v5356_v25   ;;  %v5735_v29 = vpop.f32.mrf.mxu0  ;;  %v5879_v49 = vpop.f32.mrf.mxu1  ;;  %v4281_v33 = vadd.f32 %v7046_v53, %v4202_v4  ;;  %v4355_v35 = vmax.f32 %v4283_v13, 0.0  ;;  %v7460_v4 = vld [vmem:[#allocation59_spill] sm:$0xff] }
 0x220   : > { %5447 = vst [vmem:[%s7062_s14 + $0xa0] sm:$0xff] %v5351_v30   ;;  %v4064_v18 = vmax.f32 %v7450_v32, %v5735_v29  ;;  %v4136_v55 = vmax.f32 %v7451_v54, %v5879_v49  ;;  %v4284_v19 = vadd.f32 %v7046_v53, %v4205_v31  ;;  %v4203_v6 = vmax.f32 %v4059_v51, %v4131_v40  ;;  %v7463_v32 = vld [vmem:[#allocation62_spill] sm:$0xff] }
 0x221   : > { %v3343_v7 = vpop.f32.mrf.mxu0  ;;  %v3919_v8 = vpop.f32.mrf.mxu1  ;;  %v4353_v37 = vmax.f32 %v4281_v33, 0.0  ;;  %v7464_v33 = vld [vmem:[#allocation63_spill] sm:$0xff] }
 0x222   : > { %v4208_v9 = vmax.f32 %v4064_v18, %v4136_v55  ;;  %v4062_v56 = vmax.f32 %v7452_v60, %v3343_v7  ;;  %v4134_v34 = vmax.f32 %v7453_v57, %v3919_v8  ;;  %v4356_v61 = vmax.f32 %v4284_v19, 0.0 }
 0x223   : > { %v4282_v14 = vadd.f32 %v7046_v53, %v4203_v6  ;;  %v5736_v20 = vpop.f32.mrf.mxu0  ;;  %v5880_v21 = vpop.f32.mrf.mxu1  ;;  %v7465_v6 = vld [vmem:[#allocation64_spill] sm:$0xff] }
 0x224   : > { %v4065_v59 = vmax.f32 %v7454_v58, %v5736_v20  ;;  %v4137_v36 = vmax.f32 %v7455_v50, %v5880_v21  ;;  %v5366_v38 = vpack.c.bf16 %v4356_v61, %v4355_v35  ;;  %v4206_v2 = vmax.f32 %v4062_v56, %v4134_v34  ;;  %v7466_v61 = vld [vmem:[#allocation65_spill] sm:$0xff]  ;;  %v7467_v20 = vld [vmem:[#allocation66_spill] sm:$0xff] }
 0x225   : > { %v4354_v28 = vmax.f32 %v4282_v14, 0.0  ;;  %v3346_v62 = vpop.f32.mrf.mxu0  ;;  %v3922_v3 = vpop.f32.mrf.mxu1  ;;  %v4287_v10 = vadd.f32 %v7046_v53, %v4208_v9 }
 0x226   : > { %v4209_v11 = vmax.f32 %v4065_v59, %v4137_v36  ;;  %v4063_v16 = vmax.f32 %v7456_v22, %v3346_v62  ;;  %5450 = vst [vmem:[%s7062_s14 + $0xb8] sm:$0xff] %v5366_v38   ;;  %v4135_v63 = vmax.f32 %v7457_v42, %v3922_v3  ;;  %v4285_v27 = vadd.f32 %v7046_v53, %v4206_v2  ;;  %v7470_v42 = vld [vmem:[#allocation69_spill] sm:$0xff] }
 0x227   : > { %v5361_v23 = vpack.c.bf16 %v4354_v28, %v4353_v37  ;;  %v5739_v43 = vpop.f32.mrf.mxu0  ;;  %v5883_v52 = vpop.f32.mrf.mxu1  ;;  %v4359_v39 = vmax.f32 %v4287_v10, 0.0  ;;  %v7468_v37 = vld [vmem:[#allocation67_spill] sm:$0xff]  ;;  %v7469_v28 = vld [vmem:[#allocation68_spill] sm:$0xff] }
 0x228   : > { %v4288_v17 = vadd.f32 %v7046_v53, %v4209_v11  ;;  %v4068_v5 = vmax.f32 %v7458_v41, %v5739_v43  ;;  %v4140_v44 = vmax.f32 %v7459_v26, %v5883_v52  ;;  %v4207_v0 = vmax.f32 %v4063_v16, %v4135_v63 }
 0x229   : > { %5449 = vst [vmem:[%s7062_s14 + $0xb0] sm:$0xff] %v5361_v23   ;;  %v3359_v45 = vpop.f32.mrf.mxu0  ;;  %v3935_v24 = vpop.f32.mrf.mxu1  ;;  %v4357_v29 = vmax.f32 %v4285_v27, 0.0  ;;  %v7472_v27 = vld [vmem:[#allocation71_spill] sm:$0xff] }
 0x22a   : > { %v4360_v25 = vmax.f32 %v4288_v17, 0.0  ;;  %v4066_v15 = vmax.f32 %v7460_v4, %v3359_v45  ;;  %v4138_v46 = vmax.f32 %v7461_v12, %v3935_v24  ;;  %v4286_v47 = vadd.f32 %v7046_v53, %v4207_v0  ;;  %v7471_v17 = vld [vmem:[#allocation70_spill] sm:$0xff]  ;;  %v7474_v12 = vld [vmem:[#allocation73_spill] sm:$0xff] }
 0x22b   : > { %v4212_v30 = vmax.f32 %v4068_v5, %v4140_v44  ;;  %v5740_v1 = vpop.f32.mrf.mxu0  ;;  %v5884_v51 = vpop.f32.mrf.mxu1 }
 0x22c   : > { %v5376_v13 = vpack.c.bf16 %v4360_v25, %v4359_v39  ;;  %v4210_v31 = vmax.f32 %v4066_v15, %v4138_v46  ;;  %v4069_v40 = vmax.f32 %v7462_v48, %v5740_v1  ;;  %v4358_v49 = vmax.f32 %v4286_v47, 0.0  ;;  %v7473_v39 = vld [vmem:[#allocation72_spill] sm:$0xff]  ;;  %v7475_v47 = vld [vmem:[#allocation74_spill] sm:$0xff] }
 0x22d   : > { %v4141_v18 = vmax.f32 %v7463_v32, %v5884_v51  ;;  %v3362_v54 = vpop.f32.mrf.mxu0  ;;  %v3938_v55 = vpop.f32.mrf.mxu1  ;;  %v4291_v9 = vadd.f32 %v7046_v53, %v4212_v30  ;;  %v7477_v32 = vld [vmem:[#allocation76_spill] sm:$0xff] }
 0x22e   : > { %5452 = vst [vmem:[%s7062_s14 + $0xc8] sm:$0xff] %v5376_v13   ;;  %v4067_v19 = vmax.f32 %v7464_v33, %v3362_v54  ;;  %v4139_v7 = vmax.f32 %v7465_v6, %v3938_v55  ;;  %v5371_v8 = vpack.c.bf16 %v4358_v49, %v4357_v29  ;;  %v4289_v34 = vadd.f32 %v7046_v53, %v4210_v31  ;;  %v7476_v29 = vld [vmem:[#allocation75_spill] sm:$0xff] }
 0x22f   : > { %v4213_v60 = vmax.f32 %v4069_v40, %v4141_v18  ;;  %v5743_v56 = vpop.f32.mrf.mxu0  ;;  %v5887_v57 = vpop.f32.mrf.mxu1  ;;  %v4363_v62 = vmax.f32 %v4291_v9, 0.0  ;;  %v7479_v9 = vld [vmem:[#allocation78_spill] sm:$0xff] }
 0x230   : > { %v4211_v35 = vmax.f32 %v4067_v19, %v4139_v7  ;;  %v4072_v14 = vmax.f32 %v7466_v61, %v5743_v56  ;;  %v4144_v21 = vmax.f32 %v7467_v20, %v5887_v57  ;;  %5451 = vst [vmem:[%s7062_s14 + $0xc0] sm:$0xff] %v5371_v8   ;;  %v4361_v16 = vmax.f32 %v4289_v34, 0.0  ;;  %v7478_v7 = vld [vmem:[#allocation77_spill] sm:$0xff] }
 0x231   : > { %v4292_v58 = vadd.f32 %v7046_v53, %v4213_v60  ;;  %v3375_v59 = vpop.f32.mrf.mxu0  ;;  %v3951_v50 = vpop.f32.mrf.mxu1 }
 0x232   : > { %v4290_v36 = vadd.f32 %v7046_v53, %v4211_v35  ;;  %v4070_v38 = vmax.f32 %v7468_v37, %v3375_v59  ;;  %v4142_v2 = vmax.f32 %v7469_v28, %v3951_v50  ;;  %v4216_v10 = vmax.f32 %v4072_v14, %v4144_v21 }
 0x233   : > { %v4364_v3 = vmax.f32 %v4292_v58, 0.0  ;;  %v5744_v11 = vpop.f32.mrf.mxu0  ;;  %v5888_v22 = vpop.f32.mrf.mxu1  ;;  %v7480_v58 = vld [vmem:[#allocation79_spill] sm:$0xff] }
 0x234   : > { %v4362_v23 = vmax.f32 %v4290_v36, 0.0  ;;  %v4073_v63 = vmax.f32 %v7470_v42, %v5744_v11  ;;  %v4214_v52 = vmax.f32 %v4070_v38, %v4142_v2  ;;  %v4145_v41 = vmax.f32 %v7471_v17, %v5888_v22  ;;  %v7481_v36 = vld [vmem:[#allocation80_spill] sm:$0xff] }
 0x235   : > { %v5386_v43 = vpack.c.bf16 %v4364_v3, %v4363_v62  ;;  %v3378_v5 = vpop.f32.mrf.mxu0  ;;  %v3954_v26 = vpop.f32.mrf.mxu1  ;;  %v4295_v45 = vadd.f32 %v7046_v53, %v4216_v10  ;;  %v7482_v62 = vld [vmem:[#allocation81_spill] sm:$0xff]  ;;  %v7483_v10 = vld [vmem:[#allocation82_spill] sm:$0xff] }
 0x236   : > { %v5381_v44 = vpack.c.bf16 %v4362_v23, %v4361_v16  ;;  %v4071_v0 = vmax.f32 %v7472_v27, %v3378_v5  ;;  %v4217_v24 = vmax.f32 %v4073_v63, %v4145_v41  ;;  %v4143_v25 = vmax.f32 %v7473_v39, %v3954_v26  ;;  %v7485_v41 = vld [vmem:[#allocation84_spill] sm:$0xff]  ;;  %v7486_v39 = vld [vmem:[#allocation85_spill] sm:$0xff] }
 0x237   : > { %5454 = vst [vmem:[%s7062_s14 + $0xd8] sm:$0xff] %v5386_v43   ;;  %v5747_v4 = vpop.f32.mrf.mxu0  ;;  %v5891_v15 = vpop.f32.mrf.mxu1  ;;  %v4293_v1 = vadd.f32 %v7046_v53, %v4214_v52  ;;  %v4367_v54 = vmax.f32 %v4295_v45, 0.0  ;;  %v7484_v52 = vld [vmem:[#allocation83_spill] sm:$0xff] }
 0x238   : > { %5453 = vst [vmem:[%s7062_s14 + $0xd0] sm:$0xff] %v5381_v44   ;;  %v4076_v46 = vmax.f32 %v7474_v12, %v5747_v4  ;;  %v4148_v30 = vmax.f32 %v7475_v47, %v5891_v15  ;;  %v4296_v51 = vadd.f32 %v7046_v53, %v4217_v24  ;;  %v4215_v13 = vmax.f32 %v4071_v0, %v4143_v25  ;;  %v7487_v12 = vld [vmem:[#allocation86_spill] sm:$0xff] }
 0x239   : > { %v3391_v31 = vpop.f32.mrf.mxu0  ;;  %v3967_v48 = vpop.f32.mrf.mxu1  ;;  %v4365_v56 = vmax.f32 %v4293_v1, 0.0  ;;  %v7488_v1 = vld [vmem:[#allocation87_spill] sm:$0xff] }
 0x23a   : > { %v4220_v40 = vmax.f32 %v4076_v46, %v4148_v30  ;;  %v4074_v49 = vmax.f32 %v7476_v29, %v3391_v31  ;;  %v4146_v18 = vmax.f32 %v7477_v32, %v3967_v48  ;;  %v4368_v55 = vmax.f32 %v4296_v51, 0.0  ;;  %v6078_v48 = vld [vmem:[%s7308_s2] ss:$0 sm:$0xff] }
 0x23b   : > { %v4294_v33 = vadd.f32 %v7046_v53, %v4215_v13  ;;  %v5748_v19 = vpop.f32.mrf.mxu0  ;;  %v5892_v6 = vpop.f32.mrf.mxu1  ;;  %v7489_v13 = vld [vmem:[#allocation88_spill] sm:$0xff] }
 0x23c   : > { %v4077_v8 = vmax.f32 %v7478_v7, %v5748_v19  ;;  %v4149_v60 = vmax.f32 %v7479_v9, %v5892_v6  ;;  %v5396_v57 = vpack.c.bf16 %v4368_v55, %v4367_v54  ;;  %v4218_v35 = vmax.f32 %v4074_v49, %v4146_v18  ;;  %v7490_v55 = vld [vmem:[#allocation89_spill] sm:$0xff]  ;;  %v7491_v19 = vld [vmem:[#allocation90_spill] sm:$0xff] }
 0x23d   : > { %v4366_v34 = vmax.f32 %v4294_v33, 0.0  ;;  %v3394_v61 = vpop.f32.mrf.mxu0  ;;  %v3970_v14 = vpop.f32.mrf.mxu1  ;;  %v4299_v20 = vadd.f32 %v7046_v53, %v4220_v40 }
 0x23e   : > { %v4221_v21 = vmax.f32 %v4077_v8, %v4149_v60  ;;  %v4075_v59 = vmax.f32 %v7480_v58, %v3394_v61  ;;  %5456 = vst [vmem:[%s7062_s14 + $0xe8] sm:$0xff] %v5396_v57   ;;  %v4147_v37 = vmax.f32 %v7481_v36, %v3970_v14  ;;  %v4297_v22 = vadd.f32 %v7046_v53, %v4218_v35  ;;  %v7494_v36 = vld [vmem:[#allocation93_spill] sm:$0xff] }
 0x23f   : > { %v5391_v50 = vpack.c.bf16 %v4366_v34, %v4365_v56  ;;  %v5751_v38 = vpop.f32.mrf.mxu0  ;;  %v5895_v28 = vpop.f32.mrf.mxu1  ;;  %v4371_v63 = vmax.f32 %v4299_v20, 0.0  ;;  %v7492_v56 = vld [vmem:[#allocation91_spill] sm:$0xff]  ;;  %v7493_v34 = vld [vmem:[#allocation92_spill] sm:$0xff] }
 0x240   : > { %v4300_v2 = vadd.f32 %v7046_v53, %v4221_v21  ;;  %v4080_v3 = vmax.f32 %v7482_v62, %v5751_v38  ;;  %v4152_v11 = vmax.f32 %v7483_v10, %v5895_v28  ;;  %v4219_v16 = vmax.f32 %v4075_v59, %v4147_v37 }
 0x241   : > { %5455 = vst [vmem:[%s7062_s14 + $0xe0] sm:$0xff] %v5391_v50   ;;  %v3407_v23 = vpop.f32.mrf.mxu0  ;;  %v3983_v42 = vpop.f32.mrf.mxu1  ;;  %v4369_v4 = vmax.f32 %v4297_v22, 0.0  ;;  %v7496_v22 = vld [vmem:[#allocation95_spill] sm:$0xff] }
 0x242   : > { %v4372_v43 = vmax.f32 %v4300_v2, 0.0  ;;  %v4078_v17 = vmax.f32 %v7484_v52, %v3407_v23  ;;  %v4150_v5 = vmax.f32 %v7485_v41, %v3983_v42  ;;  %v4298_v26 = vadd.f32 %v7046_v53, %v4219_v16  ;;  %v7495_v2 = vld [vmem:[#allocation94_spill] sm:$0xff] }
 0x243   : > { %v4224_v44 = vmax.f32 %v4080_v3, %v4152_v11  ;;  %v5752_v27 = vpop.f32.mrf.mxu0  ;;  %v5896_v0 = vpop.f32.mrf.mxu1 }
 0x244   : > { %v5406_v45 = vpack.c.bf16 %v4372_v43, %v4371_v63  ;;  %v4222_v24 = vmax.f32 %v4078_v17, %v4150_v5  ;;  %v4081_v25 = vmax.f32 %v7486_v39, %v5752_v27  ;;  %v4370_v15 = vmax.f32 %v4298_v26, 0.0  ;;  %v7497_v63 = vld [vmem:[#allocation96_spill] sm:$0xff] }
 0x245   : > { %v4153_v46 = vmax.f32 %v7487_v12, %v5896_v0  ;;  %v3410_v47 = vpop.f32.mrf.mxu0  ;;  %v3986_v30 = vpop.f32.mrf.mxu1  ;;  %v4303_v40 = vadd.f32 %v6078_v48, %v4224_v44 }
 0x246   : > { %5458 = vst [vmem:[%s7062_s14 + $0xf8] sm:$0xff] %v5406_v45   ;;  %v4079_v51 = vmax.f32 %v7488_v1, %v3410_v47  ;;  %v4151_v31 = vmax.f32 %v7489_v13, %v3986_v30  ;;  %v5401_v53 = vpack.c.bf16 %v4370_v15, %v4369_v4  ;;  %v4301_v18 = vadd.f32 %v6078_v48, %v4222_v24 }
 0x247   : > { %v4225_v29 = vmax.f32 %v4081_v25, %v4153_v46  ;;  %v5755_v49 = vpop.f32.mrf.mxu0  ;;  %v5899_v32 = vpop.f32.mrf.mxu1  ;;  %v4375_v61 = vmax.f32 %v4303_v40, 0.0 }
 0x248   : > { %v4223_v54 = vmax.f32 %v4079_v51, %v4151_v31  ;;  %v4084_v33 = vmax.f32 %v7490_v55, %v5755_v49  ;;  %v4156_v6 = vmax.f32 %v7491_v19, %v5899_v32  ;;  %5457 = vst [vmem:[%s7062_s14 + $0xf0] sm:$0xff] %v5401_v53   ;;  %v4373_v59 = vmax.f32 %v4301_v18, 0.0 }
 0x249   : > { %v4304_v7 = vadd.f32 %v6078_v48, %v4225_v29  ;;  %v3423_v8 = vpop.f32.mrf.mxu0  ;;  %v3999_v9 = vpop.f32.mrf.mxu1 }
 0x24a   : > { %v4302_v60 = vadd.f32 %v6078_v48, %v4223_v54  ;;  %v4082_v57 = vmax.f32 %v7492_v56, %v3423_v8  ;;  %v4154_v35 = vmax.f32 %v7493_v34, %v3999_v9  ;;  %v4228_v20 = vmax.f32 %v4084_v33, %v4156_v6 }
 0x24b   : > { %v4376_v14 = vmax.f32 %v4304_v7, 0.0  ;;  %v5756_v21 = vpop.f32.mrf.mxu0  ;;  %v5900_v58 = vpop.f32.mrf.mxu1 }
 0x24c   : > { %v4374_v50 = vmax.f32 %v4302_v60, 0.0  ;;  %v4085_v37 = vmax.f32 %v7494_v36, %v5756_v21  ;;  %v4226_v28 = vmax.f32 %v4082_v57, %v4154_v35  ;;  %v4157_v62 = vmax.f32 %v7495_v2, %v5900_v58 }
 0x24d   : > { %v5416_v38 = vpack.c.bf16 %v4376_v14, %v4375_v61  ;;  %v3426_v3 = vpop.f32.mrf.mxu0  ;;  %v4002_v10 = vpop.f32.mrf.mxu1  ;;  %v4307_v23 = vadd.f32 %v6078_v48, %v4228_v20 }
 0x24e   : > { %v5411_v11 = vpack.c.bf16 %v4374_v50, %v4373_v59  ;;  %v4083_v16 = vmax.f32 %v7496_v22, %v3426_v3  ;;  %v4229_v42 = vmax.f32 %v4085_v37, %v4157_v62  ;;  %v4155_v43 = vmax.f32 %v7497_v63, %v4002_v10 }
 0x24f   : > { %5460 = vst [vmem:[%s7062_s14 + $0x108] sm:$0xff] %v5416_v38   ;;  %v4305_v52 = vadd.f32 %v6078_v48, %v4226_v28  ;;  %v4379_v5 = vmax.f32 %v4307_v23, 0.0 }
 0x250   : > { %5459 = vst [vmem:[%s7062_s14 + $0x100] sm:$0xff] %v5411_v11   ;;  %v4308_v17 = vadd.f32 %v6078_v48, %v4229_v42  ;;  %v4227_v41 = vmax.f32 %v4083_v16, %v4155_v43 }
 0x251   : > { %v4377_v27 = vmax.f32 %v4305_v52, 0.0 }
 0x252   : > { %v4380_v26 = vmax.f32 %v4308_v17, 0.0  ;;  %v4306_v44 = vadd.f32 %v6078_v48, %v4227_v41 }
 0x254   : > { %v5426_v0 = vpack.c.bf16 %v4380_v26, %v4379_v5  ;;  %v4378_v45 = vmax.f32 %v4306_v44, 0.0 }
 0x256   : > { %5462 = vst [vmem:[%s7062_s14 + $0x118] sm:$0xff] %v5426_v0   ;;  %v5421_v24 = vpack.c.bf16 %v4378_v45, %v4377_v27 }
 0x258   : > { %5461 = vst [vmem:[%s7062_s14 + $0x110] sm:$0xff] %v5421_v24  }
 0x259 PF: > { %p10_p9 = scmp.ge.s32.totalorder %s6141_s16, 4   ;;  %s7498_s12 = smov %s6097_s13 }
 0x25a   : > { %s7499_s13 = smov %s6150_s19  ;;  %s7500_s14 = smov %s6141_s16 }
 0x25b   :  { %12 = sbr.rel (!%p10_p9) target bundleno = 2 (0x2), region = 108 }

// kernel: net_binary_forward.3
= control target key start
LH: loop header
LB: loop body
LE: loop exit
PB: predicated region body
PF: predicated region fallthrough
CT: control target
= control target key end

     0   :  { %v3934_v0 = vmov 0   ;;  %vm508_vm0 = vcmask 998400   ;;  %vm605_vm1 = vcmask 1044480   ;;  %vm3936_vm2 = vmmov 0   ;;  %s5047_s1 = inlined_call_operand.vmem [shape: bf16[250,128], index: 1, kind: input, shape index: {}]   ;;  %s5048_s0 = inlined_call_operand.vmem [shape: bf16[4,128,250], index: 0, kind: input, shape index: {}]   ;;  %s5049_s3 = inlined_call_operand.vmem [shape: bf16[16,128,128], index: 3, kind: input, shape index: {}]   ;;  %s5050_s2 = inlined_call_operand.vmem [shape: f32[1,128], index: 2, kind: input, shape index: {}]   ;;  %s5051_s6 = inlined_call_operand.<no memory space> [shape: f32[1,1], index: 6, kind: input, shape index: {}]   ;;  %s5052_s4 = inlined_call_operand.vmem [shape: f32[1,128], index: 4, kind: input, shape index: {}]   ;;  %s5053_s5 = inlined_call_operand.vmem [shape: f32[1,128], index: 5, kind: input, shape index: {}]   ;;  %s5054_s7 = inlined_call_operand.vmem [shape: f32[8,1], index: 7, kind: output, shape index: {}]  }
   0x1   :  { %609 = vmatprep.subr.bf16.mxu0 %v3934_v0  ;;  %v3694_v1 = vld [vmem:[%s5047_s1 + $0x38] sm:$0xff]   ;;  %v3695_v2 = vld [vmem:[%s5047_s1 + $0x30] sm:$0xff]   ;;  %v3696_v3 = vld [vmem:[%s5047_s1 + $0x28] sm:$0xff]   ;;  %vm2737_vm3 = vcmask 7168  }
   0x2   :  { %610 = vmatpush1.bf16.msra.mxu0 %v3694_v1  ;;  %v3697_v4 = vld [vmem:[%s5047_s1 + $0x20] sm:$0xff]   ;;  %v3698_v5 = vld [vmem:[%s5047_s1 + $0x18] sm:$0xff]   ;;  %v3699_v7 = vld [vmem:[%s5047_s1 + $0x10] sm:$0xff]  }
   0x3   :  { %611 = vmatprep.subr.bf16.mxu0 %v3934_v0  ;;  %v3712_v6 = vld [vmem:[%s5048_s0 + $0x4] ss:$8 sps:$4 sm:$0xff]   ;;  %v3702_v10 = vld [vmem:[%s5047_s1 + $0x78] sm:$0x1f]   ;;  %v3703_v12 = vld [vmem:[%s5047_s1 + $0x70] sm:$0xff]  }
   0x4   :  { %2823 = vmatprep.mubr.msk.bf16.mxu0 %vm508_vm0, %v3712_v6  ;;  %v3700_v8 = vld [vmem:[%s5047_s1 + $0x8] sm:$0xff]   ;;  %v3701_v9 = vld [vmem:[%s5047_s1] sm:$0xff]   ;;  %v607_v11 = vsel %vm605_vm1, %v3702_v10, 0  ;;  %v3706_v15 = vld [vmem:[%s5047_s1 + $0x58] sm:$0xff]  }
   0x5   :  { %v3704_v13 = vld [vmem:[%s5047_s1 + $0x68] sm:$0xff]   ;;  %v3705_v14 = vld [vmem:[%s5047_s1 + $0x60] sm:$0xff]   ;;  %v3707_v16 = vld [vmem:[%s5047_s1 + $0x50] sm:$0xff]  }
   0x6   :  { %612 = vmatpush1.bf16.msra.mxu0 %v3695_v2  ;;  %v3708_v17 = vld [vmem:[%s5047_s1 + $0x48] sm:$0xff]   ;;  %v3709_v18 = vld [vmem:[%s5047_s1 + $0x40] sm:$0xff]   ;;  %v3713_v20 = vld [vmem:[%s5048_s0 + $0x14] ss:$8 sps:$4 sm:$0xff]  }
   0x7   :  { %613 = vmatprep.subr.bf16.mxu0 %v3934_v0  ;;  %v3710_v19 = vld [vmem:[%s5048_s0] ss:$8 sps:$4 sm:$0xff]   ;;  %v3715_v21 = vld [vmem:[%s5048_s0 + $0x10] ss:$8 sps:$4 sm:$0xff]   ;;  %v3716_v22 = vld [vmem:[%s5048_s0 + $0x24] ss:$8 sps:$4 sm:$0xff]  }
   0x8   :  { %v3718_v23 = vld [vmem:[%s5048_s0 + $0x20] ss:$8 sps:$4 sm:$0xff]   ;;  %v3719_v24 = vld [vmem:[%s5048_s0 + $0x34] ss:$8 sps:$4 sm:$0xff]   ;;  %v3721_v25 = vld [vmem:[%s5048_s0 + $0x30] ss:$8 sps:$4 sm:$0xff]  }
   0x9   :  { %v3722_v26 = vld [vmem:[%s5048_s0 + $0x44] ss:$8 sps:$4 sm:$0xff]   ;;  %v3724_v27 = vld [vmem:[%s5048_s0 + $0x40] ss:$8 sps:$4 sm:$0xff]   ;;  %v3725_v28 = vld [vmem:[%s5048_s0 + $0x54] ss:$8 sps:$4 sm:$0xff]  }
   0xa   :  { %614 = vmatpush1.bf16.msra.mxu0 %v3696_v3  ;;  %v3727_v29 = vld [vmem:[%s5048_s0 + $0x50] ss:$8 sps:$4 sm:$0xff]   ;;  %v3728_v30 = vld [vmem:[%s5048_s0 + $0x64] ss:$8 sps:$4 sm:$0xff]   ;;  %v3730_v31 = vld [vmem:[%s5048_s0 + $0x60] ss:$8 sps:$4 sm:$0xff]  }
   0xb   :  { %615 = vmatprep.subr.bf16.mxu0 %v3934_v0  ;;  %v3731_v32 = vld [vmem:[%s5048_s0 + $0x74] ss:$8 sps:$4 sm:$0xff]   ;;  %v3733_v33 = vld [vmem:[%s5048_s0 + $0x70] ss:$8 sps:$4 sm:$0xff]   ;;  %v3734_v34 = vld [vmem:[%s5048_s0 + $0x84] ss:$8 sps:$4 sm:$0xff]  }
   0xc   :  { %v3736_v35 = vld [vmem:[%s5048_s0 + $0x80] ss:$8 sps:$4 sm:$0xff]   ;;  %v3737_v36 = vld [vmem:[%s5048_s0 + $0x94] ss:$8 sps:$4 sm:$0xff]   ;;  %v3739_v37 = vld [vmem:[%s5048_s0 + $0x90] ss:$8 sps:$4 sm:$0xff]  }
   0xd   :  { %v3740_v38 = vld [vmem:[%s5048_s0 + $0xa4] ss:$8 sps:$4 sm:$0xff]   ;;  %v3742_v39 = vld [vmem:[%s5048_s0 + $0xa0] ss:$8 sps:$4 sm:$0xff]   ;;  %v3743_v40 = vld [vmem:[%s5048_s0 + $0xb4] ss:$8 sps:$4 sm:$0xff]  }
   0xe   :  { %616 = vmatpush1.bf16.msra.mxu0 %v3697_v4  ;;  %v3745_v41 = vld [vmem:[%s5048_s0 + $0xb0] ss:$8 sps:$4 sm:$0xff]   ;;  %v3746_v42 = vld [vmem:[%s5048_s0 + $0xc4] ss:$8 sps:$4 sm:$0xff]   ;;  %v3748_v43 = vld [vmem:[%s5048_s0 + $0xc0] ss:$8 sps:$4 sm:$0xff]  }
   0xf   :  { %617 = vmatprep.subr.bf16.mxu0 %v3934_v0  ;;  %v3749_v44 = vld [vmem:[%s5048_s0 + $0xd4] ss:$8 sps:$4 sm:$0xff]   ;;  %v3751_v45 = vld [vmem:[%s5048_s0 + $0xd0] ss:$8 sps:$4 sm:$0xff]   ;;  %v3752_v46 = vld [vmem:[%s5048_s0 + $0xe4] ss:$8 sps:$4 sm:$0xff]  }
  0x10   :  { %v3754_v47 = vld [vmem:[%s5048_s0 + $0xe0] ss:$8 sps:$4 sm:$0xff]   ;;  %v3755_v48 = vld [vmem:[%s5048_s0 + $0xf4] ss:$8 sps:$4 sm:$0xff]   ;;  %v3757_v49 = vld [vmem:[%s5048_s0 + $0xf0] ss:$8 sps:$4 sm:$0xff]  }
  0x11   :  { %v3758_v50 = vld [vmem:[%s5048_s0 + $0x104] ss:$8 sps:$4 sm:$0xff]   ;;  %v3760_v51 = vld [vmem:[%s5048_s0 + $0x100] ss:$8 sps:$4 sm:$0xff]   ;;  %v3761_v52 = vld [vmem:[%s5048_s0 + $0x114] ss:$8 sps:$4 sm:$0xff]  }
  0x12   :  { %618 = vmatpush1.bf16.msra.mxu0 %v3698_v5  ;;  %v3763_v53 = vld [vmem:[%s5048_s0 + $0x110] ss:$8 sps:$4 sm:$0xff]   ;;  %v3764_v54 = vld [vmem:[%s5048_s0 + $0x124] ss:$8 sps:$4 sm:$0xff]   ;;  %v3766_v55 = vld [vmem:[%s5048_s0 + $0x120] ss:$8 sps:$4 sm:$0xff]  }
  0x13   :  { %619 = vmatprep.subr.bf16.mxu0 %v3934_v0  ;;  %v3767_v56 = vld [vmem:[%s5048_s0 + $0x134] ss:$8 sps:$4 sm:$0xff]   ;;  %v3769_v57 = vld [vmem:[%s5048_s0 + $0x130] ss:$8 sps:$4 sm:$0xff]   ;;  %v3770_v58 = vld [vmem:[%s5048_s0 + $0x144] ss:$8 sps:$4 sm:$0xff]  }
  0x14   :  { %v3772_v59 = vld [vmem:[%s5048_s0 + $0x140] ss:$8 sps:$4 sm:$0xff]   ;;  %v3773_v60 = vld [vmem:[%s5048_s0 + $0x154] ss:$8 sps:$4 sm:$0xff]   ;;  %v3775_v61 = vld [vmem:[%s5048_s0 + $0x150] ss:$8 sps:$4 sm:$0xff]  }
  0x15   :  { %v3776_v62 = vld [vmem:[%s5048_s0 + $0x164] ss:$8 sps:$4 sm:$0xff]   ;;  %v3778_v63 = vld [vmem:[%s5048_s0 + $0x160] ss:$8 sps:$4 sm:$0xff]   ;;  %v3781_v1 = vld [vmem:[%s5048_s0 + $0x170] ss:$8 sps:$4 sm:$0xff]  }
  0x16   :  { %620 = vmatpush1.bf16.msra.mxu0 %v3699_v7  ;;  %v3782_v2 = vld [vmem:[%s5048_s0 + $0x184] ss:$8 sps:$4 sm:$0xff]   ;;  %v3784_v3 = vld [vmem:[%s5048_s0 + $0x180] ss:$8 sps:$4 sm:$0xff]   ;;  %v3785_v4 = vld [vmem:[%s5048_s0 + $0x194] ss:$8 sps:$4 sm:$0xff]  }
  0x17   :  { %621 = vmatprep.subr.bf16.mxu0 %v3934_v0 }
  0x1a   :  { %622 = vmatpush1.bf16.msra.mxu0 %v3700_v8  ;;  %v3787_v8 = vld [vmem:[%s5048_s0 + $0x190] ss:$8 sps:$4 sm:$0xff]  }
  0x1b   :  { %623 = vmatprep.subr.bf16.mxu0 %v3934_v0 }
  0x1e   :  { %624 = vmatpush1.bf16.msra.mxu0 %v3701_v9  ;;  %v3788_v9 = vld [vmem:[%s5048_s0 + $0x1a4] ss:$8 sps:$4 sm:$0xff]  }
  0x1f   :  { %625 = vmatprep.subr.bf16.mxu0 %v3934_v0 }
  0x22   :  { %626 = vmatpush2.bf16.msra.mxu0 %v607_v11 }
  0x23   :  { %627 = vmatprep.subr.bf16.mxu0 %v3934_v0 }
  0x26   :  { %628 = vmatpush2.bf16.msra.mxu0 %v3703_v12 }
  0x27   :  { %629 = vmatprep.subr.bf16.mxu0 %v3934_v0 }
  0x2a   :  { %630 = vmatpush2.bf16.msra.mxu0 %v3704_v13 }
  0x2b   :  { %631 = vmatprep.subr.bf16.mxu0 %v3934_v0 }
  0x2e   :  { %632 = vmatpush2.bf16.msra.mxu0 %v3705_v14  ;;  %v3790_v14 = vld [vmem:[%s5048_s0 + $0x1a0] ss:$8 sps:$4 sm:$0xff]  }
  0x2f   :  { %633 = vmatprep.subr.bf16.mxu0 %v3934_v0 }
  0x32   :  { %634 = vmatpush2.bf16.msra.mxu0 %v3706_v15  ;;  %v3791_v15 = vld [vmem:[%s5048_s0 + $0x1b4] ss:$8 sps:$4 sm:$0xff]  }
  0x33   :  { %635 = vmatprep.subr.bf16.mxu0 %v3934_v0 }
  0x36   :  { %636 = vmatpush2.bf16.msra.mxu0 %v3707_v16 }
  0x37   :  { %637 = vmatprep.subr.bf16.mxu0 %v3934_v0 }
  0x3a   :  { %638 = vmatpush2.bf16.msra.mxu0 %v3708_v17 }
  0x3b   :  { %639 = vmatprep.subr.bf16.mxu0 %v3934_v0  ;;  %v3779_v0 = vld [vmem:[%s5048_s0 + $0x174] ss:$8 sps:$4 sm:$0xff]  }
  0x3e   :  { %640 = vmatpush2.bf16.msra.mxu0 %v3709_v18 }
  0x41   :  { %642 = vmatmul.mubr.bf16.vlgmr.msra.gmra.mxu0 %v3710_v19 }
  0x42   :  { %2824 = vmatprep.mubr.msk.bf16.mxu0 %vm508_vm0, %v3713_v20  ;;  %v3793_v20 = vld [vmem:[%s5048_s0 + $0x1b0] ss:$8 sps:$4 sm:$0xff]  }
  0x49   :  { %650 = vmatmul.mubr.bf16.gmra.mxu0 %v3715_v21  ;;  %v3794_v21 = vld [vmem:[%s5048_s0 + $0x1c4] ss:$8 sps:$4 sm:$0xff]  }
  0x4a   :  { %2825 = vmatprep.mubr.msk.bf16.mxu0 %vm508_vm0, %v3716_v22 }
  0x51   :  { %658 = vmatmul.mubr.bf16.gmra.mxu0 %v3718_v23 }
  0x52   :  { %2826 = vmatprep.mubr.msk.bf16.mxu0 %vm508_vm0, %v3719_v24 }
  0x59   :  { %666 = vmatmul.mubr.bf16.gmra.mxu0 %v3721_v25 }
  0x5a   :  { %2827 = vmatprep.mubr.msk.bf16.mxu0 %vm508_vm0, %v3722_v26  ;;  %v3796_v26 = vld [vmem:[%s5048_s0 + $0x1c0] ss:$8 sps:$4 sm:$0xff]  }
  0x61   :  { %674 = vmatmul.mubr.bf16.gmra.mxu0 %v3724_v27  ;;  %v3797_v27 = vld [vmem:[%s5048_s0 + $0x1d4] ss:$8 sps:$4 sm:$0xff]  }
  0x62   :  { %2828 = vmatprep.mubr.msk.bf16.mxu0 %vm508_vm0, %v3725_v28 }
  0x69   :  { %682 = vmatmul.mubr.bf16.gmra.mxu0 %v3727_v29 }
  0x6a   :  { %2829 = vmatprep.mubr.msk.bf16.mxu0 %vm508_vm0, %v3728_v30 }
  0x71   :  { %690 = vmatmul.mubr.bf16.gmra.mxu0 %v3730_v31 }
  0x72   :  { %2830 = vmatprep.mubr.msk.bf16.mxu0 %vm508_vm0, %v3731_v32  ;;  %v3799_v32 = vld [vmem:[%s5048_s0 + $0x1d0] ss:$8 sps:$4 sm:$0xff]  }
  0x79   :  { %698 = vmatmul.mubr.bf16.gmra.mxu0 %v3733_v33  ;;  %v3800_v33 = vld [vmem:[%s5048_s0 + $0x1e4] ss:$8 sps:$4 sm:$0xff]  }
  0x7a   :  { %2831 = vmatprep.mubr.msk.bf16.mxu0 %vm508_vm0, %v3734_v34 }
  0x81   :  { %706 = vmatmul.mubr.bf16.gmra.mxu0 %v3736_v35 }
  0x82   :  { %2832 = vmatprep.mubr.msk.bf16.mxu0 %vm508_vm0, %v3737_v36 }
  0x89   :  { %714 = vmatmul.mubr.bf16.gmra.mxu0 %v3739_v37 }
  0x8a   :  { %2833 = vmatprep.mubr.msk.bf16.mxu0 %vm508_vm0, %v3740_v38  ;;  %v3802_v38 = vld [vmem:[%s5048_s0 + $0x1e0] ss:$8 sps:$4 sm:$0xff]  }
  0x91   :  { %722 = vmatmul.mubr.bf16.gmra.mxu0 %v3742_v39  ;;  %v3803_v39 = vld [vmem:[%s5048_s0 + $0x1f4] ss:$8 sps:$4 sm:$0xff]  }
  0x92   :  { %2834 = vmatprep.mubr.msk.bf16.mxu0 %vm508_vm0, %v3743_v40 }
  0x99   :  { %730 = vmatmul.mubr.bf16.gmra.mxu0 %v3745_v41  ;;  %v3806_v41 = vld [vmem:[%s5049_s3 + $0x78] sm:$0xff]  }
  0x9a   :  { %2835 = vmatprep.mubr.msk.bf16.mxu0 %vm508_vm0, %v3746_v42 }
  0xa1   :  { %738 = vmatmul.mubr.bf16.gmra.mxu0 %v3748_v43  ;;  %v3935_v43 = vmov 0.0  }
  0xa2   :  { %2836 = vmatprep.mubr.msk.bf16.mxu0 %vm508_vm0, %v3749_v44  ;;  %3371 = vmatprep.subr.bf16.mxu1 %v3935_v43 }
  0xa3   :  { %3372 = vmatpush3.bf16.msra.mxu1 %v3806_v41  ;;  %3551 = vmatprep.subr.bf16.mxu0 %v3935_v43 }
  0xa4   :  { %3373 = vmatprep.subr.bf16.mxu1 %v3935_v43  ;;  %3387 = vmatprep.mubr.msk.bf16.mxu1 %vm3936_vm2, %v3935_v43 }
  0xa9   :  { %746 = vmatmul.mubr.bf16.gmra.mxu0 %v3751_v45  ;;  %v3805_v45 = vld [vmem:[%s5048_s0 + $0x1f0] ss:$8 sps:$4 sm:$0xff]  }
  0xaa   :  { %2837 = vmatprep.mubr.msk.bf16.mxu0 %vm508_vm0, %v3752_v46  ;;  %v3807_v46 = vld [vmem:[%s5049_s3 + $0x70] sm:$0xff]  }
  0xab   :  { %3374 = vmatpush3.bf16.msra.mxu1 %v3807_v46  ;;  %v3827_v46 = vld [vmem:[%s5049_s3 + $0x248] sm:$0xff]  }
  0xac   :  { %3375 = vmatprep.subr.bf16.mxu1 %v3935_v43 }
  0xb1   :  { %754 = vmatmul.mubr.bf16.gmra.mxu0 %v3754_v47 }
  0xb2   :  { %2838 = vmatprep.mubr.msk.bf16.mxu0 %vm508_vm0, %v3755_v48 }
  0xb9   :  { %762 = vmatmul.mubr.bf16.gmra.mxu0 %v3757_v49  ;;  %v3808_v49 = vld [vmem:[%s5049_s3 + $0x68] sm:$0xff]  }
  0xba   :  { %2839 = vmatprep.mubr.msk.bf16.mxu0 %vm508_vm0, %v3758_v50  ;;  %3376 = vmatpush3.bf16.msra.mxu1 %v3808_v49 }
  0xbb   :  { %3377 = vmatprep.subr.bf16.mxu1 %v3935_v43 }
  0xc1   :  { %770 = vmatmul.mubr.bf16.gmra.mxu0 %v3760_v51 }
  0xc2   :  { %2840 = vmatprep.mubr.msk.bf16.mxu0 %vm508_vm0, %v3761_v52  ;;  %v3809_v52 = vld [vmem:[%s5049_s3 + $0x60] sm:$0xff]  }
  0xc3   :  { %3378 = vmatpush3.bf16.msra.mxu1 %v3809_v52  ;;  %v3829_v52 = vld [vmem:[%s5049_s3 + $0x240] sm:$0xff]  }
  0xc4   :  { %3379 = vmatprep.subr.bf16.mxu1 %v3935_v43 }
  0xc9   :  { %778 = vmatmul.mubr.bf16.gmra.mxu0 %v3763_v53 }
  0xca   :  { %2841 = vmatprep.mubr.msk.bf16.mxu0 %vm508_vm0, %v3764_v54 }
  0xd1   :  { %786 = vmatmul.mubr.bf16.gmra.mxu0 %v3766_v55  ;;  %v3810_v55 = vld [vmem:[%s5049_s3 + $0x58] sm:$0xff]  }
  0xd2   :  { %2842 = vmatprep.mubr.msk.bf16.mxu0 %vm508_vm0, %v3767_v56  ;;  %3380 = vmatpush3.bf16.msra.mxu1 %v3810_v55 }
  0xd3   :  { %3381 = vmatprep.subr.bf16.mxu1 %v3935_v43 }
  0xd9   :  { %794 = vmatmul.mubr.bf16.gmra.mxu0 %v3769_v57 }
  0xda   :  { %2843 = vmatprep.mubr.msk.bf16.mxu0 %vm508_vm0, %v3770_v58 }
  0xe1   :  { %802 = vmatmul.mubr.bf16.gmra.mxu0 %v3772_v59  ;;  %v3811_v59 = vld [vmem:[%s5049_s3 + $0x50] sm:$0xff]  }
  0xe2   :  { %2844 = vmatprep.mubr.msk.bf16.mxu0 %vm508_vm0, %v3773_v60  ;;  %3382 = vmatpush3.bf16.msra.mxu1 %v3811_v59 }
  0xe3   :  { %3383 = vmatprep.subr.bf16.mxu1 %v3935_v43 }
  0xe9   :  { %810 = vmatmul.mubr.bf16.gmra.mxu0 %v3775_v61 }
  0xea   :  { %2845 = vmatprep.mubr.msk.bf16.mxu0 %vm508_vm0, %v3776_v62 }
  0xf1   :  { %818 = vmatmul.mubr.bf16.gmra.mxu0 %v3778_v63  ;;  %v3812_v63 = vld [vmem:[%s5049_s3 + $0x48] sm:$0xff]  }
  0xf2   :  { %2846 = vmatprep.mubr.msk.bf16.mxu0 %vm508_vm0, %v3779_v0  ;;  %3384 = vmatpush3.bf16.msra.mxu1 %v3812_v63 }
  0xf3   :  { %3385 = vmatprep.subr.bf16.mxu1 %v3935_v43 }
  0xf9   :  { %826 = vmatmul.mubr.bf16.gmra.mxu0 %v3781_v1 }
  0xfa   :  { %2847 = vmatprep.mubr.msk.bf16.mxu0 %vm508_vm0, %v3782_v2 }
 0x101   :  { %v4203_v5 = vpop.f32.mrf.mxu0  ;;  %834 = vmatmul.mubr.bf16.gmra.mxu0 %v3784_v3  ;;  %v3813_v3 = vld [vmem:[%s5049_s3 + $0x40] sm:$0xff]  }
 0x102   :  { %2848 = vmatprep.mubr.msk.bf16.mxu0 %vm508_vm0, %v3785_v4  ;;  %3386 = vmatpush3.bf16.msra.mxu1 %v3813_v3 }
 0x103   :  { %v645_v6 = vpop.f32.mrf.mxu0  ;;  %3391 = vmatprep.subr.bf16.mxu1 %v3935_v43 }
 0x105   :  { %v4206_v7 = vpop.f32.mrf.mxu0 }
 0x107   :  { %v648_v10 = vpop.f32.mrf.mxu0 }
 0x108   :  { %v3815_v10 = vld [vmem:[%s5049_s3 + $0x278] sm:$0xff]  }
 0x109   :  { %v4214_v11 = vpop.f32.mrf.mxu0  ;;  %842 = vmatmul.mubr.bf16.gmra.mxu0 %v3787_v8 }
 0x10a   :  { %2849 = vmatprep.mubr.msk.bf16.mxu0 %vm508_vm0, %v3788_v9  ;;  %3552 = vmatpush3.bf16.msra.mxu0 %v3815_v10 }
 0x10b   :  { %v653_v12 = vpop.f32.mrf.mxu0  ;;  %3553 = vmatprep.subr.bf16.mxu0 %v3935_v43 }
 0x10d   :  { %v4217_v13 = vpop.f32.mrf.mxu0 }
 0x10f   :  { %v656_v16 = vpop.f32.mrf.mxu0 }
 0x110   :  { %v3817_v16 = vld [vmem:[%s5049_s3 + $0x270] sm:$0xff]  }
 0x111   :  { %v4225_v17 = vpop.f32.mrf.mxu0  ;;  %850 = vmatmul.mubr.bf16.gmra.mxu0 %v3790_v14 }
 0x112   :  { %2850 = vmatprep.mubr.msk.bf16.mxu0 %vm508_vm0, %v3791_v15  ;;  %3554 = vmatpush3.bf16.msra.mxu0 %v3817_v16 }
 0x113   :  { %v661_v18 = vpop.f32.mrf.mxu0  ;;  %3555 = vmatprep.subr.bf16.mxu0 %v3935_v43 }
 0x115   :  { %v4228_v19 = vpop.f32.mrf.mxu0 }
 0x117   :  { %v664_v22 = vpop.f32.mrf.mxu0 }
 0x118   :  { %v3819_v22 = vld [vmem:[%s5049_s3 + $0x268] sm:$0xff]  }
 0x119   :  { %v4236_v23 = vpop.f32.mrf.mxu0  ;;  %858 = vmatmul.mubr.bf16.gmra.mxu0 %v3793_v20 }
 0x11a   :  { %2851 = vmatprep.mubr.msk.bf16.mxu0 %vm508_vm0, %v3794_v21  ;;  %3556 = vmatpush3.bf16.msra.mxu0 %v3819_v22 }
 0x11b   :  { %v669_v24 = vpop.f32.mrf.mxu0  ;;  %3557 = vmatprep.subr.bf16.mxu0 %v3935_v43 }
 0x11d   :  { %v4239_v25 = vpop.f32.mrf.mxu0 }
 0x11f   :  { %v672_v28 = vpop.f32.mrf.mxu0 }
 0x120   :  { %v3821_v28 = vld [vmem:[%s5049_s3 + $0x260] sm:$0xff]  }
 0x121   :  { %v4247_v29 = vpop.f32.mrf.mxu0  ;;  %866 = vmatmul.mubr.bf16.gmra.mxu0 %v3796_v26 }
 0x122   :  { %2852 = vmatprep.mubr.msk.bf16.mxu0 %vm508_vm0, %v3797_v27  ;;  %3558 = vmatpush3.bf16.msra.mxu0 %v3821_v28 }
 0x123   :  { %v677_v30 = vpop.f32.mrf.mxu0  ;;  %3559 = vmatprep.subr.bf16.mxu0 %v3935_v43 }
 0x125   :  { %v4250_v31 = vpop.f32.mrf.mxu0 }
 0x127   :  { %v680_v34 = vpop.f32.mrf.mxu0 }
 0x128   :  { %v3823_v34 = vld [vmem:[%s5049_s3 + $0x258] sm:$0xff]  }
 0x129   :  { %v4258_v35 = vpop.f32.mrf.mxu0  ;;  %874 = vmatmul.mubr.bf16.gmra.mxu0 %v3799_v32 }
 0x12a   :  { %2853 = vmatprep.mubr.msk.bf16.mxu0 %vm508_vm0, %v3800_v33  ;;  %3560 = vmatpush3.bf16.msra.mxu0 %v3823_v34 }
 0x12b   :  { %v685_v36 = vpop.f32.mrf.mxu0  ;;  %3561 = vmatprep.subr.bf16.mxu0 %v3935_v43 }
 0x12d   :  { %v4261_v37 = vpop.f32.mrf.mxu0 }
 0x12f   :  { %v688_v40 = vpop.f32.mrf.mxu0 }
 0x130   :  { %v3825_v40 = vld [vmem:[%s5049_s3 + $0x250] sm:$0xff]  }
 0x131   :  { %v4272_v42 = vpop.f32.mrf.mxu0  ;;  %882 = vmatmul.mubr.bf16.gmra.mxu0 %v3802_v38 }
 0x132   :  { %2854 = vmatprep.mubr.msk.bf16.mxu0 %vm508_vm0, %v3803_v39  ;;  %3562 = vmatpush3.bf16.msra.mxu0 %v3825_v40 }
 0x133   :  { %v693_v44 = vpop.f32.mrf.mxu0  ;;  %3563 = vmatprep.subr.bf16.mxu0 %v3935_v43 }
 0x135   :  { %v4284_v47 = vpop.f32.mrf.mxu0 }
 0x136   :  { %3564 = vmatpush3.bf16.msra.mxu0 %v3827_v46 }
 0x137   :  { %v696_v48 = vpop.f32.mrf.mxu0  ;;  %3565 = vmatprep.subr.bf16.mxu0 %v3935_v43 }
 0x139   :  { %v4290_v50 = vpop.f32.mrf.mxu0  ;;  %890 = vmatmul.mubr.bf16.gmra.mxu0 %v3805_v45 }
 0x13a   :  { %3567 = vmatprep.mubr.msk.bf16.mxu0 %vm3936_vm2, %v3935_v43  ;;  %3566 = vmatpush3.bf16.msra.mxu0 %v3829_v52 }
 0x13b   :  { %v701_v51 = vpop.f32.mrf.mxu0  ;;  %3591 = vmatprep.subr.bf16.mxu0 %v3935_v43 }
 0x13d   :  { %v4296_v53 = vpop.f32.mrf.mxu0 }
 0x13f   :  { %v704_v54 = vpop.f32.mrf.mxu0 }
 0x141   :  { %v4302_v56 = vpop.f32.mrf.mxu0 }
 0x142   :  { %v898_v57 = vmax.f32 %v4203_v5, %v4302_v56 }
 0x143   :  { %v709_v58 = vpop.f32.mrf.mxu0 }
 0x145   :  { %v4310_v60 = vpop.f32.mrf.mxu0 }
 0x146   :  { %v899_v61 = vmax.f32 %v4206_v7, %v4310_v60  ;;  %v3814_v7 = vld [vmem:[%s5049_s3 + $0x38] sm:$0xff]  }
 0x147   :  { %v712_v62 = vpop.f32.mrf.mxu0 }
 0x149   :  { %v4318_v0 = vpop.f32.mrf.mxu0 }
 0x14a   :  { %v900_v1 = vmax.f32 %v4214_v11, %v4318_v0 }
 0x14b   :  { %v717_v2 = vpop.f32.mrf.mxu0 }
 0x14d   :  { %v4326_v4 = vpop.f32.mrf.mxu0 }
 0x14e   :  { %v901_v6 = vmax.f32 %v4217_v13, %v4326_v4 }
 0x14f   :  { %v720_v8 = vpop.f32.mrf.mxu0 }
 0x151   :  { %v4331_v9 = vpop.f32.mrf.mxu0 }
 0x152   :  { %v5055_v13 = vmax.f32 %v4225_v17, %v4331_v9 }
 0x153   :  { %v725_v14 = vpop.f32.mrf.mxu0 }
 0x155   :  { %v4343_v15 = vpop.f32.mrf.mxu0 }
 0x157   :  { %v728_v20 = vpop.f32.mrf.mxu0 }
 0x159   :  { %v4351_v21 = vpop.f32.mrf.mxu0 }
 0x15b   :  { %v733_v26 = vpop.f32.mrf.mxu0 }
 0x15d   :  { %v4359_v27 = vpop.f32.mrf.mxu0 }
 0x15f   :  { %v736_v32 = vpop.f32.mrf.mxu0 }
 0x161   :  { %v4367_v33 = vpop.f32.mrf.mxu0 }
 0x163   :  { %v741_v38 = vpop.f32.mrf.mxu0 }
 0x165   :  { %v4375_v39 = vpop.f32.mrf.mxu0 }
 0x167   :  { %v744_v44 = vpop.f32.mrf.mxu0 }
 0x169   :  { %v4383_v45 = vpop.f32.mrf.mxu0 }
 0x16b   :  { %v749_v49 = vpop.f32.mrf.mxu0 }
 0x16d   :  { %v4391_v51 = vpop.f32.mrf.mxu0 }
 0x16f   :  { %v752_v55 = vpop.f32.mrf.mxu0 }
 0x171   :  { %v4399_v58 = vpop.f32.mrf.mxu0 }
 0x173   :  { %v757_v62 = vpop.f32.mrf.mxu0 }
 0x175   :  { %v4403_v63 = vpop.f32.mrf.mxu0 }
 0x177   :  { %v760_v3 = vpop.f32.mrf.mxu0 }
 0x179   :  { %v4407_v8 = vpop.f32.mrf.mxu0 }
 0x17b   :  { %v765_v14 = vpop.f32.mrf.mxu0 }
 0x17d   :  { %v4411_v16 = vpop.f32.mrf.mxu0 }
 0x17f   :  { %v768_v22 = vpop.f32.mrf.mxu0 }
 0x181   :  { %v771_v26 = vpop.f32.mrf.mxu0 }
 0x183   :  { %v773_v28 = vpop.f32.mrf.mxu0 }
 0x185   :  { %v774_v32 = vpop.f32.mrf.mxu0 }
 0x187   :  { %v776_v34 = vpop.f32.mrf.mxu0 }
 0x189   :  { %v779_v38 = vpop.f32.mrf.mxu0 }
 0x18b   :  { %v781_v40 = vpop.f32.mrf.mxu0 }
 0x18d   :  { %v782_v44 = vpop.f32.mrf.mxu0 }
 0x18f   :  { %v784_v46 = vpop.f32.mrf.mxu0 }
 0x191   :  { %v787_v49 = vpop.f32.mrf.mxu0 }
 0x193   :  { %v789_v52 = vpop.f32.mrf.mxu0 }
 0x195   :  { %v4415_v55 = vpop.f32.mrf.mxu0 }
 0x197   :  { %v792_v62 = vpop.f32.mrf.mxu0 }
 0x199   :  { %v4417_v3 = vpop.f32.mrf.mxu0 }
 0x19b   :  { %v797_v14 = vpop.f32.mrf.mxu0 }
 0x19d   :  { %v4419_v10 = vpop.f32.mrf.mxu0 }
 0x19f   :  { %v800_v20 = vpop.f32.mrf.mxu0 }
 0x1a1   :  { %v4421_v22 = vpop.f32.mrf.mxu0 }
 0x1a3   :  { %v805_v28 = vpop.f32.mrf.mxu0 }
 0x1a5   :  { %v4423_v2 = vpop.f32.mrf.mxu0 }
 0x1a7   :  { %v808_v34 = vpop.f32.mrf.mxu0 }
 0x1a9   :  { %v4425_v40 = vpop.f32.mrf.mxu0 }
 0x1ab   :  { %v813_v46 = vpop.f32.mrf.mxu0 }
 0x1ad   :  { %v4427_v59 = vpop.f32.mrf.mxu0 }
 0x1af   :  { %v816_v52 = vpop.f32.mrf.mxu0 }
 0x1b0   :  { %v4443_v52 = vld [vmem:[%s5050_s2] ss:$0 sm:$0xff] }
 0x1b1   :  { %v4429_v54 = vpop.f32.mrf.mxu0 }
 0x1b3   :  { %v821_v62 = vpop.f32.mrf.mxu0 }
 0x1b5   :  { %v4431_v48 = vpop.f32.mrf.mxu0 }
 0x1b7   :  { %v824_v14 = vpop.f32.mrf.mxu0 }
 0x1b9   :  { %v4433_v41 = vpop.f32.mrf.mxu0 }
 0x1bb   :  { %v829_v20 = vpop.f32.mrf.mxu0 }
 0x1bd   :  { %v4435_v36 = vpop.f32.mrf.mxu0 }
 0x1bf   :  { %v832_v28 = vpop.f32.mrf.mxu0 }
 0x1c1   :  { %v835_v30 = vpop.f32.mrf.mxu0 }
 0x1c2   :  { %v914_v34 = vmax.f32 %v771_v26, %v835_v30 }
 0x1c3   :  { %v837_v24 = vpop.f32.mrf.mxu0 }
 0x1c4   :  { %v930_v46 = vmax.f32 %v898_v57, %v914_v34 }
 0x1c5   :  { %v838_v62 = vpop.f32.mrf.mxu0 }
 0x1c6   :  { %v915_v14 = vmax.f32 %v774_v32, %v838_v62  ;;  %v953_v20 = vadd.f32 %v4443_v52, %v930_v46 }
 0x1c7   :  { %v840_v18 = vpop.f32.mrf.mxu0 }
 0x1c8   :  { %v931_v28 = vmax.f32 %v899_v61, %v915_v14  ;;  %v969_v56 = vmax.f32 %v953_v20, 0.0 }
 0x1c9   :  { %v843_v30 = vpop.f32.mrf.mxu0 }
 0x1ca   :  { %v954_v24 = vadd.f32 %v4443_v52, %v931_v28  ;;  %v916_v26 = vmax.f32 %v779_v38, %v843_v30 }
 0x1cb   :  { %v845_v5 = vpop.f32.mrf.mxu0 }
 0x1cc   :  { %v970_v57 = vmax.f32 %v954_v24, 0.0  ;;  %v932_v34 = vmax.f32 %v900_v1, %v916_v26  ;;  %v3818_v24 = vld [vmem:[%s5049_s3 + $0x28] sm:$0xff]   ;;  %v5056_v26 = vmax.f32 %v4228_v19, %v4343_v15 }
 0x1cd   :  { %v846_v12 = vpop.f32.mrf.mxu0 }
 0x1ce   :  { %v955_v18 = vadd.f32 %v4443_v52, %v932_v34  ;;  %v917_v32 = vmax.f32 %v782_v44, %v846_v12  ;;  %v4454_v46 = vpack.c.bf16 %v970_v57, %v969_v56  ;;  %v3816_v12 = vld [vmem:[%s5049_s3 + $0x30] sm:$0xff]  }
 0x1cf   :  { %v848_v62 = vpop.f32.mrf.mxu0 }
 0x1d0   :  { %v933_v60 = vmax.f32 %v901_v6, %v917_v32  ;;  %v1027_v61 = vrot.slane %v4454_v46, 4  ;;  %v971_v44 = vmax.f32 %v955_v18, 0.0  ;;  %v5057_v32 = vmax.f32 %v4236_v23, %v4351_v21 }
 0x1d1   :  { %v851_v38 = vpop.f32.mrf.mxu0 }
 0x1d2   :  { %v956_v11 = vadd.f32 %v4443_v52, %v933_v60  ;;  %v918_v0 = vmax.f32 %v787_v49, %v851_v38  ;;  %3388 = vmatmul.mubr.bf16.vlgmr.msra.gmra.mxu1 %v1027_v61  ;;  %v3822_v61 = vld [vmem:[%s5049_s3 + $0x18] sm:$0xff]   ;;  %v5058_v38 = vmax.f32 %v4239_v25, %v4359_v27 }
 0x1d3   :  { %3392 = vmatpush3.bf16.msra.mxu1 %v3814_v7  ;;  %v853_v1 = vpop.f32.mrf.mxu0  ;;  %3407 = vmatprep.mubr.msk.bf16.mxu1 %vm3936_vm2, %v3935_v43 }
 0x1d4   :  { %v972_v14 = vmax.f32 %v956_v11, 0.0  ;;  %v934_v4 = vmax.f32 %v5055_v13, %v918_v0  ;;  %3393 = vmatprep.subr.bf16.mxu1 %v3935_v43 }
 0x1d5   :  { %v854_v6 = vpop.f32.mrf.mxu0 }
 0x1d6   :  { %v4473_v49 = vpack.c.bf16 %v972_v14, %v971_v44  ;;  %v957_v20 = vadd.f32 %v4443_v52, %v934_v4  ;;  %v919_v28 = vmax.f32 %v4415_v55, %v854_v6  ;;  %v3820_v55 = vld [vmem:[%s5049_s3 + $0x20] sm:$0xff]   ;;  %v5059_v14 = vmax.f32 %v4247_v29, %v4367_v33  ;;  %v3826_v6 = vld [vmem:[%s5049_s3 + $0x8] sm:$0xff]  }
 0x1d7   :  { %3394 = vmatpush3.bf16.msra.mxu1 %v3816_v12  ;;  %v856_v30 = vpop.f32.mrf.mxu0 }
 0x1d8   :  { %v935_v17 = vmax.f32 %v5056_v26, %v919_v28  ;;  %3395 = vmatprep.subr.bf16.mxu1 %v3935_v43  ;;  %v973_v34 = vmax.f32 %v957_v20, 0.0  ;;  %v5060_v28 = vmax.f32 %v4250_v31, %v4375_v39  ;;  %v3828_v26 = vld [vmem:[%s5049_s3] sm:$0xff]  }
 0x1d9   :  { %v859_v9 = vpop.f32.mrf.mxu0 }
 0x1da   :  { %v958_v5 = vadd.f32 %v4443_v52, %v935_v17  ;;  %v920_v56 = vmax.f32 %v4417_v3, %v859_v9 }
 0x1db   :  { %3396 = vmatpush3.bf16.msra.mxu1 %v3818_v24  ;;  %v861_v57 = vpop.f32.mrf.mxu0 }
 0x1dc   :  { %v974_v18 = vmax.f32 %v958_v5, 0.0  ;;  %v936_v19 = vmax.f32 %v5057_v32, %v920_v56  ;;  %3397 = vmatprep.subr.bf16.mxu1 %v3935_v43  ;;  %v5061_v5 = vmax.f32 %v4258_v35, %v4383_v45  ;;  %v3831_v35 = vld [vmem:[%s5049_s3 + $0x2f8] sm:$0xff]  }
 0x1dd   :  { %v862_v15 = vpop.f32.mrf.mxu0 }
 0x1de   :  { %v4493_v62 = vpack.c.bf16 %v974_v18, %v973_v34  ;;  %v959_v7 = vadd.f32 %v4443_v52, %v936_v19  ;;  %v921_v3 = vmax.f32 %v4419_v10, %v862_v15  ;;  %v3824_v10 = vld [vmem:[%s5049_s3 + $0x10] sm:$0xff]   ;;  %v3830_v34 = vld [vmem:[%s5049_s3 + $0xb8] sm:$0xff]   ;;  %v5062_v18 = vmax.f32 %v4261_v37, %v4391_v51 }
 0x1df   :  { %3398 = vmatpush3.bf16.msra.mxu1 %v3820_v55  ;;  %v864_v60 = vpop.f32.mrf.mxu0  ;;  %v3833_v37 = vld [vmem:[%s5049_s3 + $0x2f0] sm:$0xff]  }
 0x1e0   :  { %v937_v23 = vmax.f32 %v5058_v38, %v921_v3  ;;  %3399 = vmatprep.subr.bf16.mxu1 %v3935_v43  ;;  %v975_v12 = vmax.f32 %v959_v7, 0.0  ;;  %v3832_v3 = vld [vmem:[%s5049_s3 + $0xb0] sm:$0xff]  }
 0x1e1   :  { %v867_v21 = vpop.f32.mrf.mxu0 }
 0x1e2   :  { %v960_v11 = vadd.f32 %v4443_v52, %v937_v23  ;;  %v922_v0 = vmax.f32 %v4421_v22, %v867_v21 }
 0x1e3   :  { %3400 = vmatpush3.bf16.msra.mxu1 %v3822_v61  ;;  %v869_v1 = vpop.f32.mrf.mxu0  ;;  %v5063_v61 = vmax.f32 %v4272_v42, %v4399_v58  ;;  %v3834_v58 = vld [vmem:[%s5049_s3 + $0xa8] sm:$0xff]  }
 0x1e4   :  { %v976_v44 = vmax.f32 %v960_v11, 0.0  ;;  %v938_v25 = vmax.f32 %v5059_v14, %v922_v0  ;;  %3401 = vmatprep.subr.bf16.mxu1 %v3935_v43  ;;  %v3835_v11 = vld [vmem:[%s5049_s3 + $0x2e8] sm:$0xff]   ;;  %v5064_v0 = vmax.f32 %v4284_v47, %v4403_v63  ;;  %v3836_v14 = vld [vmem:[%s5049_s3 + $0xa0] sm:$0xff]  }
 0x1e5   :  { %v870_v27 = vpop.f32.mrf.mxu0  ;;  %v3837_v47 = vld [vmem:[%s5049_s3 + $0x2e0] sm:$0xff]  }
 0x1e6   :  { %v4513_v13 = vpack.c.bf16 %v976_v44, %v975_v12  ;;  %v923_v4 = vmax.f32 %v4423_v2, %v870_v27  ;;  %v961_v20 = vadd.f32 %v4443_v52, %v938_v25  ;;  %v5065_v27 = vmax.f32 %v4290_v50, %v4407_v8  ;;  %v3839_v50 = vld [vmem:[%s5049_s3 + $0x2d8] sm:$0xff]  }
 0x1e7   :  { %3402 = vmatpush3.bf16.msra.mxu1 %v3824_v10  ;;  %v872_v22 = vpop.f32.mrf.mxu0 }
 0x1e8   :  { %v939_v29 = vmax.f32 %v5060_v28, %v923_v4  ;;  %3403 = vmatprep.subr.bf16.mxu1 %v3935_v43  ;;  %v977_v17 = vmax.f32 %v961_v20, 0.0  ;;  %v3838_v28 = vld [vmem:[%s5049_s3 + $0x98] sm:$0xff]  }
 0x1e9   :  { %v875_v33 = vpop.f32.mrf.mxu0 }
 0x1ea   :  { %v962_v30 = vadd.f32 %v4443_v52, %v939_v29  ;;  %v924_v24 = vmax.f32 %v4425_v40, %v875_v33  ;;  %v5066_v29 = vmax.f32 %v4296_v53, %v4411_v16  ;;  %v3842_v16 = vld [vmem:[%s5049_s3 + $0x88] sm:$0xff]  }
 0x1eb   :  { %3404 = vmatpush3.bf16.msra.mxu1 %v3826_v6  ;;  %v877_v2 = vpop.f32.mrf.mxu0 }
 0x1ec   :  { %v978_v9 = vmax.f32 %v962_v30, 0.0  ;;  %v940_v31 = vmax.f32 %v5061_v5, %v924_v24  ;;  %3405 = vmatprep.subr.bf16.mxu1 %v3935_v43  ;;  %v3840_v30 = vld [vmem:[%s5049_s3 + $0x90] sm:$0xff]   ;;  %v3846_v5 = vld [vmem:[%s5049_s3 + $0xf8] sm:$0xff]  }
 0x1ed   :  { %v878_v39 = vpop.f32.mrf.mxu0  ;;  %v3841_v24 = vld [vmem:[%s5049_s3 + $0x2d0] sm:$0xff]  }
 0x1ee   :  { %v4533_v56 = vpack.c.bf16 %v978_v9, %v977_v17  ;;  %v963_v57 = vadd.f32 %v4443_v52, %v940_v31  ;;  %v925_v40 = vmax.f32 %v4427_v59, %v878_v39  ;;  %v3844_v17 = vld [vmem:[%s5049_s3 + $0x80] sm:$0xff]   ;;  %v3847_v31 = vld [vmem:[%s5049_s3 + $0x378] sm:$0xff]  }
 0x1ef   :  { %3406 = vmatpush3.bf16.msra.mxu1 %v3828_v26  ;;  %v880_v55 = vpop.f32.mrf.mxu0  ;;  %v3845_v9 = vld [vmem:[%s5049_s3 + $0x2c0] sm:$0xff]  }
 0x1f0   :  { %v1974_v45 = vrot.slane %v4533_v56, 4  ;;  %v941_v32 = vmax.f32 %v5062_v18, %v925_v40  ;;  %3411 = vmatprep.subr.bf16.mxu1 %v3935_v43  ;;  %v979_v51 = vmax.f32 %v963_v57, 0.0  ;;  %v3848_v57 = vld [vmem:[%s5049_s3 + $0xf0] sm:$0xff]   ;;  %v3850_v55 = vld [vmem:[%s5049_s3 + $0xe8] sm:$0xff]   ;;  %v3854_v18 = vld [vmem:[%s5049_s3 + $0xd8] sm:$0xff]  }
 0x1f1   :  { %v883_v19 = vpop.f32.mrf.mxu0  ;;  %v3849_v40 = vld [vmem:[%s5049_s3 + $0x370] sm:$0xff]  }
 0x1f2   :  { %v964_v59 = vadd.f32 %v4443_v52, %v941_v32  ;;  %v926_v15 = vmax.f32 %v4429_v54, %v883_v19  ;;  %3408 = vmatmul.mubr.bf16.vlgmr.msra.gmra.mxu1 %v4454_v46  ;;  %3568 = vmatmul.mubr.bf16.vlgmr.msra.gmra.mxu0 %v1974_v45  ;;  %v3853_v45 = vld [vmem:[%s5049_s3 + $0x360] sm:$0xff]   ;;  %v3855_v32 = vld [vmem:[%s5049_s3 + $0x358] sm:$0xff]   ;;  %v3856_v19 = vld [vmem:[%s5049_s3 + $0xd0] sm:$0xff]  }
 0x1f3   :  { %3412 = vmatpush3.bf16.msra.mxu1 %v3830_v34  ;;  %3592 = vmatpush3.bf16.msra.mxu0 %v3831_v35  ;;  %v885_v7 = vpop.f32.mrf.mxu0  ;;  %v3851_v34 = vld [vmem:[%s5049_s3 + $0x368] sm:$0xff]   ;;  %v3852_v35 = vld [vmem:[%s5049_s3 + $0xe0] sm:$0xff]  }
 0x1f4   :  { %v980_v60 = vmax.f32 %v964_v59, 0.0  ;;  %v942_v54 = vmax.f32 %v5063_v61, %v926_v15  ;;  %3413 = vmatprep.subr.bf16.mxu1 %v3935_v43  ;;  %3593 = vmatprep.subr.bf16.mxu0 %v3935_v43  ;;  %v3857_v59 = vld [vmem:[%s5049_s3 + $0x350] sm:$0xff]   ;;  %v3858_v15 = vld [vmem:[%s5049_s3 + $0xc8] sm:$0xff]  }
 0x1f5   :  { %v886_v46 = vpop.f32.mrf.mxu0  ;;  %3427 = vmatprep.mubr.msk.bf16.mxu1 %vm3936_vm2, %v3935_v43  ;;  %3607 = vmatprep.mubr.msk.bf16.mxu0 %vm3936_vm2, %v3935_v43  ;;  %v3859_v7 = vld [vmem:[%s5049_s3 + $0x348] sm:$0xff]  }
 0x1f6   :  { %v4566_v38 = vpack.c.bf16 %v980_v60, %v979_v51  ;;  %v965_v23 = vadd.f32 %v4443_v52, %v942_v54  ;;  %v927_v21 = vmax.f32 %v4431_v48, %v886_v46  ;;  %v3862_v51 = vld [vmem:[%s5049_s3 + $0x138] sm:$0xff]   ;;  %v1329_v54 = vrot.slane %v4473_v49, 4  ;;  %v3864_v46 = vld [vmem:[%s5049_s3 + $0x130] sm:$0xff]  }
 0x1f7   :  { %3414 = vmatpush3.bf16.msra.mxu1 %v3832_v3  ;;  %3594 = vmatpush3.bf16.msra.mxu0 %v3833_v37  ;;  %v888_v42 = vpop.f32.mrf.mxu0  ;;  %v3860_v3 = vld [vmem:[%s5049_s3 + $0xc0] sm:$0xff]   ;;  %v3863_v60 = vld [vmem:[%s5049_s3 + $0x3f8] sm:$0xff]  }
 0x1f8   :  { %v943_v1 = vmax.f32 %v5064_v0, %v927_v21  ;;  %3415 = vmatprep.subr.bf16.mxu1 %v3935_v43  ;;  %3595 = vmatprep.subr.bf16.mxu0 %v3935_v43  ;;  %v981_v63 = vmax.f32 %v965_v23, 0.0  ;;  %v2189_v39 = vrot.slane %v4566_v38, 4  ;;  %v3861_v37 = vld [vmem:[%s5049_s3 + $0x340] sm:$0xff]   ;;  %v3865_v23 = vld [vmem:[%s5049_s3 + $0x3f0] sm:$0xff]   ;;  %v3867_v21 = vld [vmem:[%s5049_s3 + $0x3e8] sm:$0xff]  }
 0x1f9   :  { %v891_v48 = vpop.f32.mrf.mxu0  ;;  %v3868_v42 = vld [vmem:[%s5049_s3 + $0x120] sm:$0xff]   ;;  %v3871_v0 = vld [vmem:[%s5049_s3 + $0x3d8] sm:$0xff]  }
 0x1fa   :  { %v966_v10 = vadd.f32 %v4443_v52, %v943_v1  ;;  %v928_v12 = vmax.f32 %v4433_v41, %v891_v48  ;;  %v3872_v1 = vld [vmem:[%s5049_s3 + $0x110] sm:$0xff]  }
 0x1fb   :  { %3416 = vmatpush3.bf16.msra.mxu1 %v3834_v58  ;;  %3596 = vmatpush3.bf16.msra.mxu0 %v3835_v11  ;;  %v893_v44 = vpop.f32.mrf.mxu0  ;;  %v3869_v58 = vld [vmem:[%s5049_s3 + $0x3e0] sm:$0xff]   ;;  %v3870_v11 = vld [vmem:[%s5049_s3 + $0x118] sm:$0xff]   ;;  %v3873_v48 = vld [vmem:[%s5049_s3 + $0x3d0] sm:$0xff]  }
 0x1fc   :  { %v982_v25 = vmax.f32 %v966_v10, 0.0  ;;  %v944_v4 = vmax.f32 %v5065_v27, %v928_v12  ;;  %3417 = vmatprep.subr.bf16.mxu1 %v3935_v43  ;;  %3597 = vmatprep.subr.bf16.mxu0 %v3935_v43  ;;  %v3874_v10 = vld [vmem:[%s5049_s3 + $0x108] sm:$0xff]   ;;  %v3876_v44 = vld [vmem:[%s5049_s3 + $0x100] sm:$0xff]  }
 0x1fd   :  { %v894_v41 = vpop.f32.mrf.mxu0  ;;  %v3875_v12 = vld [vmem:[%s5049_s3 + $0x3c8] sm:$0xff]  }
 0x1fe   :  { %v4594_v22 = vpack.c.bf16 %v982_v25, %v981_v63  ;;  %v967_v6 = vadd.f32 %v4443_v52, %v944_v4  ;;  %v929_v20 = vmax.f32 %v4435_v36, %v894_v41  ;;  %v3879_v25 = vld [vmem:[%s5049_s3 + $0x170] sm:$0xff]   ;;  %v3880_v27 = vld [vmem:[%s5049_s3 + $0x168] sm:$0xff]   ;;  %v3881_v4 = vld [vmem:[%s5049_s3 + $0x160] sm:$0xff]  }
 0x1ff   :  { %3418 = vmatpush3.bf16.msra.mxu1 %v3836_v14  ;;  %3598 = vmatpush3.bf16.msra.mxu0 %v3837_v47  ;;  %v896_v8 = vpop.f32.mrf.mxu0  ;;  %v3877_v14 = vld [vmem:[%s5049_s3 + $0x3c0] sm:$0xff]   ;;  %v3878_v47 = vld [vmem:[%s5049_s3 + $0x178] sm:$0xff]  }
 0x200   :  { %v945_v33 = vmax.f32 %v5066_v29, %v929_v20  ;;  %3419 = vmatprep.subr.bf16.mxu1 %v3935_v43  ;;  %3599 = vmatprep.subr.bf16.mxu0 %v3935_v43  ;;  %v983_v2 = vmax.f32 %v967_v6, 0.0  ;;  %v2404_v61 = vrot.slane %v4594_v22, 4  ;;  %v3882_v41 = vld [vmem:[%s5049_s3 + $0x158] sm:$0xff]   ;;  %v3883_v6 = vld [vmem:[%s5049_s3 + $0x150] sm:$0xff]   ;;  %v3884_v20 = vld [vmem:[%s5049_s3 + $0x148] sm:$0xff]   ;;  %v1544_v8 = vrot.slane %v4493_v62, 4 }
 0x201   :  { %v3887_v29 = vld [vmem:[%s5049_s3 + $0x1b0] sm:$0xff]  }
 0x202   :  { %v968_v36 = vadd.f32 %v4443_v52, %v945_v33  ;;  %v3843_v52 = vld [vmem:[%s5049_s3 + $0x2c8] sm:$0xff]  }
 0x203   :  { %3420 = vmatpush3.bf16.msra.mxu1 %v3838_v28  ;;  %3600 = vmatpush3.bf16.msra.mxu0 %v3839_v50  ;;  %v3885_v28 = vld [vmem:[%s5049_s3 + $0x140] sm:$0xff]   ;;  %v3886_v50 = vld [vmem:[%s5049_s3 + $0x1b8] sm:$0xff]   ;;  %v3888_v33 = vld [vmem:[%s5049_s3 + $0x1a8] sm:$0xff]  }
 0x204   :  { %v984_v26 = vmax.f32 %v968_v36, 0.0  ;;  %3421 = vmatprep.subr.bf16.mxu1 %v3935_v43  ;;  %3601 = vmatprep.subr.bf16.mxu0 %v3935_v43  ;;  %v3890_v36 = vld [vmem:[%s5049_s3 + $0x198] sm:$0xff]  }
 0x206   :  { %v4618_v53 = vpack.c.bf16 %v984_v26, %v983_v2  ;;  %v3893_v2 = vld [vmem:[%s5049_s3 + $0x180] sm:$0xff]   ;;  %v3894_v26 = vld [vmem:[%s5049_s3 + $0x1f8] sm:$0xff]  }
 0x207   :  { %3422 = vmatpush3.bf16.msra.mxu1 %v3840_v30  ;;  %3602 = vmatpush3.bf16.msra.mxu0 %v3841_v24  ;;  %v3891_v30 = vld [vmem:[%s5049_s3 + $0x190] sm:$0xff]   ;;  %v3892_v24 = vld [vmem:[%s5049_s3 + $0x188] sm:$0xff]  }
 0x208   :  { %3423 = vmatprep.subr.bf16.mxu1 %v3935_v43  ;;  %3603 = vmatprep.subr.bf16.mxu0 %v3935_v43  ;;  %v2619_v63 = vrot.slane %v4618_v53, 4 }
 0x20b   :  { %3424 = vmatpush3.bf16.msra.mxu1 %v3842_v16  ;;  %3604 = vmatpush3.bf16.msra.mxu0 %v3843_v52  ;;  %v3895_v52 = vld [vmem:[%s5049_s3 + $0x1f0] sm:$0xff]  }
 0x20c   :  { %3425 = vmatprep.subr.bf16.mxu1 %v3935_v43  ;;  %3605 = vmatprep.subr.bf16.mxu0 %v3935_v43 }
 0x20f   :  { %3426 = vmatpush3.bf16.msra.mxu1 %v3844_v17  ;;  %3606 = vmatpush3.bf16.msra.mxu0 %v3845_v9 }
 0x210   :  { %3431 = vmatprep.subr.bf16.mxu1 %v3935_v43  ;;  %3631 = vmatprep.subr.bf16.mxu0 %v3935_v43 }
 0x212   :  { %3428 = vmatmul.mubr.bf16.vlgmr.msra.gmra.mxu1 %v4473_v49  ;;  %3608 = vmatmul.mubr.bf16.vlgmr.msra.gmra.mxu0 %v2189_v39  ;;  %v3866_v49 = vld [vmem:[%s5049_s3 + $0x128] sm:$0xff]   ;;  %v3897_v39 = vld [vmem:[%s5049_s3 + $0x1e0] sm:$0xff]  }
 0x213   :  { %3432 = vmatpush3.bf16.msra.mxu1 %v3846_v5  ;;  %3632 = vmatpush3.bf16.msra.mxu0 %v3847_v31  ;;  %v3896_v5 = vld [vmem:[%s5049_s3 + $0x1e8] sm:$0xff]  }
 0x214   :  { %3433 = vmatprep.subr.bf16.mxu1 %v3935_v43  ;;  %3633 = vmatprep.subr.bf16.mxu0 %v3935_v43 }
 0x215   :  { %3447 = vmatprep.mubr.msk.bf16.mxu1 %vm3936_vm2, %v3935_v43  ;;  %3647 = vmatprep.mubr.msk.bf16.mxu0 %vm3936_vm2, %v3935_v43 }
 0x217   :  { %3434 = vmatpush3.bf16.msra.mxu1 %v3848_v57  ;;  %3634 = vmatpush3.bf16.msra.mxu0 %v3849_v40  ;;  %v3898_v57 = vld [vmem:[%s5049_s3 + $0x1d8] sm:$0xff]   ;;  %v3899_v40 = vld [vmem:[%s5049_s3 + $0x1d0] sm:$0xff]  }
 0x218   :  { %3435 = vmatprep.subr.bf16.mxu1 %v3935_v43  ;;  %3635 = vmatprep.subr.bf16.mxu0 %v3935_v43 }
 0x21b   :  { %3436 = vmatpush3.bf16.msra.mxu1 %v3850_v55  ;;  %3636 = vmatpush3.bf16.msra.mxu0 %v3851_v34  ;;  %v3900_v55 = vld [vmem:[%s5049_s3 + $0x1c8] sm:$0xff]   ;;  %v3901_v34 = vld [vmem:[%s5049_s3 + $0x1c0] sm:$0xff]  }
 0x21c   :  { %3437 = vmatprep.subr.bf16.mxu1 %v3935_v43  ;;  %3637 = vmatprep.subr.bf16.mxu0 %v3935_v43 }
 0x21f   :  { %3438 = vmatpush3.bf16.msra.mxu1 %v3852_v35  ;;  %3638 = vmatpush3.bf16.msra.mxu0 %v3853_v45  ;;  %v3902_v35 = vld [vmem:[%s5049_s3 + $0x238] sm:$0xff]   ;;  %v1759_v45 = vrot.slane %v4513_v13, 4 }
 0x220   :  { %3439 = vmatprep.subr.bf16.mxu1 %v3935_v43  ;;  %3639 = vmatprep.subr.bf16.mxu0 %v3935_v43 }
 0x223   :  { %3440 = vmatpush3.bf16.msra.mxu1 %v3854_v18  ;;  %3640 = vmatpush3.bf16.msra.mxu0 %v3855_v32 }
 0x224   :  { %3441 = vmatprep.subr.bf16.mxu1 %v3935_v43  ;;  %3641 = vmatprep.subr.bf16.mxu0 %v3935_v43 }
 0x227   :  { %3442 = vmatpush3.bf16.msra.mxu1 %v3856_v19  ;;  %3642 = vmatpush3.bf16.msra.mxu0 %v3857_v59  ;;  %v3903_v59 = vld [vmem:[%s5049_s3 + $0x230] sm:$0xff]  }
 0x228   :  { %3443 = vmatprep.subr.bf16.mxu1 %v3935_v43  ;;  %3643 = vmatprep.subr.bf16.mxu0 %v3935_v43 }
 0x22b   :  { %3444 = vmatpush3.bf16.msra.mxu1 %v3858_v15  ;;  %3644 = vmatpush3.bf16.msra.mxu0 %v3859_v7 }
 0x22c   :  { %3445 = vmatprep.subr.bf16.mxu1 %v3935_v43  ;;  %3645 = vmatprep.subr.bf16.mxu0 %v3935_v43 }
 0x22f   :  { %3446 = vmatpush3.bf16.msra.mxu1 %v3860_v3  ;;  %3646 = vmatpush3.bf16.msra.mxu0 %v3861_v37  ;;  %v3904_v37 = vld [vmem:[%s5049_s3 + $0x228] sm:$0xff]  }
 0x230   :  { %3451 = vmatprep.subr.bf16.mxu1 %v3935_v43  ;;  %3671 = vmatprep.subr.bf16.mxu0 %v3935_v43 }
 0x232   :  { %3448 = vmatmul.mubr.bf16.vlgmr.msra.gmra.mxu1 %v1329_v54  ;;  %3648 = vmatmul.mubr.bf16.vlgmr.msra.gmra.mxu0 %v2404_v61  ;;  %v3905_v61 = vld [vmem:[%s5049_s3 + $0x220] sm:$0xff]   ;;  %v3906_v54 = vld [vmem:[%s5049_s3 + $0x218] sm:$0xff]  }
 0x233   :  { %3452 = vmatpush3.bf16.msra.mxu1 %v3862_v51  ;;  %3672 = vmatpush3.bf16.msra.mxu0 %v3863_v60 }
 0x234   :  { %3453 = vmatprep.subr.bf16.mxu1 %v3935_v43  ;;  %3673 = vmatprep.subr.bf16.mxu0 %v3935_v43 }
 0x235   :  { %3467 = vmatprep.mubr.msk.bf16.mxu1 %vm3936_vm2, %v3935_v43  ;;  %3687 = vmatprep.mubr.msk.bf16.mxu0 %vm3936_vm2, %v3935_v43 }
 0x237   :  { %3454 = vmatpush3.bf16.msra.mxu1 %v3864_v46  ;;  %3674 = vmatpush3.bf16.msra.mxu0 %v3865_v23  ;;  %v3907_v46 = vld [vmem:[%s5049_s3 + $0x210] sm:$0xff]   ;;  %v3908_v23 = vld [vmem:[%s5049_s3 + $0x208] sm:$0xff]  }
 0x238   :  { %3455 = vmatprep.subr.bf16.mxu1 %v3935_v43  ;;  %3675 = vmatprep.subr.bf16.mxu0 %v3935_v43 }
 0x23b   :  { %3456 = vmatpush3.bf16.msra.mxu1 %v3866_v49  ;;  %3676 = vmatpush3.bf16.msra.mxu0 %v3867_v21  ;;  %v3909_v49 = vld [vmem:[%s5049_s3 + $0x200] sm:$0xff]   ;;  %v3910_v21 = vld [vmem:[%s5049_s3 + $0x2b8] sm:$0xff]  }
 0x23c   :  { %3457 = vmatprep.subr.bf16.mxu1 %v3935_v43  ;;  %3677 = vmatprep.subr.bf16.mxu0 %v3935_v43 }
 0x23f   :  { %3458 = vmatpush3.bf16.msra.mxu1 %v3868_v42  ;;  %3678 = vmatpush3.bf16.msra.mxu0 %v3869_v58 }
 0x240   :  { %3459 = vmatprep.subr.bf16.mxu1 %v3935_v43  ;;  %3679 = vmatprep.subr.bf16.mxu0 %v3935_v43 }
 0x243   :  { %3460 = vmatpush3.bf16.msra.mxu1 %v3870_v11  ;;  %3680 = vmatpush3.bf16.msra.mxu0 %v3871_v0  ;;  %v3911_v0 = vld [vmem:[%s5049_s3 + $0x2b0] sm:$0xff]  }
 0x244   :  { %3461 = vmatprep.subr.bf16.mxu1 %v3935_v43  ;;  %3681 = vmatprep.subr.bf16.mxu0 %v3935_v43 }
 0x247   :  { %3462 = vmatpush3.bf16.msra.mxu1 %v3872_v1  ;;  %3682 = vmatpush3.bf16.msra.mxu0 %v3873_v48 }
 0x248   :  { %3463 = vmatprep.subr.bf16.mxu1 %v3935_v43  ;;  %3683 = vmatprep.subr.bf16.mxu0 %v3935_v43 }
 0x24b   :  { %3464 = vmatpush3.bf16.msra.mxu1 %v3874_v10  ;;  %3684 = vmatpush3.bf16.msra.mxu0 %v3875_v12 }
 0x24c   :  { %3465 = vmatprep.subr.bf16.mxu1 %v3935_v43  ;;  %3685 = vmatprep.subr.bf16.mxu0 %v3935_v43 }
 0x24f   :  { %3466 = vmatpush3.bf16.msra.mxu1 %v3876_v44  ;;  %3686 = vmatpush3.bf16.msra.mxu0 %v3877_v14 }
 0x250   :  { %3471 = vmatprep.subr.bf16.mxu1 %v3935_v43 }
 0x252   :  { %3468 = vmatmul.mubr.bf16.vlgmr.msra.gmra.mxu1 %v4493_v62  ;;  %3688 = vmatmul.mubr.bf16.vlgmr.msra.gmra.mxu0 %v2619_v63  ;;  %v3889_v62 = vld [vmem:[%s5049_s3 + $0x1a0] sm:$0xff]   ;;  %v3914_v63 = vld [vmem:[%s5049_s3 + $0x298] sm:$0xff]  }
 0x253   :  { %3472 = vmatpush3.bf16.msra.mxu1 %v3878_v47  ;;  %3487 = vmatprep.mubr.msk.bf16.mxu1 %vm3936_vm2, %v3935_v43  ;;  %v3913_v47 = vld [vmem:[%s5049_s3 + $0x2a0] sm:$0xff]  }
 0x254   :  { %3473 = vmatprep.subr.bf16.mxu1 %v3935_v43 }
 0x257   :  { %3474 = vmatpush3.bf16.msra.mxu1 %v3879_v25  ;;  %v3915_v25 = vld [vmem:[%s5049_s3 + $0x290] sm:$0xff]  }
 0x258   :  { %3475 = vmatprep.subr.bf16.mxu1 %v3935_v43 }
 0x25b   :  { %3476 = vmatpush3.bf16.msra.mxu1 %v3880_v27  ;;  %v3916_v27 = vld [vmem:[%s5049_s3 + $0x288] sm:$0xff]  }
 0x25c   :  { %3477 = vmatprep.subr.bf16.mxu1 %v3935_v43 }
 0x25f   :  { %3478 = vmatpush3.bf16.msra.mxu1 %v3881_v4  ;;  %v3917_v4 = vld [vmem:[%s5049_s3 + $0x280] sm:$0xff]  }
 0x260   :  { %3479 = vmatprep.subr.bf16.mxu1 %v3935_v43 }
 0x263   :  { %3480 = vmatpush3.bf16.msra.mxu1 %v3882_v41  ;;  %v3918_v41 = vld [vmem:[%s5049_s3 + $0x338] sm:$0xff]  }
 0x264   :  { %3481 = vmatprep.subr.bf16.mxu1 %v3935_v43 }
 0x267   :  { %3482 = vmatpush3.bf16.msra.mxu1 %v3883_v6 }
 0x268   :  { %3483 = vmatprep.subr.bf16.mxu1 %v3935_v43 }
 0x26b   :  { %3484 = vmatpush3.bf16.msra.mxu1 %v3884_v20 }
 0x26c   :  { %3485 = vmatprep.subr.bf16.mxu1 %v3935_v43 }
 0x26f   :  { %3486 = vmatpush3.bf16.msra.mxu1 %v3885_v28 }
 0x270   :  { %3491 = vmatprep.subr.bf16.mxu1 %v3935_v43 }
 0x272   :  { %3488 = vmatmul.mubr.bf16.vlgmr.msra.gmra.mxu1 %v1544_v8 }
 0x273   :  { %3492 = vmatpush3.bf16.msra.mxu1 %v3886_v50  ;;  %3507 = vmatprep.mubr.msk.bf16.mxu1 %vm3936_vm2, %v3935_v43  ;;  %v3919_v50 = vld [vmem:[%s5049_s3 + $0x330] sm:$0xff]  }
 0x274   :  { %3493 = vmatprep.subr.bf16.mxu1 %v3935_v43 }
 0x277   :  { %3494 = vmatpush3.bf16.msra.mxu1 %v3887_v29 }
 0x278   :  { %3495 = vmatprep.subr.bf16.mxu1 %v3935_v43 }
 0x27b   :  { %3496 = vmatpush3.bf16.msra.mxu1 %v3888_v33 }
 0x27c   :  { %3497 = vmatprep.subr.bf16.mxu1 %v3935_v43 }
 0x27f   :  { %3498 = vmatpush3.bf16.msra.mxu1 %v3889_v62 }
 0x280   :  { %3499 = vmatprep.subr.bf16.mxu1 %v3935_v43 }
 0x283   :  { %3500 = vmatpush3.bf16.msra.mxu1 %v3890_v36 }
 0x284   :  { %3501 = vmatprep.subr.bf16.mxu1 %v3935_v43 }
 0x287   :  { %3502 = vmatpush3.bf16.msra.mxu1 %v3891_v30 }
 0x288   :  { %3503 = vmatprep.subr.bf16.mxu1 %v3935_v43 }
 0x28b   :  { %3504 = vmatpush3.bf16.msra.mxu1 %v3892_v24  ;;  %v3921_v24 = vld [vmem:[%s5049_s3 + $0x320] sm:$0xff]  }
 0x28c   :  { %3505 = vmatprep.subr.bf16.mxu1 %v3935_v43 }
 0x28f   :  { %3506 = vmatpush3.bf16.msra.mxu1 %v3893_v2  ;;  %v3922_v2 = vld [vmem:[%s5049_s3 + $0x318] sm:$0xff]  }
 0x290   :  { %3511 = vmatprep.subr.bf16.mxu1 %v3935_v43 }
 0x292   :  { %3508 = vmatmul.mubr.bf16.vlgmr.msra.gmra.mxu1 %v4513_v13  ;;  %v1111_v16 = vpop.f32.mrf.mxu1 }
 0x293   :  { %3512 = vmatpush3.bf16.msra.mxu1 %v3894_v26  ;;  %3527 = vmatprep.mubr.msk.bf16.mxu1 %vm3936_vm2, %v3935_v43  ;;  %v3923_v26 = vld [vmem:[%s5049_s3 + $0x310] sm:$0xff]  }
 0x294   :  { %v3389_v17 = vpop.f32.mrf.mxu1  ;;  %3513 = vmatprep.subr.bf16.mxu1 %v3935_v43 }
 0x295   :  { %v3926_v17 = vld [vmem:[%s5049_s3 + $0x3b8] sm:$0xff]  }
 0x296   :  { %v1114_v9 = vpop.f32.mrf.mxu1 }
 0x297   :  { %3514 = vmatpush3.bf16.msra.mxu1 %v3895_v52  ;;  %v3925_v52 = vld [vmem:[%s5049_s3 + $0x300] sm:$0xff]  }
 0x298   :  { %v3390_v31 = vpop.f32.mrf.mxu1  ;;  %3515 = vmatprep.subr.bf16.mxu1 %v3935_v43 }
 0x29b   :  { %3516 = vmatpush3.bf16.msra.mxu1 %v3896_v5 }
 0x29c   :  { %3517 = vmatprep.subr.bf16.mxu1 %v3935_v43 }
 0x29f   :  { %3518 = vmatpush3.bf16.msra.mxu1 %v3897_v39  ;;  %v3927_v39 = vld [vmem:[%s5049_s3 + $0x3b0] sm:$0xff]  }
 0x2a0   :  { %3519 = vmatprep.subr.bf16.mxu1 %v3935_v43 }
 0x2a3   :  { %3520 = vmatpush3.bf16.msra.mxu1 %v3898_v57 }
 0x2a4   :  { %3521 = vmatprep.subr.bf16.mxu1 %v3935_v43 }
 0x2a7   :  { %3522 = vmatpush3.bf16.msra.mxu1 %v3899_v40 }
 0x2a8   :  { %3523 = vmatprep.subr.bf16.mxu1 %v3935_v43 }
 0x2ab   :  { %3524 = vmatpush3.bf16.msra.mxu1 %v3900_v55 }
 0x2ac   :  { %3525 = vmatprep.subr.bf16.mxu1 %v3935_v43 }
 0x2af   :  { %3526 = vmatpush3.bf16.msra.mxu1 %v3901_v34 }
 0x2b0   :  { %3531 = vmatprep.subr.bf16.mxu1 %v3935_v43 }
 0x2b2   :  { %v1199_v18 = vpop.f32.mrf.mxu1  ;;  %3528 = vmatmul.mubr.bf16.vlgmr.msra.gmra.mxu1 %v1759_v45  ;;  %v4887_v32 = vpop.f32.mrf.mxu0 }
 0x2b3   :  { %v1200_v19 = vadd.f32 %v1199_v18, %v1111_v16  ;;  %3532 = vmatpush3.bf16.msra.mxu1 %v3902_v35  ;;  %3547 = vmatprep.mubr.msk.bf16.mxu1 %vm3936_vm2, %v3935_v43  ;;  %v3924_v16 = vld [vmem:[%s5049_s3 + $0x308] sm:$0xff]   ;;  %v3929_v18 = vld [vmem:[%s5049_s3 + $0x3a0] sm:$0xff]  }
 0x2b4   :  { %v3409_v15 = vpop.f32.mrf.mxu1  ;;  %v3569_v7 = vpop.f32.mrf.mxu0  ;;  %3533 = vmatprep.subr.bf16.mxu1 %v3935_v43 }
 0x2b5   :  { %v3932_v15 = vld [vmem:[%s5049_s3 + $0x388] sm:$0xff]   ;;  %v3933_v7 = vld [vmem:[%s5049_s3 + $0x380] sm:$0xff]  }
 0x2b6   :  { %v1202_v13 = vpop.f32.mrf.mxu1  ;;  %v2061_v3 = vpop.f32.mrf.mxu0 }
 0x2b7   :  { %3534 = vmatpush3.bf16.msra.mxu1 %v3903_v59  ;;  %v3931_v59 = vld [vmem:[%s5049_s3 + $0x390] sm:$0xff]  }
 0x2b8   :  { %v3410_v51 = vpop.f32.mrf.mxu1  ;;  %v3570_v60 = vpop.f32.mrf.mxu0  ;;  %3535 = vmatprep.subr.bf16.mxu1 %v3935_v43 }
 0x2bb   :  { %3536 = vmatpush3.bf16.msra.mxu1 %v3904_v37 }
 0x2bc   :  { %3537 = vmatprep.subr.bf16.mxu1 %v3935_v43 }
 0x2bf   :  { %3538 = vmatpush3.bf16.msra.mxu1 %v3905_v61 }
 0x2c0   :  { %3539 = vmatprep.subr.bf16.mxu1 %v3935_v43 }
 0x2c3   :  { %3540 = vmatpush3.bf16.msra.mxu1 %v3906_v54 }
 0x2c4   :  { %3541 = vmatprep.subr.bf16.mxu1 %v3935_v43 }
 0x2c7   :  { %3542 = vmatpush3.bf16.msra.mxu1 %v3907_v46 }
 0x2c8   :  { %3543 = vmatprep.subr.bf16.mxu1 %v3935_v43 }
 0x2cb   :  { %3544 = vmatpush3.bf16.msra.mxu1 %v3908_v23 }
 0x2cc   :  { %3545 = vmatprep.subr.bf16.mxu1 %v3935_v43 }
 0x2cf   :  { %3546 = vmatpush3.bf16.msra.mxu1 %v3909_v49 }
 0x2d0   :  { %3571 = vmatprep.subr.bf16.mxu1 %v3935_v43 }
 0x2d2   :  { %v1304_v42 = vpop.f32.mrf.mxu1  ;;  %3548 = vmatmul.mubr.bf16.vlgmr.msra.gmra.mxu1 %v4533_v56  ;;  %v4924_v58 = vpop.f32.mrf.mxu0  ;;  %v3912_v56 = vld [vmem:[%s5049_s3 + $0x2a8] sm:$0xff]  }
 0x2d3   :  { %v1310_v11 = vadd.f32 %v1304_v42, %v1200_v19  ;;  %3572 = vmatpush3.bf16.msra.mxu1 %v3910_v21  ;;  %3587 = vmatprep.mubr.msk.bf16.mxu1 %vm3936_vm2, %v3935_v43  ;;  %v3930_v19 = vld [vmem:[%s5049_s3 + $0x398] sm:$0xff]  }
 0x2d4   :  { %v3429_v1 = vpop.f32.mrf.mxu1  ;;  %v3609_v48 = vpop.f32.mrf.mxu0  ;;  %3573 = vmatprep.subr.bf16.mxu1 %v3935_v43 }
 0x2d6   :  { %v1307_v10 = vpop.f32.mrf.mxu1  ;;  %v2276_v12 = vpop.f32.mrf.mxu0 }
 0x2d7   :  { %3574 = vmatpush3.bf16.msra.mxu1 %v3911_v0 }
 0x2d8   :  { %v3430_v44 = vpop.f32.mrf.mxu1  ;;  %v3610_v14 = vpop.f32.mrf.mxu0  ;;  %3575 = vmatprep.subr.bf16.mxu1 %v3935_v43 }
 0x2db   :  { %3576 = vmatpush3.bf16.msra.mxu1 %v3912_v56 }
 0x2dc   :  { %3577 = vmatprep.subr.bf16.mxu1 %v3935_v43 }
 0x2df   :  { %3578 = vmatpush3.bf16.msra.mxu1 %v3913_v47 }
 0x2e0   :  { %3579 = vmatprep.subr.bf16.mxu1 %v3935_v43 }
 0x2e3   :  { %3580 = vmatpush3.bf16.msra.mxu1 %v3914_v63 }
 0x2e4   :  { %3581 = vmatprep.subr.bf16.mxu1 %v3935_v43 }
 0x2e7   :  { %3582 = vmatpush3.bf16.msra.mxu1 %v3915_v25 }
 0x2e8   :  { %3583 = vmatprep.subr.bf16.mxu1 %v3935_v43 }
 0x2eb   :  { %3584 = vmatpush3.bf16.msra.mxu1 %v3916_v27 }
 0x2ec   :  { %3585 = vmatprep.subr.bf16.mxu1 %v3935_v43 }
 0x2ef   :  { %3586 = vmatpush3.bf16.msra.mxu1 %v3917_v4 }
 0x2f0   :  { %3611 = vmatprep.subr.bf16.mxu1 %v3935_v43 }
 0x2f2   :  { %v1413_v6 = vpop.f32.mrf.mxu1  ;;  %3588 = vmatmul.mubr.bf16.vlgmr.msra.gmra.mxu1 %v4566_v38  ;;  %v4961_v20 = vpop.f32.mrf.mxu0  ;;  %v3920_v38 = vld [vmem:[%s5049_s3 + $0x328] sm:$0xff]  }
 0x2f3   :  { %v1419_v28 = vadd.f32 %v1413_v6, %v1310_v11  ;;  %3612 = vmatpush3.bf16.msra.mxu1 %v3918_v41  ;;  %3627 = vmatprep.mubr.msk.bf16.mxu1 %vm3936_vm2, %v3935_v43 }
 0x2f4   :  { %v3449_v8 = vpop.f32.mrf.mxu1  ;;  %v3649_v29 = vpop.f32.mrf.mxu0  ;;  %3613 = vmatprep.subr.bf16.mxu1 %v3935_v43 }
 0x2f6   :  { %v1416_v33 = vpop.f32.mrf.mxu1  ;;  %v2491_v62 = vpop.f32.mrf.mxu0 }
 0x2f7   :  { %3614 = vmatpush3.bf16.msra.mxu1 %v3919_v50 }
 0x2f8   :  { %v3450_v36 = vpop.f32.mrf.mxu1  ;;  %v3650_v30 = vpop.f32.mrf.mxu0  ;;  %3615 = vmatprep.subr.bf16.mxu1 %v3935_v43 }
 0x2f9   :  { %v3224_v36 = vld [vmem:[%s5052_s4] ss:$0 sm:$0xff] }
 0x2fb   :  { %3616 = vmatpush3.bf16.msra.mxu1 %v3920_v38 }
 0x2fc   :  { %3617 = vmatprep.subr.bf16.mxu1 %v3935_v43 }
 0x2ff   :  { %3618 = vmatpush3.bf16.msra.mxu1 %v3921_v24 }
 0x300   :  { %3619 = vmatprep.subr.bf16.mxu1 %v3935_v43 }
 0x303   :  { %3620 = vmatpush3.bf16.msra.mxu1 %v3922_v2 }
 0x304   :  { %3621 = vmatprep.subr.bf16.mxu1 %v3935_v43 }
 0x307   :  { %3622 = vmatpush3.bf16.msra.mxu1 %v3923_v26 }
 0x308   :  { %3623 = vmatprep.subr.bf16.mxu1 %v3935_v43 }
 0x30b   :  { %3624 = vmatpush3.bf16.msra.mxu1 %v3924_v16 }
 0x30c   :  { %3625 = vmatprep.subr.bf16.mxu1 %v3935_v43 }
 0x30f   :  { %3626 = vmatpush3.bf16.msra.mxu1 %v3925_v52 }
 0x310   :  { %3651 = vmatprep.subr.bf16.mxu1 %v3935_v43 }
 0x312   :  { %v1519_v9 = vpop.f32.mrf.mxu1  ;;  %3628 = vmatmul.mubr.bf16.vlgmr.msra.gmra.mxu1 %v4594_v22  ;;  %v4998_v5 = vpop.f32.mrf.mxu0  ;;  %v3928_v22 = vld [vmem:[%s5049_s3 + $0x3a8] sm:$0xff]  }
 0x313   :  { %v1525_v31 = vadd.f32 %v1519_v9, %v1419_v28  ;;  %3652 = vmatpush3.bf16.msra.mxu1 %v3926_v17  ;;  %3667 = vmatprep.mubr.msk.bf16.mxu1 %vm3936_vm2, %v3935_v43 }
 0x314   :  { %v3469_v57 = vpop.f32.mrf.mxu1  ;;  %v3689_v40 = vpop.f32.mrf.mxu0  ;;  %3653 = vmatprep.subr.bf16.mxu1 %v3935_v43 }
 0x316   :  { %v1522_v55 = vpop.f32.mrf.mxu1  ;;  %v2706_v34 = vpop.f32.mrf.mxu0 }
 0x317   :  { %3654 = vmatpush3.bf16.msra.mxu1 %v3927_v39 }
 0x318   :  { %v3470_v35 = vpop.f32.mrf.mxu1  ;;  %v3690_v45 = vpop.f32.mrf.mxu0  ;;  %3655 = vmatprep.subr.bf16.mxu1 %v3935_v43 }
 0x31b   :  { %3656 = vmatpush3.bf16.msra.mxu1 %v3928_v22 }
 0x31c   :  { %3657 = vmatprep.subr.bf16.mxu1 %v3935_v43 }
 0x31f   :  { %3658 = vmatpush3.bf16.msra.mxu1 %v3929_v18 }
 0x320   :  { %3659 = vmatprep.subr.bf16.mxu1 %v3935_v43 }
 0x323   :  { %3660 = vmatpush3.bf16.msra.mxu1 %v3930_v19 }
 0x324   :  { %3661 = vmatprep.subr.bf16.mxu1 %v3935_v43 }
 0x327   :  { %3662 = vmatpush3.bf16.msra.mxu1 %v3931_v59 }
 0x328   :  { %3663 = vmatprep.subr.bf16.mxu1 %v3935_v43 }
 0x32b   :  { %3664 = vmatpush3.bf16.msra.mxu1 %v3932_v15 }
 0x32c   :  { %3665 = vmatprep.subr.bf16.mxu1 %v3935_v43  ;;  %v12_v43 = vstv %s5051_s6 }
 0x32d   :  { %13 = vst [vmem:[#allocation2] sm:$0x1] %v12_v43 }
 0x32f   :  { %3666 = vmatpush3.bf16.msra.mxu1 %v3933_v7 }
 0x332   :  { %v1628_v13 = vpop.f32.mrf.mxu1  ;;  %3668 = vmatmul.mubr.bf16.vlgmr.msra.gmra.mxu1 %v4618_v53 }
 0x333   :  { %v1634_v3 = vadd.f32 %v1628_v13, %v1525_v31 }
 0x334   :  { %v3489_v37 = vpop.f32.mrf.mxu1 }
 0x336   :  { %v1631_v51 = vpop.f32.mrf.mxu1 }
 0x338   :  { %v3490_v60 = vpop.f32.mrf.mxu1 }
 0x352   :  { %v1734_v61 = vpop.f32.mrf.mxu1 }
 0x353   :  { %v1740_v54 = vadd.f32 %v1734_v61, %v1634_v3 }
 0x354   :  { %v3509_v46 = vpop.f32.mrf.mxu1 }
 0x356   :  { %v1737_v23 = vpop.f32.mrf.mxu1 }
 0x358   :  { %v3510_v49 = vpop.f32.mrf.mxu1 }
 0x372   :  { %v1843_v21 = vpop.f32.mrf.mxu1 }
 0x373   :  { %v1849_v42 = vadd.f32 %v1843_v21, %v1740_v54 }
 0x374   :  { %v3529_v11 = vpop.f32.mrf.mxu1 }
 0x376   :  { %v1846_v0 = vpop.f32.mrf.mxu1 }
 0x378   :  { %v3530_v1 = vpop.f32.mrf.mxu1 }
 0x392   :  { %v1949_v53 = vpop.f32.mrf.mxu1 }
 0x393   :  { %v1955_v48 = vadd.f32 %v1949_v53, %v1849_v42 }
 0x394   :  { %v3549_v10 = vpop.f32.mrf.mxu1 }
 0x395   :  { %v2064_v6 = vadd.f32 %v4887_v32, %v1955_v48  ;;  %v3225_v32 = vld [vmem:[%s5053_s5] ss:$0 sm:$0xff] }
 0x396   :  { %v1952_v12 = vpop.f32.mrf.mxu1 }
 0x398   :  { %v3550_v56 = vpop.f32.mrf.mxu1 }
 0x3b2   :  { %v2164_v44 = vpop.f32.mrf.mxu1 }
 0x3b3   :  { %v2170_v28 = vadd.f32 %v2164_v44, %v2064_v6 }
 0x3b4   :  { %v3589_v14 = vpop.f32.mrf.mxu1 }
 0x3b5   :  { %v2279_v50 = vadd.f32 %v4924_v58, %v2170_v28 }
 0x3b6   :  { %v2167_v47 = vpop.f32.mrf.mxu1 }
 0x3b8   :  { %v3590_v63 = vpop.f32.mrf.mxu1 }
 0x3d2   :  { %v2379_v25 = vpop.f32.mrf.mxu1 }
 0x3d3   :  { %v2385_v8 = vadd.f32 %v2379_v25, %v2279_v50 }
 0x3d4   :  { %v3629_v27 = vpop.f32.mrf.mxu1 }
 0x3d5   :  { %v2494_v29 = vadd.f32 %v4961_v20, %v2385_v8  ;;  %v3226_v20 = vld [vmem:[#allocation2] ss:$0 sm:$0xff] }
 0x3d6   :  { %v2382_v4 = vpop.f32.mrf.mxu1 }
 0x3d8   :  { %v3630_v41 = vpop.f32.mrf.mxu1 }
 0x3f2   :  { %v2594_v33 = vpop.f32.mrf.mxu1 }
 0x3f3   :  { %v2600_v62 = vadd.f32 %v2594_v33, %v2494_v29 }
 0x3f4   :  { %v3669_v38 = vpop.f32.mrf.mxu1 }
 0x3f5   :  { %v2709_v30 = vadd.f32 %v4998_v5, %v2600_v62 }
 0x3f6   :  { %v2597_v24 = vpop.f32.mrf.mxu1 }
 0x3f7   :  { %v2717_v2 = vadd.f32 %v3224_v36, %v2709_v30 }
 0x3f8   :  { %v3670_v26 = vpop.f32.mrf.mxu1 }
 0x3f9   :  { %v2718_v58 = vmax.f32 %v2717_v2, 0.0 }
 0x3fb   :  { %v2726_v16 = vmul.f32 %v3225_v32, %v2718_v58 }
 0x3fd   :  { %2727 = vadd.xlane.f32.xlu0 %v2726_v16 }
 0x486   :  { %v2728_v52 = vpop.xlane.xlu0 %2727 }
 0x487   :  { %v2736_v17 = vadd.f32 %v3226_v20, %v2728_v52 }
 0x489   :  { %2738 = vst.msk [vmem:[%s5054_s7] sm:$0xff] %vm2737_vm3, %v2736_v17 }

</bundles_post_ra>
